<compile_context>
chip_gen: v5e
topology: v5e:2x2
jax: 0.10.0
libtpu: 0.0.40
codegen_flags: <defaults>
</compile_context>

<pallas_src>
import functools

import jax
import jax.numpy as jnp
from jax.experimental import pallas as pl
from jax.experimental.pallas import tpu as pltpu


def _round_up(n, m):
    return ((n + m - 1) // m) * m


def _choose_tb(B):
    """Largest 128-multiple batch tile (<= 1024 rows) that still yields >= 2
    grid steps whenever the batch has more than one 128-row block (keeps both
    v7x TensorCores busy and amortizes per-step pipeline overhead)."""
    nblk = max(1, _round_up(B, 128) // 128)     # number of 128-row blocks
    if nblk == 1:
        return 128
    per_step = min(8, -(-nblk // 2))            # ceil(nblk/2), capped at 1024 rows
    return per_step * 128


def mlp_kernel(x_ref,
               w1_ref, b1_ref,
               w2_ref, b2_ref,
               w3_ref, b3_ref,
               w4_ref, b4_ref,
               o_ref):
    # Fused 4-layer MLP on one batch tile. bf16 MXU inputs, f32 accumulation,
    # bias-add / ReLU in f32 (safe on v5e), cast back to bf16 for next matmul.
    x = x_ref[...].astype(jnp.bfloat16)   # in-kernel cast (no wrapper pass)
    h = jnp.dot(x, w1_ref[...], preferred_element_type=jnp.float32)
    h = jnp.maximum(h + b1_ref[...], 0.0)

    h = jnp.dot(h.astype(jnp.bfloat16), w2_ref[...],
                preferred_element_type=jnp.float32)
    h = jnp.maximum(h + b2_ref[...], 0.0)

    h = jnp.dot(h.astype(jnp.bfloat16), w3_ref[...],
                preferred_element_type=jnp.float32)
    h = jnp.maximum(h + b3_ref[...], 0.0)

    h = jnp.dot(h.astype(jnp.bfloat16), w4_ref[...],
                preferred_element_type=jnp.float32)
    o_ref[...] = h + b4_ref[...]


def prepare_params(params):
    """One-time parameter prep (hoisted out of the per-call path).

    Zero-pads every feature width up to a multiple of 128 lanes
    (400->512, 200->256, 100->128, 10->128), casts weights to bf16 for the
    MXU and keeps biases f32 as (1, N) rows. Padding is exact: padded hidden
    units see zero weights + zero bias, stay zero through ReLU, and padded
    output columns are sliced off.

    Returns (prepped_tuple, true_output_dim).
    """
    (w1, b1), (w2, b2), (w3, b3), (w4, b4) = params
    d1 = _round_up(w1.shape[1], 128)   # 400 -> 512
    d2 = _round_up(w2.shape[1], 128)   # 200 -> 256
    d3 = _round_up(w3.shape[1], 128)   # 100 -> 128
    d4 = _round_up(w4.shape[1], 128)   # 10  -> 128

    def pad_w(w, rows, cols):
        wp = jnp.pad(w, ((0, rows - w.shape[0]), (0, cols - w.shape[1])))
        return wp.astype(jnp.bfloat16)

    def pad_b(b, cols):
        return jnp.pad(b, (0, cols - b.shape[0])).reshape(1, cols).astype(jnp.float32)

    prepped = (
        pad_w(w1, w1.shape[0], d1), pad_b(b1, d1),
        pad_w(w2, d1, d2),          pad_b(b2, d2),
        pad_w(w3, d2, d3),          pad_b(b3, d3),
        pad_w(w4, d3, d4),          pad_b(b4, d4),
    )
    return jax.tree_util.tree_map(jax.block_until_ready, prepped), w4.shape[1]


@functools.partial(jax.jit, static_argnames=("tb",))
def _mlp_forward_padded(x, prepped, *, tb):
    """x: (B, 784) float32. prepped: output of prepare_params (bf16 weights,
    f32 biases, all lane-padded). Returns padded (B_pad, d4) f32 logits."""
    w1, b1, w2, b2, w3, b3, w4, b4 = prepped
    B, D_in = x.shape
    d1, d2, d3, d4 = w1.shape[1], w2.shape[1], w3.shape[1], w4.shape[1]

    # Pad the batch to a tile multiple (f32; kernel does the bf16 cast).
    B_pad = _round_up(max(B, tb), tb)
    xp = jnp.pad(x, ((0, B_pad - B), (0, 0)))

    grid = (B_pad // tb,)

    def resident(arr):
        # Whole-array block, identical block index for every batch tile:
        # weights/biases stay VMEM-resident across grid steps (~1.2 MiB bf16).
        return pl.BlockSpec(arr.shape, lambda i: (0, 0))

    flops = 2 * B_pad * (D_in * d1 + d1 * d2 + d2 * d3 + d3 * d4)
    bytes_accessed = (
        xp.size * 4 + B_pad * d4 * 4
        + (w1.size + w2.size + w3.size + w4.size) * 2
        + (b1.size + b2.size + b3.size + b4.size) * 4
    )

    return pl.pallas_call(
        mlp_kernel,
        out_shape=jax.ShapeDtypeStruct((B_pad, d4), jnp.float32),
        grid_spec=pltpu.PrefetchScalarGridSpec(
            num_scalar_prefetch=0,
            grid=grid,
            in_specs=[
                pl.BlockSpec((tb, D_in), lambda i: (i, 0)),  # x batch tile
                resident(w1), resident(b1),
                resident(w2), resident(b2),
                resident(w3), resident(b3),
                resident(w4), resident(b4),
            ],
            out_specs=pl.BlockSpec((tb, d4), lambda i: (i, 0)),
        ),
        compiler_params=pltpu.CompilerParams(
            dimension_semantics=("parallel",),
            # Right-sized: ~15 MiB footprint even at tb=1024; leaves headroom
            # on v7x's 64 MiB VMEM.
            vmem_limit_bytes=24 * 1024 * 1024,
        ),
        cost_estimate=pl.CostEstimate(
            flops=flops, transcendentals=0, bytes_accessed=bytes_accessed),
    )(xp, w1, b1, w2, b2, w3, b3, w4, b4)


def mlp_forward(x, prepped, d_out):
    """Full forward: adaptive batch tile, then strip batch/lane padding."""
    B = x.shape[0]
    tb = _choose_tb(B)
    out = _mlp_forward_padded(x, prepped, tb=tb)
    return out[:B, :d_out]


def init_params(key):
    """PyTorch-Linear-style init: U[-1/sqrt(fan_in), 1/sqrt(fan_in)]."""
    dims = [28 * 28, 400, 200, 100, 10]
    params = []
    for i in range(len(dims) - 1):
        fan_in, fan_out = dims[i], dims[i + 1]
        key, kw, kb = jax.random.split(key, 3)
        bound = 1.0 / jnp.sqrt(jnp.float32(fan_in))
        w = jax.random.uniform(kw, (fan_in, fan_out), jnp.float32, -bound, bound)
        b = jax.random.uniform(kb, (fan_out,), jnp.float32, -bound, bound)
        params.append((w, b))
    return tuple(params)


def mlp_reference_f32(x, params):
    h = x
    for i, (w, b) in enumerate(params):
        h = h @ w + b
        if i < len(params) - 1:
            h = jnp.maximum(h, 0.0)
    return h


def mlp_reference_bf16(x, params):
    # Mirrors the kernel's precision: bf16 MXU inputs, f32 accumulation.
    h = x.astype(jnp.bfloat16)
    for i, (w, b) in enumerate(params):
        h = jnp.dot(h, w.astype(jnp.bfloat16),
                    preferred_element_type=jnp.float32) + b
        if i < len(params) - 1:
            h = jnp.maximum(h, 0.0).astype(jnp.bfloat16)
    return h


if __name__ == "__main__":
    key = jax.random.PRNGKey(0)
    key, kx = jax.random.split(key)
    params = init_params(key)

    # One-time parameter prep (hoisted out of the per-call path).
    prepped, d_out = prepare_params(params)

    # Batch = 100 like the reference script (pads to one 128-row tile).
    x_small = jax.random.normal(kx, (100, 28 * 28), jnp.float32)
    out_small = jax.block_until_ready(mlp_forward(x_small, prepped, d_out))
    assert out_small.shape == (100, 10)
    ref_bf16 = mlp_reference_bf16(x_small, params)
    ref_f32 = mlp_reference_f32(x_small, params)
    assert jnp.allclose(out_small, ref_bf16, atol=1e-2, rtol=1e-2), \
        "mismatch vs bf16-matched reference"
    assert jnp.allclose(out_small, ref_f32, atol=5e-2, rtol=5e-2), \
        "mismatch vs f32 reference"

    # Larger batch -> adaptive tb=256, grid=2 (exercises the parallel batch
    # axis / v7x megacore sharding).
    key, kx2 = jax.random.split(key)
    x_big = jax.random.normal(kx2, (512, 28 * 28), jnp.float32)
    out_big = jax.block_until_ready(mlp_forward(x_big, prepped, d_out))
    assert out_big.shape == (512, 10)
    ref_big = mlp_reference_bf16(x_big, params)
    assert jnp.allclose(out_big, ref_big, atol=1e-2, rtol=1e-2), \
        "mismatch vs bf16-matched reference (batch=512)"

    # Non-tile-multiple batch -> pad path with >=2 grid steps.
    key, kx3 = jax.random.split(key)
    x_odd = jax.random.normal(kx3, (300, 28 * 28), jnp.float32)
    out_odd = jax.block_until_ready(mlp_forward(x_odd, prepped, d_out))
    assert out_odd.shape == (300, 10)
    ref_odd = mlp_reference_bf16(x_odd, params)
    assert jnp.allclose(out_odd, ref_odd, atol=1e-2, rtol=1e-2), \
        "mismatch vs bf16-matched reference (batch=300)"

    print("KERNEL_OK")
</pallas_src>

<mosaic_0001>
module attributes {stable_mosaic.version = 11 : i64} {
  func.func @mlp_kernel(%arg0: i32, %arg1: memref<128x784xf32, #tpu.memory_space<vmem>>, %arg2: memref<784x512xbf16, #tpu.memory_space<vmem>>, %arg3: memref<1x512xf32, #tpu.memory_space<vmem>>, %arg4: memref<512x256xbf16, #tpu.memory_space<vmem>>, %arg5: memref<1x256xf32, #tpu.memory_space<vmem>>, %arg6: memref<256x128xbf16, #tpu.memory_space<vmem>>, %arg7: memref<1x128xf32, #tpu.memory_space<vmem>>, %arg8: memref<128x128xbf16, #tpu.memory_space<vmem>>, %arg9: memref<1x128xf32, #tpu.memory_space<vmem>>, %arg10: memref<128x128xf32, #tpu.memory_space<vmem>>) attributes {dimension_semantics = [#tpu.dimension_semantics<parallel>], iteration_bounds = array<i64: 1>, scalar_prefetch = 0 : i64, scratch_operands = 0 : i64, tpu.core_type = #tpu.core_type<tc>, window_params = [{transform_indices = @transform_0, window_bounds = array<i64: 128, 784>}, {pipeline_mode = #tpu.pipeline_mode<synchronous>, transform_indices = @transform_1, window_bounds = array<i64: 784, 512>}, {pipeline_mode = #tpu.pipeline_mode<synchronous>, transform_indices = @transform_2, window_bounds = array<i64: 1, 512>}, {pipeline_mode = #tpu.pipeline_mode<synchronous>, transform_indices = @transform_3, window_bounds = array<i64: 512, 256>}, {pipeline_mode = #tpu.pipeline_mode<synchronous>, transform_indices = @transform_4, window_bounds = array<i64: 1, 256>}, {pipeline_mode = #tpu.pipeline_mode<synchronous>, transform_indices = @transform_5, window_bounds = array<i64: 256, 128>}, {pipeline_mode = #tpu.pipeline_mode<synchronous>, transform_indices = @transform_6, window_bounds = array<i64: 1, 128>}, {pipeline_mode = #tpu.pipeline_mode<synchronous>, transform_indices = @transform_7, window_bounds = array<i64: 128, 128>}, {pipeline_mode = #tpu.pipeline_mode<synchronous>, transform_indices = @transform_8, window_bounds = array<i64: 1, 128>}, {transform_indices = @transform_9, window_bounds = array<i64: 128, 128>}]} {
    %c0 = arith.constant 0 : index
    %c0_0 = arith.constant 0 : index
    %0 = vector.load %arg1[%c0, %c0_0] : memref<128x784xf32, #tpu.memory_space<vmem>>, vector<128x784xf32>
    %1 = arith.truncf %0 : vector<128x784xf32> to vector<128x784xbf16>
    %c0_1 = arith.constant 0 : index
    %c0_2 = arith.constant 0 : index
    %2 = vector.load %arg2[%c0_1, %c0_2] : memref<784x512xbf16, #tpu.memory_space<vmem>>, vector<784x512xbf16>
    %cst = arith.constant dense<0.000000e+00> : vector<128x512xf32>
    %3 = tpu.matmul %1, %2, %cst {dimension_numbers = #tpu.dot_dimension_numbers<[1], [0], [0], [1], [0, 0, 1, 1], [], []>} : vector<128x784xbf16>, vector<784x512xbf16>, vector<128x512xf32> -> vector<128x512xf32>
    %c0_3 = arith.constant 0 : index
    %c0_4 = arith.constant 0 : index
    %4 = vector.load %arg3[%c0_3, %c0_4] : memref<1x512xf32, #tpu.memory_space<vmem>>, vector<1x512xf32>
    %5 = vector.broadcast %4 : vector<1x512xf32> to vector<128x512xf32>
    %6 = arith.addf %3, %5 : vector<128x512xf32>
    %cst_5 = arith.constant 0.000000e+00 : f32
    %7 = vector.broadcast %cst_5 : f32 to vector<128x512xf32>
    %8 = arith.maximumf %6, %7 : vector<128x512xf32>
    %9 = arith.truncf %8 : vector<128x512xf32> to vector<128x512xbf16>
    %c0_6 = arith.constant 0 : index
    %c0_7 = arith.constant 0 : index
    %10 = vector.load %arg4[%c0_6, %c0_7] : memref<512x256xbf16, #tpu.memory_space<vmem>>, vector<512x256xbf16>
    %cst_8 = arith.constant dense<0.000000e+00> : vector<128x256xf32>
    %11 = tpu.matmul %9, %10, %cst_8 {dimension_numbers = #tpu.dot_dimension_numbers<[1], [0], [0], [1], [0, 0, 1, 1], [], []>} : vector<128x512xbf16>, vector<512x256xbf16>, vector<128x256xf32> -> vector<128x256xf32>
    %c0_9 = arith.constant 0 : index
    %c0_10 = arith.constant 0 : index
    %12 = vector.load %arg5[%c0_9, %c0_10] : memref<1x256xf32, #tpu.memory_space<vmem>>, vector<1x256xf32>
    %13 = vector.broadcast %12 : vector<1x256xf32> to vector<128x256xf32>
    %14 = arith.addf %11, %13 : vector<128x256xf32>
    %cst_11 = arith.constant 0.000000e+00 : f32
    %15 = vector.broadcast %cst_11 : f32 to vector<128x256xf32>
    %16 = arith.maximumf %14, %15 : vector<128x256xf32>
    %17 = arith.truncf %16 : vector<128x256xf32> to vector<128x256xbf16>
    %c0_12 = arith.constant 0 : index
    %c0_13 = arith.constant 0 : index
    %18 = vector.load %arg6[%c0_12, %c0_13] : memref<256x128xbf16, #tpu.memory_space<vmem>>, vector<256x128xbf16>
    %cst_14 = arith.constant dense<0.000000e+00> : vector<128x128xf32>
    %19 = tpu.matmul %17, %18, %cst_14 {dimension_numbers = #tpu.dot_dimension_numbers<[1], [0], [0], [1], [0, 0, 1, 1], [], []>} : vector<128x256xbf16>, vector<256x128xbf16>, vector<128x128xf32> -> vector<128x128xf32>
    %c0_15 = arith.constant 0 : index
    %c0_16 = arith.constant 0 : index
    %20 = vector.load %arg7[%c0_15, %c0_16] : memref<1x128xf32, #tpu.memory_space<vmem>>, vector<1x128xf32>
    %21 = vector.broadcast %20 : vector<1x128xf32> to vector<128x128xf32>
    %22 = arith.addf %19, %21 : vector<128x128xf32>
    %cst_17 = arith.constant 0.000000e+00 : f32
    %23 = vector.broadcast %cst_17 : f32 to vector<128x128xf32>
    %24 = arith.maximumf %22, %23 : vector<128x128xf32>
    %25 = arith.truncf %24 : vector<128x128xf32> to vector<128x128xbf16>
    %c0_18 = arith.constant 0 : index
    %c0_19 = arith.constant 0 : index
    %26 = vector.load %arg8[%c0_18, %c0_19] : memref<128x128xbf16, #tpu.memory_space<vmem>>, vector<128x128xbf16>
    %cst_20 = arith.constant dense<0.000000e+00> : vector<128x128xf32>
    %27 = tpu.matmul %25, %26, %cst_20 {dimension_numbers = #tpu.dot_dimension_numbers<[1], [0], [0], [1], [0, 0, 1, 1], [], []>} : vector<128x128xbf16>, vector<128x128xbf16>, vector<128x128xf32> -> vector<128x128xf32>
    %c0_21 = arith.constant 0 : index
    %c0_22 = arith.constant 0 : index
    %28 = vector.load %arg9[%c0_21, %c0_22] : memref<1x128xf32, #tpu.memory_space<vmem>>, vector<1x128xf32>
    %29 = vector.broadcast %28 : vector<1x128xf32> to vector<128x128xf32>
    %30 = arith.addf %27, %29 : vector<128x128xf32>
    %c0_23 = arith.constant 0 : index
    %c0_24 = arith.constant 0 : index
    %31 = vector.load %arg10[%c0_23, %c0_24] : memref<128x128xf32, #tpu.memory_space<vmem>>, vector<128x128xf32>
    tpu.vector_store %arg10[%c0_23, %c0_24], %30 {strides = array<i32>} : memref<128x128xf32, #tpu.memory_space<vmem>>, vector<128x128xf32>,
    return
  }
  func.func @transform_0(%arg0: i32) -> (i32, i32) {
    %c0_i32 = arith.constant 0 : i32
    %c0_i32_0 = arith.constant 0 : i32
    return %arg0, %c0_i32 : i32, i32
  }
  func.func @transform_1(%arg0: i32) -> (i32, i32) {
    %c0_i32 = arith.constant 0 : i32
    %c0_i32_0 = arith.constant 0 : i32
    %c0_i32_1 = arith.constant 0 : i32
    return %c0_i32, %c0_i32_0 : i32, i32
  }
  func.func @transform_2(%arg0: i32) -> (i32, i32) {
    %c0_i32 = arith.constant 0 : i32
    %c0_i32_0 = arith.constant 0 : i32
    %c0_i32_1 = arith.constant 0 : i32
    return %c0_i32, %c0_i32_0 : i32, i32
  }
  func.func @transform_3(%arg0: i32) -> (i32, i32) {
    %c0_i32 = arith.constant 0 : i32
    %c0_i32_0 = arith.constant 0 : i32
    %c0_i32_1 = arith.constant 0 : i32
    return %c0_i32, %c0_i32_0 : i32, i32
  }
  func.func @transform_4(%arg0: i32) -> (i32, i32) {
    %c0_i32 = arith.constant 0 : i32
    %c0_i32_0 = arith.constant 0 : i32
    %c0_i32_1 = arith.constant 0 : i32
    return %c0_i32, %c0_i32_0 : i32, i32
  }
  func.func @transform_5(%arg0: i32) -> (i32, i32) {
    %c0_i32 = arith.constant 0 : i32
    %c0_i32_0 = arith.constant 0 : i32
    %c0_i32_1 = arith.constant 0 : i32
    return %c0_i32, %c0_i32_0 : i32, i32
  }
  func.func @transform_6(%arg0: i32) -> (i32, i32) {
    %c0_i32 = arith.constant 0 : i32
    %c0_i32_0 = arith.constant 0 : i32
    %c0_i32_1 = arith.constant 0 : i32
    return %c0_i32, %c0_i32_0 : i32, i32
  }
  func.func @transform_7(%arg0: i32) -> (i32, i32) {
    %c0_i32 = arith.constant 0 : i32
    %c0_i32_0 = arith.constant 0 : i32
    %c0_i32_1 = arith.constant 0 : i32
    return %c0_i32, %c0_i32_0 : i32, i32
  }
  func.func @transform_8(%arg0: i32) -> (i32, i32) {
    %c0_i32 = arith.constant 0 : i32
    %c0_i32_0 = arith.constant 0 : i32
    %c0_i32_1 = arith.constant 0 : i32
    return %c0_i32, %c0_i32_0 : i32, i32
  }
  func.func @transform_9(%arg0: i32) -> (i32, i32) {
    %c0_i32 = arith.constant 0 : i32
    %c0_i32_0 = arith.constant 0 : i32
    return %arg0, %c0_i32 : i32, i32
  }
}

</mosaic_0001>

<bundles_post_ra>
// kernel: _mlp_forward_padded.1
= control target key start
LH: loop header
LB: loop body
LE: loop exit
PB: predicated region body
PF: predicated region fallthrough
CT: control target
= control target key end

     0   :  { %14 = vsyncpa [#allocation3], 0  ;;  %s8427_s0 = inlined_call_operand.vmem [shape: f32[128,784], index: 0, kind: input, shape index: {}]   ;;  %s8428_s1 = inlined_call_operand.vmem [shape: bf16[784,512], index: 1, kind: input, shape index: {}]   ;;  %s8429_s2 = inlined_call_operand.vmem [shape: f32[1,512], index: 2, kind: input, shape index: {}]   ;;  %s8430_s3 = inlined_call_operand.hbm [shape: bf16[512,256], index: 3, kind: input, shape index: {}]   ;;  %s8431_s4 = inlined_call_operand.vmem [shape: f32[1,256], index: 4, kind: input, shape index: {}]   ;;  %s8432_s5 = inlined_call_operand.hbm [shape: bf16[256,128], index: 5, kind: input, shape index: {}]   ;;  %s8433_s6 = inlined_call_operand.vmem [shape: f32[1,128], index: 6, kind: input, shape index: {}]   ;;  %s8434_s7 = inlined_call_operand.hbm [shape: bf16[128,128], index: 7, kind: input, shape index: {}]   ;;  %s8435_s8 = inlined_call_operand.vmem [shape: f32[1,128], index: 8, kind: input, shape index: {}]   ;;  %s8436_s9 = inlined_call_operand.hbm [shape: f32[128,128], index: 9, kind: output, shape index: {}]  }
   0x1   :  { %15 = vsyncpa [#allocation6], 0  ;;  %s42_s11 = sshll.u32 %s8432_s5, 4  ;;  %s43_s11 = int_to_ptr.hbm [resolvable:$true] %s42_s11 }
   0x2   :  { %16 = vsyncpa [#allocation4], 0  ;;  %s5755_s12 = smov [#allocation5]   ;;  %s27_s16 = sshll.u32 %s8430_s3, 4  ;;  %s28_s16 = int_to_ptr.hbm [resolvable:$true] %s27_s16 }
   0x3   :  { %s44_s13 = sshll.u32 %s5755_s12, 4  ;;  %s5756_s17 = smov 64   ;;  %s45_s13 = int_to_ptr.vmem [resolvable:$true] %s44_s13 }
   0x4   :  { %s5757_s18 = smov 4   ;;  %s5758_s19 = smov [#allocation2]  }
   0x5   :  { %50 = dma.hbm_to_vmem [thread:$0]  %s43_s11, 2048, %s45_s13, [#allocation6], %s5756_s17, %s5756_s17, %s5757_s18  }
   0x6   :  { %s29_s20 = sshll.u32 %s5758_s19, 4  ;;  %s5759_s21 = smov 128   ;;  %s30_s20 = int_to_ptr.vmem [resolvable:$true] %s29_s20 }
   0x7   :  { %s5760_s22 = smov 8   ;;  %s57_s24 = sshll.u32 %s8434_s7, 4  ;;  %s58_s24 = int_to_ptr.hbm [resolvable:$true] %s57_s24 }
   0x8   :  { %35 = dma.hbm_to_vmem [thread:$0]  %s28_s16, 8192, %s30_s20, [#allocation3], %s5759_s21, %s5759_s21, %s5760_s22  }
   0x9   :  { %s5761_s25 = smov [#allocation7]  }
   0xa   :  { %s59_s3 = sshll.u32 %s5761_s25, 4  ;;  %s60_s3 = int_to_ptr.vmem [resolvable:$true] %s59_s3 }
   0xb   :  { %65 = dma.hbm_to_vmem [thread:$0]  %s58_s24, 1024, %s60_s3, [#allocation6], %s5756_s17, %s5756_s17, %s5757_s18  }
   0xc   :  { %5749 = dma.done.wait [#allocation3], 8192  }
   0xd   :  { %5750 = vsyncadd [#allocation3], 4294959104 }
   0xe   :  { %5751 = dma.done.wait [#allocation6], 3072  }
   0xf   :  { %5752 = vsyncadd [#allocation6], 4294964224  ;;  %v4279_v0 = vld [vmem:[%s8428_s1 + $0xe0] sm:$0xf]  ;;  %v5363_v1 = vld [vmem:[%s8428_s1 + $0xec] sm:$0xf0] }
  0x10   :  { %v4407_v2 = vld [vmem:[%s8428_s1 + $0x1e0] sm:$0xf]  ;;  %v4280_v3 = vor.u32 %v5363_v1, %v4279_v0  ;;  %v5395_v4 = vld [vmem:[%s8428_s1 + $0x1ec] sm:$0xf0]  ;;  %vm1435_vm0 = vcmask 130048  }
  0x11   :  { %v4535_v5 = vld [vmem:[%s8428_s1 + $0x2e0] sm:$0xf]  ;;  %v5427_v6 = vld [vmem:[%s8428_s1 + $0x2ec] sm:$0xf0]  ;;  %v5843_v7 = vor.u32 %v5395_v4, %v4407_v2 }
  0x12   :  { %v5845_v8 = vor.u32 %v5427_v6, %v4535_v5  ;;  %v4263_v9 = vld [vmem:[%s8428_s1 + $0xc0] sm:$0xf]  ;;  %v5359_v10 = vld [vmem:[%s8428_s1 + $0xcc] sm:$0xf0]  ;;  %1460 = vmatpush.bf16.msra.mxu0 %v4280_v3  ;;  %5617 = vmatpush.bf16.msra.mxu3 %v4280_v3  ;;  %v88_v6 = vld [vmem:[%s8427_s0 + $0x38] sm:$0xff] }
  0x13   :  { %v4391_v11 = vld [vmem:[%s8428_s1 + $0x1c0] sm:$0xf]  ;;  %v4264_v12 = vor.u32 %v5359_v10, %v4263_v9  ;;  %v5391_v13 = vld [vmem:[%s8428_s1 + $0x1cc] sm:$0xf0]  ;;  %5625 = vmatpush.bf16.msra.mxu1 %v5843_v7 }
  0x14   :  { %v4519_v14 = vld [vmem:[%s8428_s1 + $0x2c0] sm:$0xf]  ;;  %v5423_v15 = vld [vmem:[%s8428_s1 + $0x2cc] sm:$0xf0]  ;;  %5633 = vmatpush.bf16.msra.mxu2 %v5845_v8  ;;  %v5867_v16 = vor.u32 %v5391_v13, %v4391_v11  ;;  %v116_v13 = vld [vmem:[%s8427_s0 + $0x118] sm:$0xff] }
  0x15   :  { %v5869_v17 = vor.u32 %v5423_v15, %v4519_v14  ;;  %v4247_v18 = vld [vmem:[%s8428_s1 + $0xa0] sm:$0xf]  ;;  %v5355_v19 = vld [vmem:[%s8428_s1 + $0xac] sm:$0xf0]  ;;  %v110_v14 = vld [vmem:[%s8427_s0 + $0xe8] sm:$0xff] }
  0x16   :  { %v4375_v20 = vld [vmem:[%s8428_s1 + $0x1a0] sm:$0xf]  ;;  %v5387_v21 = vld [vmem:[%s8428_s1 + $0x1ac] sm:$0xf0]  ;;  %1461 = vmatpush.bf16.msra.mxu0 %v4264_v12  ;;  %5618 = vmatpush.bf16.msra.mxu3 %v4264_v12  ;;  %v4248_v24 = vor.u32 %v5355_v19, %v4247_v18 }
  0x17   :  { %v4503_v22 = vld [vmem:[%s8428_s1 + $0x2a0] sm:$0xf]  ;;  %v5419_v23 = vld [vmem:[%s8428_s1 + $0x2ac] sm:$0xf0]  ;;  %5626 = vmatpush.bf16.msra.mxu1 %v5867_v16  ;;  %v5891_v25 = vor.u32 %v5387_v21, %v4375_v20  ;;  %v118_v21 = vld [vmem:[%s8427_s0 + $0x128] sm:$0xff] }
  0x18   :  { %5634 = vmatpush.bf16.msra.mxu2 %v5869_v17  ;;  %v5893_v26 = vor.u32 %v5419_v23, %v4503_v22  ;;  %v4231_v27 = vld [vmem:[%s8428_s1 + $0x80] sm:$0xf]  ;;  %v5351_v28 = vld [vmem:[%s8428_s1 + $0x8c] sm:$0xf0] }
  0x19   :  { %v4359_v29 = vld [vmem:[%s8428_s1 + $0x180] sm:$0xf]  ;;  %v5383_v30 = vld [vmem:[%s8428_s1 + $0x18c] sm:$0xf0]  ;;  %v4232_v33 = vor.u32 %v5351_v28, %v4231_v27 }
  0x1a   :  { %v4487_v31 = vld [vmem:[%s8428_s1 + $0x280] sm:$0xf]  ;;  %v5415_v32 = vld [vmem:[%s8428_s1 + $0x28c] sm:$0xf0]  ;;  %1462 = vmatpush.bf16.msra.mxu0 %v4248_v24  ;;  %5619 = vmatpush.bf16.msra.mxu3 %v4248_v24  ;;  %v5915_v34 = vor.u32 %v5383_v30, %v4359_v29 }
  0x1b   :  { %5627 = vmatpush.bf16.msra.mxu1 %v5891_v25  ;;  %v5917_v35 = vor.u32 %v5415_v32, %v4487_v31  ;;  %v4215_v36 = vld [vmem:[%s8428_s1 + $0x60] sm:$0xf]  ;;  %v5347_v37 = vld [vmem:[%s8428_s1 + $0x6c] sm:$0xf0] }
  0x1c   :  { %5635 = vmatpush.bf16.msra.mxu2 %v5893_v26  ;;  %v4343_v38 = vld [vmem:[%s8428_s1 + $0x160] sm:$0xf]  ;;  %v5379_v39 = vld [vmem:[%s8428_s1 + $0x16c] sm:$0xf0]  ;;  %v4216_v42 = vor.u32 %v5347_v37, %v4215_v36 }
  0x1d   :  { %v4471_v40 = vld [vmem:[%s8428_s1 + $0x260] sm:$0xf]  ;;  %v5411_v41 = vld [vmem:[%s8428_s1 + $0x26c] sm:$0xf0]  ;;  %v5939_v43 = vor.u32 %v5379_v39, %v4343_v38 }
  0x1e   :  { %1463 = vmatpush.bf16.msra.mxu0 %v4232_v33  ;;  %5620 = vmatpush.bf16.msra.mxu3 %v4232_v33  ;;  %v5941_v44 = vor.u32 %v5411_v41, %v4471_v40  ;;  %v4199_v45 = vld [vmem:[%s8428_s1 + $0x40] sm:$0xf]  ;;  %v5343_v46 = vld [vmem:[%s8428_s1 + $0x4c] sm:$0xf0]  ;;  %v130_v41 = vld [vmem:[%s8427_s0 + $0x188] sm:$0xff] }
  0x1f   :  { %5628 = vmatpush.bf16.msra.mxu1 %v5915_v34  ;;  %v4327_v47 = vld [vmem:[%s8428_s1 + $0x140] sm:$0xf]  ;;  %v5375_v48 = vld [vmem:[%s8428_s1 + $0x14c] sm:$0xf0]  ;;  %v4200_v51 = vor.u32 %v5343_v46, %v4199_v45  ;;  %v132_v46 = vld [vmem:[%s8427_s0 + $0x198] sm:$0xff] }
  0x20   :  { %5636 = vmatpush.bf16.msra.mxu2 %v5917_v35  ;;  %v4455_v49 = vld [vmem:[%s8428_s1 + $0x240] sm:$0xf]  ;;  %v5407_v50 = vld [vmem:[%s8428_s1 + $0x24c] sm:$0xf0]  ;;  %v5963_v52 = vor.u32 %v5375_v48, %v4327_v47 }
  0x21   :  { %v5965_v53 = vor.u32 %v5407_v50, %v4455_v49  ;;  %v4183_v54 = vld [vmem:[%s8428_s1 + $0x20] sm:$0xf]  ;;  %v5339_v55 = vld [vmem:[%s8428_s1 + $0x2c] sm:$0xf0] }
  0x22   :  { %1464 = vmatpush.bf16.msra.mxu0 %v4216_v42  ;;  %5621 = vmatpush.bf16.msra.mxu3 %v4216_v42  ;;  %v4311_v56 = vld [vmem:[%s8428_s1 + $0x120] sm:$0xf]  ;;  %v5371_v57 = vld [vmem:[%s8428_s1 + $0x12c] sm:$0xf0]  ;;  %v4184_v60 = vor.u32 %v5339_v55, %v4183_v54 }
  0x23   :  { %5629 = vmatpush.bf16.msra.mxu1 %v5939_v43  ;;  %v4439_v58 = vld [vmem:[%s8428_s1 + $0x220] sm:$0xf]  ;;  %v5403_v59 = vld [vmem:[%s8428_s1 + $0x22c] sm:$0xf0]  ;;  %v5990_v62 = vor.u32 %v5371_v57, %v4311_v56 }
  0x24   :  { %5637 = vmatpush.bf16.msra.mxu2 %v5941_v44  ;;  %v4167_v61 = vld [vmem:[%s8428_s1] sm:$0xf]  ;;  %v5992_v63 = vor.u32 %v5403_v59, %v4439_v58  ;;  %v5335_v0 = vld [vmem:[%s8428_s1 + $0xc] sm:$0xf0]  ;;  %v82_v58 = vld [vmem:[%s8427_s0 + $0x8] sm:$0xff] }
  0x25   :  { %v4295_v1 = vld [vmem:[%s8428_s1 + $0x100] sm:$0xf]  ;;  %v5367_v2 = vld [vmem:[%s8428_s1 + $0x10c] sm:$0xf0]  ;;  %v4168_v11 = vor.u32 %v5335_v0, %v4167_v61  ;;  %v146_v0 = vld [vmem:[%s8427_s0 + $0x208] sm:$0xff] }
  0x26   :  { %1465 = vmatpush.bf16.msra.mxu0 %v4200_v51  ;;  %5622 = vmatpush.bf16.msra.mxu3 %v4200_v51  ;;  %v4423_v3 = vld [vmem:[%s8428_s1 + $0x200] sm:$0xf]  ;;  %v5399_v4 = vld [vmem:[%s8428_s1 + $0x20c] sm:$0xf0]  ;;  %v6032_v15 = vor.u32 %v5367_v2, %v4295_v1 }
  0x27   :  { %5630 = vmatpush.bf16.msra.mxu1 %v5963_v52  ;;  %v81_v5 = vld [vmem:[%s8427_s0] sm:$0xff]  ;;  %v5459_v10 = vld [vmem:[%s8428_s1 + $0x3ec] sm:$0xf0]  ;;  %v6034_v18 = vor.u32 %v5399_v4, %v4423_v3 }
  0x28   :  { %5638 = vmatpush.bf16.msra.mxu2 %v5965_v53  ;;  %v4663_v9 = vld [vmem:[%s8428_s1 + $0x3e0] sm:$0xf]  ;;  %v111_v20 = vld [vmem:[%s8427_s0 + $0xf0] sm:$0xff]  ;;  %v6045_v23 = vpack.c.bf16 %v88_v6, %v81_v5 }
  0x29   :  { %v109_v12 = vld [vmem:[%s8427_s0 + $0xe0] sm:$0xff]  ;;  %v4664_v22 = vor.u32 %v5459_v10, %v4663_v9  ;;  %v5455_v28 = vld [vmem:[%s8428_s1 + $0x3cc] sm:$0xf0]  ;;  %v6057_v30 = vpack.c.bf16 %v118_v21, %v111_v20  ;;  %v158_v20 = vld [vmem:[%s8427_s0 + $0x268] sm:$0xff] }
  0x2a   :  { %1466 = vmatpush.bf16.msra.mxu0 %v4184_v60  ;;  %5623 = vmatpush.bf16.msra.mxu3 %v4184_v60  ;;  %v117_v19 = vld [vmem:[%s8427_s0 + $0x120] sm:$0xff]  ;;  %8531 = vst [vmem:[#allocation12_spill] sm:$0xff] %v6045_v23  ;;  %v6047_v24 = vpack.c.bf16 %v116_v13, %v109_v12  ;;  %v5451_v33 = vld [vmem:[%s8428_s1 + $0x3ac] sm:$0xf0]  ;;  %v138_v60 = vld [vmem:[%s8427_s0 + $0x1c8] sm:$0xff] }
  0x2b   :  { %5631 = vmatpush.bf16.msra.mxu1 %v5990_v62  ;;  %v4647_v27 = vld [vmem:[%s8428_s1 + $0x3c0] sm:$0xf]  ;;  %v6055_v29 = vpack.c.bf16 %v117_v19, %v110_v14  ;;  %v5447_v37 = vld [vmem:[%s8428_s1 + $0x38c] sm:$0xf0] }
  0x2c   :  { %5639 = vmatpush.bf16.msra.mxu2 %v5992_v63  ;;  %8532 = vst [vmem:[#allocation13_spill] sm:$0xff] %v6047_v24  ;;  %v4648_v31 = vor.u32 %v5455_v28, %v4647_v27  ;;  %v4631_v32 = vld [vmem:[%s8428_s1 + $0x3a0] sm:$0xf]  ;;  %v95_v39 = vld [vmem:[%s8427_s0 + $0x70] sm:$0xff] }
  0x2d   :  { %v4615_v36 = vld [vmem:[%s8428_s1 + $0x380] sm:$0xf]  ;;  %v123_v40 = vld [vmem:[%s8427_s0 + $0x150] sm:$0xff] }
  0x2e   :  { %1467 = vmatpush.bf16.msra.mxu0 %v4168_v11  ;;  %5624 = vmatpush.bf16.msra.mxu3 %v4168_v11  ;;  %v4616_v38 = vor.u32 %v5447_v37, %v4615_v36  ;;  %v131_v42 = vld [vmem:[%s8427_s0 + $0x190] sm:$0xff]  ;;  %v125_v45 = vld [vmem:[%s8427_s0 + $0x160] sm:$0xff]  ;;  %v6107_v48 = vpack.c.bf16 %v130_v41, %v123_v40 }
  0x2f   :  { %5632 = vmatpush.bf16.msra.mxu1 %v6032_v15  ;;  %v6111_v50 = vpack.c.bf16 %v132_v46, %v125_v45  ;;  %v5443_v51 = vld [vmem:[%s8428_s1 + $0x36c] sm:$0xf0]  ;;  %v137_v57 = vld [vmem:[%s8427_s0 + $0x1c0] sm:$0xff] }
  0x30   :  { %5640 = vmatpush.bf16.msra.mxu2 %v6034_v18  ;;  %8534 = vst [vmem:[#allocation15_spill] sm:$0xff] %v6107_v48  ;;  %v5439_v55 = vld [vmem:[%s8428_s1 + $0x34c] sm:$0xf0]  ;;  %v89_v59 = vld [vmem:[%s8427_s0 + $0x40] sm:$0xff] }
  0x31   :  { %1468 = vmatmul.bf16.vlgmr.msra.gmra.mxu0 %v6045_v23  ;;  %1478 = vmatmul.bf16.vlgmr.msra.gmra.mxu3 %v6047_v24  ;;  %v145_v61 = vld [vmem:[%s8427_s0 + $0x200] sm:$0xff]  ;;  %v6159_v2 = vpack.c.bf16 %v89_v59, %v82_v58  ;;  %v5519_v10 = vld [vmem:[%s8428_s1 + $0x5cc] sm:$0xf0] }
  0x32   :  { %1607 = vmatpush.bf16.msrb.mxu3 %v4664_v22  ;;  %1509 = vmatpush.bf16.msrb.mxu0 %v5843_v7  ;;  %v4632_v7 = vor.u32 %v5451_v33, %v4631_v32  ;;  %v6162_v3 = vpack.c.bf16 %v145_v61, %v138_v60  ;;  %v4919_v5 = vld [vmem:[%s8428_s1 + $0x5e0] sm:$0xf]  ;;  %v5435_v12 = vld [vmem:[%s8428_s1 + $0x32c] sm:$0xf0]  ;;  %v96_v22 = vld [vmem:[%s8427_s0 + $0x78] sm:$0xff] }
  0x33   :  { %1527 = vmatmul.bf16.vlgmr.msra.gmra.mxu1 %v6055_v29  ;;  %1576 = vmatmul.bf16.vlgmr.msra.gmra.mxu2 %v6057_v30  ;;  %v4903_v9 = vld [vmem:[%s8428_s1 + $0x5c0] sm:$0xf]  ;;  %v151_v19 = vld [vmem:[%s8427_s0 + $0x230] sm:$0xff]  ;;  %v160_v32 = vld [vmem:[%s8427_s0 + $0x278] sm:$0xff] }
  0x34   :  { %v4567_v11 = vld [vmem:[%s8428_s1 + $0x320] sm:$0xf]  ;;  %v4904_v13 = vor.u32 %v5519_v10, %v4903_v9  ;;  %v103_v27 = vld [vmem:[%s8427_s0 + $0xb0] sm:$0xff]  ;;  %v166_v60 = vld [vmem:[%s8427_s0 + $0x2a8] sm:$0xff] }
  0x35   :  { %v4887_v14 = vld [vmem:[%s8428_s1 + $0x5a0] sm:$0xf]  ;;  %v159_v28 = vld [vmem:[%s8427_s0 + $0x270] sm:$0xff]  ;;  %v6229_v36 = vpack.c.bf16 %v103_v27, %v96_v22 }
  0x36   :  { %1510 = vmatpush.bf16.msrb.mxu0 %v5867_v16  ;;  %1608 = vmatpush.bf16.msrb.mxu3 %v4648_v31  ;;  %v102_v16 = vld [vmem:[%s8427_s0 + $0xa8] sm:$0xff]  ;;  %v153_v31 = vld [vmem:[%s8427_s0 + $0x240] sm:$0xff]  ;;  %v5507_v40 = vld [vmem:[%s8428_s1 + $0x56c] sm:$0xf0] }
  0x37   :  { %v6105_v47 = vpack.c.bf16 %v102_v16, %v95_v39  ;;  %v4871_v33 = vld [vmem:[%s8428_s1 + $0x580] sm:$0xf]  ;;  %v5431_v41 = vld [vmem:[%s8428_s1 + $0x30c] sm:$0xf0] }
  0x38   :  { %v4855_v16 = vld [vmem:[%s8428_s1 + $0x560] sm:$0xf]  ;;  %v5503_v46 = vld [vmem:[%s8428_s1 + $0x54c] sm:$0xf0] }
  0x39   :  { %8533 = vst [vmem:[#allocation14_spill] sm:$0xff] %v6105_v47  ;;  %v4839_v45 = vld [vmem:[%s8428_s1 + $0x540] sm:$0xf]  ;;  %v5487_v58 = vld [vmem:[%s8428_s1 + $0x4cc] sm:$0xf0] }
  0x3a   :  { %1511 = vmatpush.bf16.msrb.mxu0 %v5891_v25  ;;  %1609 = vmatpush.bf16.msrb.mxu3 %v4632_v7  ;;  %v124_v25 = vld [vmem:[%s8427_s0 + $0x158] sm:$0xff]  ;;  %v6227_v7 = vpack.c.bf16 %v158_v20, %v151_v19  ;;  %v5527_v59 = vld [vmem:[%s8428_s1 + $0x60c] sm:$0xf0]  ;;  %v4743_v22 = vld [vmem:[%s8428_s1 + $0x480] sm:$0xf] }
  0x3b   :  { %v6109_v49 = vpack.c.bf16 %v131_v42, %v124_v25  ;;  %v4856_v25 = vor.u32 %v5507_v40, %v4855_v16  ;;  %v83_v61 = vld [vmem:[%s8427_s0 + $0x10] sm:$0xff]  ;;  %v186_v40 = vld [vmem:[%s8427_s0 + $0x348] sm:$0xff] }
  0x3c   :  { %8536 = vst [vmem:[#allocation17_spill] sm:$0xff] %v6227_v7  ;;  %v5479_v27 = vld [vmem:[%s8428_s1 + $0x48c] sm:$0xf0] }
  0x3e   :  { %1512 = vmatpush.bf16.msrb.mxu0 %v5915_v34  ;;  %1610 = vmatpush.bf16.msrb.mxu3 %v4616_v38  ;;  %v4599_v34 = vld [vmem:[%s8428_s1 + $0x360] sm:$0xf]  ;;  %v6233_v38 = vpack.c.bf16 %v160_v32, %v153_v31  ;;  %v4744_v32 = vor.u32 %v5479_v27, %v4743_v22  ;;  %v5353_v27 = vld [vmem:[%s8428_s1 + $0xa4] sm:$0xf] }
  0x3f   :  { %v4600_v54 = vor.u32 %v5443_v51, %v4599_v34  ;;  %v4791_v34 = vld [vmem:[%s8428_s1 + $0x4e0] sm:$0xf]  ;;  %v5491_v51 = vld [vmem:[%s8428_s1 + $0x4ec] sm:$0xf0] }
  0x41   :  { %1473 = vmatmul.bf16.gmra.mxu0 %v6105_v47  ;;  %1483 = vmatmul.bf16.gmra.mxu3 %v6107_v48 }
  0x42   :  { %1513 = vmatpush.bf16.msrb.mxu0 %v5939_v43  ;;  %1611 = vmatpush.bf16.msrb.mxu3 %v4600_v54  ;;  %v4583_v43 = vld [vmem:[%s8428_s1 + $0x340] sm:$0xf] }
  0x43   :  { %1532 = vmatmul.bf16.gmra.mxu1 %v6109_v49  ;;  %1581 = vmatmul.bf16.gmra.mxu2 %v6111_v50  ;;  %v4584_v56 = vor.u32 %v5439_v55, %v4583_v43  ;;  %v165_v54 = vld [vmem:[%s8427_s0 + $0x2a0] sm:$0xff]  ;;  %v172_v43 = vld [vmem:[%s8427_s0 + $0x2d8] sm:$0xff]  ;;  %v4792_v55 = vor.u32 %v5491_v51, %v4791_v34 }
  0x44   :  { %v181_v34 = vld [vmem:[%s8427_s0 + $0x320] sm:$0xff]  ;;  %v188_v51 = vld [vmem:[%s8427_s0 + $0x358] sm:$0xff] }
  0x46   :  { %1514 = vmatpush.bf16.msrb.mxu0 %v5963_v52  ;;  %v144_v52 = vld [vmem:[%s8427_s0 + $0x1f8] sm:$0xff]  ;;  %1612 = vmatpush.bf16.msrb.mxu3 %v4584_v56  ;;  %v4823_v56 = vld [vmem:[%s8428_s1 + $0x520] sm:$0xf] }
  0x47   :  { %v6157_v1 = vpack.c.bf16 %v144_v52, %v137_v57  ;;  %v5499_v57 = vld [vmem:[%s8428_s1 + $0x52c] sm:$0xf0]  ;;  %v4775_v52 = vld [vmem:[%s8428_s1 + $0x4c0] sm:$0xf] }
  0x48   :  { %v4824_v9 = vor.u32 %v5499_v57, %v4823_v56  ;;  %v4776_v10 = vor.u32 %v5487_v58, %v4775_v52  ;;  %v5467_v56 = vld [vmem:[%s8428_s1 + $0x42c] sm:$0xf0]  ;;  %v4679_v58 = vld [vmem:[%s8428_s1 + $0x400] sm:$0xf] }
  0x49   :  { %8535 = vst [vmem:[#allocation16_spill] sm:$0xff] %v6157_v1 }
  0x4a   :  { %1515 = vmatpush.bf16.msrb.mxu0 %v5990_v62  ;;  %v139_v62 = vld [vmem:[%s8427_s0 + $0x1d0] sm:$0xff] }
  0x4b   :  { %v6164_v4 = vpack.c.bf16 %v146_v0, %v139_v62  ;;  %v90_v62 = vld [vmem:[%s8427_s0 + $0x48] sm:$0xff] }
  0x4e   :  { %1516 = vmatpush.bf16.msrb.mxu0 %v6032_v15  ;;  %v5515_v15 = vld [vmem:[%s8428_s1 + $0x5ac] sm:$0xf0] }
  0x4f   :  { %v4888_v21 = vor.u32 %v5515_v15, %v4887_v14  ;;  %v5483_v14 = vld [vmem:[%s8428_s1 + $0x4ac] sm:$0xf0] }
  0x51   :  { %1488 = vmatmul.bf16.gmra.mxu3 %v6157_v1  ;;  %1517 = vmatmul.bf16.vlgmr.msrb.gmra.mxu0 %v6159_v2 }
  0x52   :  { %1558 = vmatpush.bf16.msra.mxu0 %v5845_v8  ;;  %v5523_v8 = vld [vmem:[%s8428_s1 + $0x5ec] sm:$0xf0] }
  0x53   :  { %1537 = vmatmul.bf16.gmra.mxu1 %v6162_v3  ;;  %1586 = vmatmul.bf16.gmra.mxu2 %v6164_v4  ;;  %v4920_v6 = vor.u32 %v5523_v8, %v4919_v5  ;;  %v173_v5 = vld [vmem:[%s8427_s0 + $0x2e0] sm:$0xff]  ;;  %v167_v8 = vld [vmem:[%s8427_s0 + $0x2b0] sm:$0xff] }
  0x54   :  { %v6325_v15 = vpack.c.bf16 %v173_v5, %v166_v60  ;;  %v5357_v60 = vld [vmem:[%s8428_s1 + $0xc4] sm:$0xf]  ;;  %v84_v5 = vld [vmem:[%s8427_s0 + $0x18] sm:$0xff] }
  0x55   :  { %1705 = vmatpush.bf16.msrb.mxu1 %v4920_v6  ;;  %v174_v6 = vld [vmem:[%s8427_s0 + $0x2e8] sm:$0xff] }
  0x56   :  { %1559 = vmatpush.bf16.msra.mxu0 %v5869_v17  ;;  %v4568_v17 = vor.u32 %v5435_v12, %v4567_v11  ;;  %v5495_v11 = vld [vmem:[%s8428_s1 + $0x50c] sm:$0xf0]  ;;  %v6315_v12 = vpack.c.bf16 %v172_v43, %v165_v54  ;;  %8539 = vst [vmem:[#allocation20_spill] sm:$0xff] %v6325_v15  ;;  %v6327_v19 = vpack.c.bf16 %v174_v6, %v167_v8  ;;  %v85_v6 = vld [vmem:[%s8427_s0 + $0x20] sm:$0xff] }
  0x57   :  { %v91_v8 = vld [vmem:[%s8427_s0 + $0x50] sm:$0xff] }
  0x58   :  { %1613 = vmatpush.bf16.msrb.mxu3 %v4568_v17  ;;  %8537 = vst [vmem:[#allocation18_spill] sm:$0xff] %v6315_v12  ;;  %v4759_v17 = vld [vmem:[%s8428_s1 + $0x4a0] sm:$0xf] }
  0x59   :  { %1706 = vmatpush.bf16.msrb.mxu1 %v4904_v13  ;;  %v6317_v13 = vpack.c.bf16 %v90_v62, %v83_v61  ;;  %8540 = vst [vmem:[#allocation21_spill] sm:$0xff] %v6327_v19  ;;  %v4265_v61 = vld [vmem:[%s8428_s1 + $0xd0] sm:$0xf0] }
  0x5a   :  { %1560 = vmatpush.bf16.msra.mxu0 %v5893_v26  ;;  %v152_v26 = vld [vmem:[%s8427_s0 + $0x238] sm:$0xff]  ;;  %v4268_v62 = vor.u32 %v5357_v60, %v4265_v61  ;;  %v115_v60 = vld [vmem:[%s8427_s0 + $0x110] sm:$0xff]  ;;  %v122_v61 = vld [vmem:[%s8427_s0 + $0x148] sm:$0xff] }
  0x5b   :  { %v6231_v37 = vpack.c.bf16 %v159_v28, %v152_v26  ;;  %8538 = vst [vmem:[#allocation19_spill] sm:$0xff] %v6317_v13  ;;  %v5361_v26 = vld [vmem:[%s8428_s1 + $0xe4] sm:$0xf]  ;;  %v4281_v28 = vld [vmem:[%s8428_s1 + $0xf0] sm:$0xf0] }
  0x5c   :  { %v4284_v31 = vor.u32 %v5361_v26, %v4281_v28  ;;  %v4249_v26 = vld [vmem:[%s8428_s1 + $0xb0] sm:$0xf0] }
  0x5d   :  { %1707 = vmatpush.bf16.msrb.mxu1 %v4888_v21  ;;  %v4760_v21 = vor.u32 %v5483_v14, %v4759_v17  ;;  %v94_v17 = vld [vmem:[%s8427_s0 + $0x68] sm:$0xff]  ;;  %v6435_v14 = vpack.c.bf16 %v91_v8, %v84_v5  ;;  %v4252_v28 = vor.u32 %v5353_v27, %v4249_v26  ;;  %v445_v5 = vld [vmem:[%s8429_s2] sm:$0xf] }
  0x5e   :  { %1561 = vmatpush.bf16.msra.mxu0 %v5917_v35  ;;  %v5511_v35 = vld [vmem:[%s8428_s1 + $0x58c] sm:$0xf0] }
  0x5f   :  { %v4872_v39 = vor.u32 %v5511_v35, %v4871_v33  ;;  %v4727_v33 = vld [vmem:[%s8428_s1 + $0x460] sm:$0xf]  ;;  %v5475_v35 = vld [vmem:[%s8428_s1 + $0x46c] sm:$0xf0]  ;;  %8544 = vst [vmem:[#allocation25_spill] sm:$0xff] %v6435_v14 }
  0x60   :  { %v4728_v16 = vor.u32 %v5475_v35, %v4727_v33  ;;  %v99_v33 = vld [vmem:[%s8427_s0 + $0x90] sm:$0xff]  ;;  %v106_v35 = vld [vmem:[%s8427_s0 + $0xc8] sm:$0xff] }
  0x61   :  { %1493 = vmatmul.bf16.gmra.mxu3 %v6227_v7  ;;  %1522 = vmatmul.bf16.gmra.mxu0 %v6229_v36 }
  0x62   :  { %1562 = vmatpush.bf16.msra.mxu0 %v5941_v44  ;;  %v4551_v44 = vld [vmem:[%s8428_s1 + $0x300] sm:$0xf]  ;;  %1708 = vmatpush.bf16.msrb.mxu1 %v4872_v39  ;;  %v179_v39 = vld [vmem:[%s8427_s0 + $0x310] sm:$0xff] }
  0x63   :  { %1542 = vmatmul.bf16.gmra.mxu1 %v6231_v37  ;;  %1591 = vmatmul.bf16.gmra.mxu2 %v6233_v38  ;;  %v4552_v42 = vor.u32 %v5431_v41, %v4551_v44  ;;  %v4711_v44 = vld [vmem:[%s8428_s1 + $0x440] sm:$0xf]  ;;  %v5471_v41 = vld [vmem:[%s8428_s1 + $0x44c] sm:$0xf0]  ;;  %v6381_v54 = vpack.c.bf16 %v186_v40, %v179_v39  ;;  %v100_v39 = vld [vmem:[%s8427_s0 + $0x98] sm:$0xff] }
  0x64   :  { %v101_v40 = vld [vmem:[%s8427_s0 + $0xa0] sm:$0xff] }
  0x65   :  { %1614 = vmatpush.bf16.msrb.mxu3 %v4552_v42  ;;  %v97_v42 = vld [vmem:[%s8427_s0 + $0x80] sm:$0xff]  ;;  %8541 = vst [vmem:[#allocation22_spill] sm:$0xff] %v6381_v54 }
  0x66   :  { %1563 = vmatpush.bf16.msra.mxu0 %v5965_v53  ;;  %1709 = vmatpush.bf16.msrb.mxu1 %v4856_v25  ;;  %v4840_v53 = vor.u32 %v5503_v46, %v4839_v45  ;;  %v180_v25 = vld [vmem:[%s8427_s0 + $0x318] sm:$0xff]  ;;  %v187_v46 = vld [vmem:[%s8427_s0 + $0x350] sm:$0xff] }
  0x67   :  { %v104_v45 = vld [vmem:[%s8427_s0 + $0xb8] sm:$0xff]  ;;  %v6391_v57 = vpack.c.bf16 %v187_v46, %v180_v25  ;;  %v6480_v25 = vpack.c.bf16 %v106_v35, %v99_v33  ;;  %v5349_v46 = vld [vmem:[%s8428_s1 + $0x84] sm:$0xf] }
  0x68   :  { %v6383_v43 = vpack.c.bf16 %v104_v45, %v97_v42 }
  0x69   :  { %1803 = vmatpush.bf16.msra.mxu3 %v4284_v31  ;;  %8542 = vst [vmem:[#allocation23_spill] sm:$0xff] %v6391_v57  ;;  %v98_v31 = vld [vmem:[%s8427_s0 + $0x88] sm:$0xff] }
  0x6a   :  { %1564 = vmatpush.bf16.msra.mxu0 %v5992_v63  ;;  %v4935_v63 = vld [vmem:[%s8428_s1 + $0x600] sm:$0xf]  ;;  %1710 = vmatpush.bf16.msrb.mxu1 %v4840_v53  ;;  %v4712_v53 = vor.u32 %v5471_v41, %v4711_v44  ;;  %v108_v44 = vld [vmem:[%s8427_s0 + $0xd8] sm:$0xff]  ;;  %8549 = vst [vmem:[#allocation30_spill] sm:$0xff] %v6480_v25 }
  0x6b   :  { %v4936_v0 = vor.u32 %v5527_v59, %v4935_v63  ;;  %v6393_v63 = vpack.c.bf16 %v188_v51, %v181_v34  ;;  %v5463_v59 = vld [vmem:[%s8428_s1 + $0x40c] sm:$0xf0]  ;;  %v6484_v45 = vpack.c.bf16 %v108_v44, %v101_v40  ;;  %v4233_v34 = vld [vmem:[%s8428_s1 + $0x90] sm:$0xf0]  ;;  %v133_v40 = vld [vmem:[%s8427_s0 + $0x1a0] sm:$0xff] }
  0x6c   :  { %v4236_v51 = vor.u32 %v5349_v46, %v4233_v34  ;;  %v127_v44 = vld [vmem:[%s8427_s0 + $0x170] sm:$0xff]  ;;  %v134_v46 = vld [vmem:[%s8427_s0 + $0x1a8] sm:$0xff]  ;;  %v128_v34 = vld [vmem:[%s8427_s0 + $0x178] sm:$0xff] }
  0x6d   :  { %1761 = vmatpush.bf16.msrb.mxu2 %v4936_v0  ;;  %8543 = vst [vmem:[#allocation24_spill] sm:$0xff] %v6393_v63  ;;  %v4680_v0 = vor.u32 %v5463_v59, %v4679_v58  ;;  %1804 = vmatpush.bf16.msra.mxu3 %v4268_v62  ;;  %v114_v58 = vld [vmem:[%s8427_s0 + $0x108] sm:$0xff]  ;;  %v121_v59 = vld [vmem:[%s8427_s0 + $0x140] sm:$0xff] }
  0x6e   :  { %1565 = vmatpush.bf16.msra.mxu0 %v6034_v18  ;;  %v4807_v18 = vld [vmem:[%s8428_s1 + $0x500] sm:$0xf]  ;;  %1711 = vmatpush.bf16.msrb.mxu1 %v4824_v9  ;;  %v92_v9 = vld [vmem:[%s8427_s0 + $0x58] sm:$0xff]  ;;  %8551 = vst [vmem:[#allocation32_spill] sm:$0xff] %v6484_v45 }
  0x6f   :  { %v4808_v20 = vor.u32 %v5495_v11, %v4807_v18  ;;  %v93_v18 = vld [vmem:[%s8427_s0 + $0x60] sm:$0xff]  ;;  %v87_v11 = vld [vmem:[%s8427_s0 + $0x30] sm:$0xff] }
  0x70   :  { %v6441_v22 = vpack.c.bf16 %v94_v17, %v87_v11  ;;  %v5345_v11 = vld [vmem:[%s8428_s1 + $0x64] sm:$0xf]  ;;  %v4217_v17 = vld [vmem:[%s8428_s1 + $0x70] sm:$0xf0] }
  0x71   :  { %1498 = vmatmul.bf16.gmra.mxu3 %v6315_v12  ;;  %1566 = vmatmul.bf16.vlgmr.msra.gmra.mxu0 %v6317_v13  ;;  %v4220_v27 = vor.u32 %v5345_v11, %v4217_v17 }
  0x72   :  { %1656 = vmatpush.bf16.msrb.mxu0 %v4792_v55  ;;  %1712 = vmatpush.bf16.msrb.mxu1 %v4808_v20  ;;  %v4695_v55 = vld [vmem:[%s8428_s1 + $0x420] sm:$0xf]  ;;  %v6437_v20 = vpack.c.bf16 %v92_v9, %v85_v6  ;;  %8547 = vst [vmem:[#allocation28_spill] sm:$0xff] %v6441_v22  ;;  %v6528_v6 = vpack.c.bf16 %v121_v59, %v114_v58 }
  0x73   :  { %1547 = vmatmul.bf16.gmra.mxu1 %v6325_v15  ;;  %1596 = vmatmul.bf16.gmra.mxu2 %v6327_v19  ;;  %v4696_v52 = vor.u32 %v5467_v56, %v4695_v55  ;;  %v119_v55 = vld [vmem:[%s8427_s0 + $0x130] sm:$0xff]  ;;  %v113_v56 = vld [vmem:[%s8427_s0 + $0x100] sm:$0xff]  ;;  %v6530_v9 = vpack.c.bf16 %v122_v61, %v115_v60  ;;  %v6577_v60 = vpack.c.bf16 %v134_v46, %v127_v44 }
  0x74   :  { %8545 = vst [vmem:[#allocation26_spill] sm:$0xff] %v6437_v20  ;;  %1805 = vmatpush.bf16.msra.mxu3 %v4252_v28 }
  0x75   :  { %8553 = vst [vmem:[#allocation34_spill] sm:$0xff] %v6528_v6 }
  0x76   :  { %1657 = vmatpush.bf16.msrb.mxu0 %v4776_v10  ;;  %v86_v10 = vld [vmem:[%s8427_s0 + $0x28] sm:$0xff]  ;;  %8554 = vst [vmem:[#allocation35_spill] sm:$0xff] %v6530_v9 }
  0x77   :  { %8555 = vst [vmem:[#allocation36_spill] sm:$0xff] %v6577_v60 }
  0x78   :  { %1806 = vmatpush.bf16.msra.mxu3 %v4236_v51  ;;  %v135_v51 = vld [vmem:[%s8427_s0 + $0x1b0] sm:$0xff] }
  0x7a   :  { %1658 = vmatpush.bf16.msrb.mxu0 %v4760_v21  ;;  %v6439_v21 = vpack.c.bf16 %v93_v18, %v86_v10  ;;  %v6532_v18 = vperm.slane %v445_v5, 0  ;;  %v6581_v5 = vpack.c.bf16 %v135_v51, %v128_v34  ;;  %v140_v51 = vld [vmem:[%s8427_s0 + $0x1d8] sm:$0xff] }
  0x7c   :  { %8546 = vst [vmem:[#allocation27_spill] sm:$0xff] %v6439_v21  ;;  %1807 = vmatpush.bf16.msra.mxu3 %v4220_v27 }
  0x7d   :  { %8556 = vst [vmem:[#allocation37_spill] sm:$0xff] %v6581_v5 }
  0x7e   :  { %1659 = vmatpush.bf16.msrb.mxu0 %v4744_v32  ;;  %v105_v32 = vld [vmem:[%s8427_s0 + $0xc0] sm:$0xff] }
  0x7f   :  { %v6478_v41 = vpack.c.bf16 %v105_v32, %v98_v31 }
  0x81   :  { %1503 = vmatmul.bf16.gmra.mxu3 %v6381_v54  ;;  %1571 = vmatmul.bf16.gmra.mxu0 %v6383_v43  ;;  %8548 = vst [vmem:[#allocation29_spill] sm:$0xff] %v6478_v41  ;;  %v5397_v54 = vld [vmem:[%s8428_s1 + $0x204] sm:$0xf] }
  0x82   :  { %1660 = vmatpush.bf16.msrb.mxu0 %v4728_v16  ;;  %v107_v16 = vld [vmem:[%s8427_s0 + $0xd0] sm:$0xff] }
  0x83   :  { %1552 = vmatmul.bf16.gmra.mxu1 %v6391_v57  ;;  %1601 = vmatmul.bf16.gmra.mxu2 %v6393_v63  ;;  %v6482_v42 = vpack.c.bf16 %v107_v16, %v100_v39  ;;  %v126_v16 = vld [vmem:[%s8427_s0 + $0x168] sm:$0xff] }
  0x84   :  { %v6575_v59 = vpack.c.bf16 %v133_v40, %v126_v16 }
  0x85   :  { %8550 = vst [vmem:[#allocation31_spill] sm:$0xff] %v6482_v42 }
  0x86   :  { %1661 = vmatpush.bf16.msrb.mxu0 %v4712_v53  ;;  %v112_v53 = vld [vmem:[%s8427_s0 + $0xf8] sm:$0xff] }
  0x87   :  { %v6521_v62 = vpack.c.bf16 %v119_v55, %v112_v53  ;;  %v129_v53 = vld [vmem:[%s8427_s0 + $0x180] sm:$0xff]  ;;  %v136_v55 = vld [vmem:[%s8427_s0 + $0x1b8] sm:$0xff] }
  0x8a   :  { %1662 = vmatpush.bf16.msrb.mxu0 %v4696_v52  ;;  %v120_v52 = vld [vmem:[%s8427_s0 + $0x138] sm:$0xff] }
  0x8e   :  { %1663 = vmatpush.bf16.msrb.mxu0 %v4680_v0  ;;  %v6523_v0 = vpack.c.bf16 %v120_v52, %v113_v56 }
  0x90   :  { %8552 = vst [vmem:[#allocation33_spill] sm:$0xff] %v6523_v0 }
  0x91   :  { %1615 = vmatmul.bf16.vlgmr.msrb.gmra.mxu3 %v6435_v14  ;;  %1664 = vmatmul.bf16.vlgmr.msrb.gmra.mxu0 %v6437_v20 }
  0x93   :  { %1713 = vmatmul.bf16.vlgmr.msrb.gmra.mxu1 %v6439_v21  ;;  %4949 = vmatmul.msk.bf16.vlgmr.msrb.gmra.mxu2 %vm1435_vm0, %v6441_v22  ;;  %v4617_v22 = vld [vmem:[%s8428_s1 + $0x390] sm:$0xf0] }
  0xa1   :  { %1620 = vmatmul.bf16.gmra.mxu3 %v6478_v41  ;;  %1669 = vmatmul.bf16.gmra.mxu0 %v6480_v25 }
  0xa3   :  { %1718 = vmatmul.bf16.gmra.mxu1 %v6482_v42  ;;  %4950 = vmatmul.msk.bf16.gmra.mxu2 %vm1435_vm0, %v6484_v45 }
  0xae   :  { %v1469_v8 = vpop.f32.mrf.mxu0 }
  0xb0   :  { %v1528_v10 = vpop.f32.mrf.mxu1 }
  0xb1   :  { %1625 = vmatmul.bf16.gmra.mxu3 %v6521_v62  ;;  %1674 = vmatmul.bf16.gmra.mxu0 %v6523_v0 }
  0xb3   :  { %1723 = vmatmul.bf16.gmra.mxu1 %v6528_v6  ;;  %4951 = vmatmul.msk.bf16.gmra.mxu2 %vm1435_vm0, %v6530_v9 }
  0xb4   :  { %v1479_v26 = vpop.f32.mrf.mxu3 }
  0xb5   :  { %v1480_v28 = vadd.f32 %v1479_v26, %v6532_v18  ;;  %v5341_v26 = vld [vmem:[%s8428_s1 + $0x44] sm:$0xf] }
  0xb6   :  { %v1577_v31 = vpop.f32.mrf.mxu2  ;;  %v6546_v32 = vpop.f32.mrf.mxu0 }
  0xb7   :  { %v1529_v33 = vadd.f32 %v1528_v10, %v1480_v28  ;;  %v6583_v10 = vpack.c.bf16 %v136_v55, %v129_v53  ;;  %v4201_v28 = vld [vmem:[%s8428_s1 + $0x50] sm:$0xf0]  ;;  %v141_v55 = vld [vmem:[%s8427_s0 + $0x1e0] sm:$0xff] }
  0xb8   :  { %v1530_v35 = vpop.f32.mrf.mxu1  ;;  %v147_v53 = vld [vmem:[%s8427_s0 + $0x210] sm:$0xff] }
  0xb9   :  { %v6548_v39 = vadd.f32 %v1577_v31, %v1529_v33  ;;  %8557 = vst [vmem:[#allocation38_spill] sm:$0xff] %v6583_v10  ;;  %v4204_v31 = vor.u32 %v5341_v26, %v4201_v28  ;;  %v150_v26 = vld [vmem:[%s8427_s0 + $0x228] sm:$0xff] }
  0xbb   :  { %1808 = vmatpush.bf16.msra.mxu3 %v4204_v31 }
  0xbc   :  { %v1481_v56 = vpop.f32.mrf.mxu3 }
  0xbd   :  { %v1482_v52 = vadd.f32 %v1481_v56, %v6532_v18  ;;  %v148_v56 = vld [vmem:[%s8427_s0 + $0x218] sm:$0xff] }
  0xbe   :  { %v1579_v58 = vpop.f32.mrf.mxu2  ;;  %v6579_v61 = vpop.f32.mrf.mxu0 }
  0xbf   :  { %v1531_v11 = vadd.f32 %v1530_v35, %v1482_v52  ;;  %v142_v52 = vld [vmem:[%s8427_s0 + $0x1e8] sm:$0xff] }
  0xc0   :  { %v1533_v17 = vpop.f32.mrf.mxu1 }
  0xc1   :  { %v6585_v27 = vadd.f32 %v1579_v58, %v1531_v11  ;;  %1630 = vmatmul.bf16.gmra.mxu3 %v6575_v59  ;;  %1679 = vmatmul.bf16.gmra.mxu0 %v6577_v60  ;;  %v1470_v58 = vadd.f32 %v1469_v8, %v6532_v18  ;;  %v149_v11 = vld [vmem:[%s8427_s0 + $0x220] sm:$0xff] }
  0xc3   :  { %1728 = vmatmul.bf16.gmra.mxu1 %v6581_v5  ;;  %4952 = vmatmul.msk.bf16.gmra.mxu2 %vm1435_vm0, %v6583_v10 }
  0xc4   :  { %v1484_v33 = vpop.f32.mrf.mxu3 }
  0xc5   :  { %v1485_v35 = vadd.f32 %v1484_v33, %v6532_v18 }
  0xc6   :  { %v1582_v16 = vpop.f32.mrf.mxu2  ;;  %v6599_v40 = vpop.f32.mrf.mxu0 }
  0xc7   :  { %v1534_v44 = vadd.f32 %v1533_v17, %v1485_v35  ;;  %v143_v17 = vld [vmem:[%s8427_s0 + $0x1f0] sm:$0xff]  ;;  %v6629_v35 = vpack.c.bf16 %v147_v53, %v140_v51  ;;  %v5393_v51 = vld [vmem:[%s8428_s1 + $0x1e4] sm:$0xf] }
  0xc8   :  { %v1535_v46 = vpop.f32.mrf.mxu1  ;;  %v6635_v10 = vpack.c.bf16 %v150_v26, %v143_v17  ;;  %v4409_v53 = vld [vmem:[%s8428_s1 + $0x1f0] sm:$0xf0]  ;;  %v5457_v17 = vld [vmem:[%s8428_s1 + $0x3e4] sm:$0xf] }
  0xc9   :  { %v6601_v34 = vadd.f32 %v1582_v16, %v1534_v44  ;;  %v6631_v16 = vpack.c.bf16 %v148_v56, %v141_v55  ;;  %v6633_v44 = vpack.c.bf16 %v149_v11, %v142_v52  ;;  %v1472_v55 = vadd.f32 %v6546_v32, %v6532_v18  ;;  %v4537_v11 = vld [vmem:[%s8428_s1 + $0x2f0] sm:$0xf0] }
  0xca   :  { %8560 = vst [vmem:[#allocation41_spill] sm:$0xff] %v6635_v10  ;;  %v4412_v52 = vor.u32 %v5393_v51, %v4409_v53  ;;  %v4665_v32 = vld [vmem:[%s8428_s1 + $0x3f0] sm:$0xf0]  ;;  %v5421_v53 = vld [vmem:[%s8428_s1 + $0x2c4] sm:$0xf] }
  0xcb   :  { %8558 = vst [vmem:[#allocation39_spill] sm:$0xff] %v6631_v16 }
  0xcc   :  { %v1486_v28 = vpop.f32.mrf.mxu3  ;;  %8559 = vst [vmem:[#allocation40_spill] sm:$0xff] %v6633_v44  ;;  %1852 = vmatpush.bf16.msra.mxu0 %v4412_v52 }
  0xcd   :  { %v1487_v31 = vadd.f32 %v1486_v28, %v6532_v18 }
  0xce   :  { %v1584_v33 = vpop.f32.mrf.mxu2  ;;  %v1518_v8 = vpop.f32.mrf.mxu0 }
  0xcf   :  { %v1536_v5 = vadd.f32 %v1535_v46, %v1487_v31  ;;  %v6637_v60 = vadd.f32 %v1518_v8, %v1470_v58  ;;  %v5337_v46 = vld [vmem:[%s8428_s1 + $0x24] sm:$0xf] }
  0xd0   :  { %v1538_v9 = vpop.f32.mrf.mxu1  ;;  %v5425_v58 = vld [vmem:[%s8428_s1 + $0x2e4] sm:$0xf] }
  0xd1   :  { %v6639_v6 = vadd.f32 %v1584_v33, %v1536_v5  ;;  %1635 = vmatmul.bf16.gmra.mxu3 %v6629_v35  ;;  %1684 = vmatmul.bf16.gmra.mxu0 %v6631_v16  ;;  %v4185_v5 = vld [vmem:[%s8428_s1 + $0x30] sm:$0xf0]  ;;  %v4540_v28 = vor.u32 %v5425_v58, %v4537_v11  ;;  %v5389_v31 = vld [vmem:[%s8428_s1 + $0x1c4] sm:$0xf]  ;;  %v164_v16 = vld [vmem:[%s8427_s0 + $0x298] sm:$0xff] }
  0xd2   :  { %v4188_v56 = vor.u32 %v5337_v46, %v4185_v5  ;;  %v4393_v33 = vld [vmem:[%s8428_s1 + $0x1d0] sm:$0xf0]  ;;  %v4668_v46 = vor.u32 %v5457_v17, %v4665_v32  ;;  %v5453_v11 = vld [vmem:[%s8428_s1 + $0x3c4] sm:$0xf] }
  0xd3   :  { %1733 = vmatmul.bf16.gmra.mxu1 %v6633_v44  ;;  %4953 = vmatmul.msk.bf16.gmra.mxu2 %vm1435_vm0, %v6635_v10  ;;  %v4396_v5 = vor.u32 %v5389_v31, %v4393_v33  ;;  %v4521_v58 = vld [vmem:[%s8428_s1 + $0x2d0] sm:$0xf0]  ;;  %v154_v33 = vld [vmem:[%s8427_s0 + $0x248] sm:$0xff]  ;;  %v161_v44 = vld [vmem:[%s8427_s0 + $0x280] sm:$0xff] }
  0xd4   :  { %v1489_v26 = vpop.f32.mrf.mxu3  ;;  %1809 = vmatpush.bf16.msra.mxu3 %v4188_v56  ;;  %1901 = vmatpush.bf16.msra.mxu1 %v4540_v28  ;;  %v4649_v56 = vld [vmem:[%s8428_s1 + $0x3d0] sm:$0xf0]  ;;  %v5385_v28 = vld [vmem:[%s8428_s1 + $0x1a4] sm:$0xf]  ;;  %v6749_v25 = vpack.c.bf16 %v161_v44, %v154_v33 }
  0xd5   :  { %v1490_v8 = vadd.f32 %v1489_v26, %v6532_v18  ;;  %v4524_v26 = vor.u32 %v5421_v53, %v4521_v58  ;;  %1950 = vmatpush.bf16.msra.mxu2 %v4668_v46  ;;  %v4652_v31 = vor.u32 %v5453_v11, %v4649_v56  ;;  %1853 = vmatpush.bf16.msra.mxu0 %v4396_v5  ;;  %v4505_v46 = vld [vmem:[%s8428_s1 + $0x2b0] sm:$0xf0]  ;;  %v5449_v53 = vld [vmem:[%s8428_s1 + $0x3a4] sm:$0xf]  ;;  %v156_v5 = vld [vmem:[%s8427_s0 + $0x258] sm:$0xff] }
  0xd6   :  { %v1587_v51 = vpop.f32.mrf.mxu2  ;;  %v1520_v10 = vpop.f32.mrf.mxu0  ;;  %v4633_v58 = vld [vmem:[%s8428_s1 + $0x3b0] sm:$0xf0] }
  0xd7   :  { %v1539_v52 = vadd.f32 %v1538_v9, %v1490_v8  ;;  %v6691_v17 = vadd.f32 %v1520_v10, %v1472_v55  ;;  %v4377_v9 = vld [vmem:[%s8428_s1 + $0x1b0] sm:$0xf0]  ;;  %v5417_v10 = vld [vmem:[%s8428_s1 + $0x2a4] sm:$0xf]  ;;  %v4636_v0 = vor.u32 %v5449_v53, %v4633_v58 }
  0xd8   :  { %v1540_v32 = vpop.f32.mrf.mxu1  ;;  %v4380_v8 = vor.u32 %v5385_v28, %v4377_v9  ;;  %v155_v11 = vld [vmem:[%s8427_s0 + $0x250] sm:$0xff]  ;;  %1902 = vmatpush.bf16.msra.mxu1 %v4524_v26  ;;  %v4508_v56 = vor.u32 %v5417_v10, %v4505_v46  ;;  %v157_v9 = vld [vmem:[%s8427_s0 + $0x260] sm:$0xff] }
  0xd9   :  { %v6708_v55 = vadd.f32 %v1587_v51, %v1539_v52  ;;  %v162_v51 = vld [vmem:[%s8427_s0 + $0x288] sm:$0xff]  ;;  %v1475_v52 = vadd.f32 %v6579_v61, %v6532_v18  ;;  %v163_v28 = vld [vmem:[%s8427_s0 + $0x290] sm:$0xff]  ;;  %1951 = vmatpush.bf16.msra.mxu2 %v4652_v31  ;;  %v5381_v26 = vld [vmem:[%s8428_s1 + $0x184] sm:$0xf]  ;;  %v6764_v44 = vpack.c.bf16 %v164_v16, %v157_v9 }
  0xda   :  { %v4361_v61 = vld [vmem:[%s8428_s1 + $0x190] sm:$0xf0]  ;;  %v5413_v10 = vld [vmem:[%s8428_s1 + $0x284] sm:$0xf]  ;;  %v6751_v31 = vpack.c.bf16 %v162_v51, %v155_v11  ;;  %1854 = vmatpush.bf16.msra.mxu0 %v4380_v8 }
  0xdb   :  { %v4489_v53 = vld [vmem:[%s8428_s1 + $0x290] sm:$0xf0]  ;;  %v5445_v58 = vld [vmem:[%s8428_s1 + $0x384] sm:$0xf]  ;;  %8563 = vst [vmem:[#allocation44_spill] sm:$0xff] %v6764_v44  ;;  %v4364_v51 = vor.u32 %v5381_v26, %v4361_v61 }
  0xdc   :  { %v1491_v45 = vpop.f32.mrf.mxu3  ;;  %8561 = vst [vmem:[#allocation42_spill] sm:$0xff] %v6751_v31  ;;  %1903 = vmatpush.bf16.msra.mxu1 %v4508_v56  ;;  %v4492_v20 = vor.u32 %v5413_v10, %v4489_v53  ;;  %v4620_v63 = vor.u32 %v5445_v58, %v4617_v22  ;;  %v5377_v16 = vld [vmem:[%s8428_s1 + $0x164] sm:$0xf]  ;;  %v4169_v22 = vld [vmem:[%s8428_s1 + $0x10] sm:$0xf0] }
  0xdd   :  { %v1492_v46 = vadd.f32 %v1491_v45, %v6532_v18  ;;  %v6762_v45 = vpack.c.bf16 %v163_v28, %v156_v5  ;;  %1952 = vmatpush.bf16.msra.mxu2 %v4636_v0  ;;  %v1477_v0 = vadd.f32 %v6599_v40, %v6532_v18  ;;  %v5409_v56 = vld [vmem:[%s8428_s1 + $0x264] sm:$0xf]  ;;  %v4329_v61 = vld [vmem:[%s8428_s1 + $0x150] sm:$0xf0] }
  0xde   :  { %v1589_v42 = vpop.f32.mrf.mxu2  ;;  %v1523_v21 = vpop.f32.mrf.mxu0  ;;  %1855 = vmatpush.bf16.msra.mxu0 %v4364_v51  ;;  %v5441_v28 = vld [vmem:[%s8428_s1 + $0x364] sm:$0xf]  ;;  %v4457_v58 = vld [vmem:[%s8428_s1 + $0x250] sm:$0xf0] }
  0xdf   :  { %8562 = vst [vmem:[#allocation43_spill] sm:$0xff] %v6762_v45  ;;  %v1541_v33 = vadd.f32 %v1540_v32, %v1492_v46  ;;  %v6766_v8 = vadd.f32 %v1523_v21, %v1475_v52  ;;  %v5333_v21 = vld [vmem:[%s8428_s1 + $0x4] sm:$0xf]  ;;  %v4473_v52 = vld [vmem:[%s8428_s1 + $0x270] sm:$0xf0] }
  0xe0   :  { %v1543_v11 = vpop.f32.mrf.mxu1  ;;  %1904 = vmatpush.bf16.msra.mxu1 %v4492_v20  ;;  %v4172_v32 = vor.u32 %v5333_v21, %v4169_v22  ;;  %v4476_v26 = vor.u32 %v5409_v56, %v4473_v52  ;;  %v4601_v20 = vld [vmem:[%s8428_s1 + $0x370] sm:$0xf0]  ;;  %v5373_v40 = vld [vmem:[%s8428_s1 + $0x144] sm:$0xf]  ;;  %v168_v52 = vld [vmem:[%s8427_s0 + $0x2b8] sm:$0xff] }
  0xe1   :  { %v6768_v57 = vadd.f32 %v1589_v42, %v1541_v33  ;;  %1640 = vmatmul.bf16.gmra.mxu3 %v6749_v25  ;;  %1689 = vmatmul.bf16.gmra.mxu0 %v6751_v31  ;;  %v4345_v42 = vld [vmem:[%s8428_s1 + $0x170] sm:$0xf0]  ;;  %v4604_v53 = vor.u32 %v5441_v28, %v4601_v20  ;;  %v5437_v33 = vld [vmem:[%s8428_s1 + $0x344] sm:$0xf] }
  0xe2   :  { %v4348_v5 = vor.u32 %v5377_v16, %v4345_v42  ;;  %1953 = vmatpush.bf16.msra.mxu2 %v4620_v63  ;;  %1810 = vmatpush.bf16.msra.mxu3 %v4172_v32  ;;  %v5405_v63 = vld [vmem:[%s8428_s1 + $0x244] sm:$0xf]  ;;  %v4332_v16 = vor.u32 %v5373_v40, %v4329_v61  ;;  %v4585_v21 = vld [vmem:[%s8428_s1 + $0x350] sm:$0xf0] }
  0xe3   :  { %1738 = vmatmul.bf16.gmra.mxu1 %v6762_v45  ;;  %4954 = vmatmul.msk.bf16.gmra.mxu2 %vm1435_vm0, %v6764_v44  ;;  %v4460_v56 = vor.u32 %v5405_v63, %v4457_v58  ;;  %v175_v28 = vld [vmem:[%s8427_s0 + $0x2f0] sm:$0xff]  ;;  %v5433_v40 = vld [vmem:[%s8428_s1 + $0x324] sm:$0xf] }
  0xe4   :  { %v1494_v9 = vpop.f32.mrf.mxu3  ;;  %1856 = vmatpush.bf16.msra.mxu0 %v4348_v5  ;;  %1905 = vmatpush.bf16.msra.mxu1 %v4476_v26  ;;  %v5401_v5 = vld [vmem:[%s8428_s1 + $0x224] sm:$0xf]  ;;  %v4441_v20 = vld [vmem:[%s8428_s1 + $0x230] sm:$0xf0] }
  0xe5   :  { %v1495_v10 = vadd.f32 %v1494_v9, %v6532_v18  ;;  %v4588_v9 = vor.u32 %v5437_v33, %v4585_v21  ;;  %v4569_v61 = vld [vmem:[%s8428_s1 + $0x330] sm:$0xf0]  ;;  %v177_v63 = vld [vmem:[%s8427_s0 + $0x300] sm:$0xff]  ;;  %v178_v33 = vld [vmem:[%s8427_s0 + $0x308] sm:$0xff]  ;;  %v4444_v21 = vor.u32 %v5401_v5, %v4441_v20 }
  0xe6   :  { %v1592_v46 = vpop.f32.mrf.mxu2  ;;  %v1525_v51 = vpop.f32.mrf.mxu0  ;;  %1954 = vmatpush.bf16.msra.mxu2 %v4604_v53  ;;  %v170_v53 = vld [vmem:[%s8427_s0 + $0x2c8] sm:$0xff]  ;;  %v171_v58 = vld [vmem:[%s8427_s0 + $0x2d0] sm:$0xff]  ;;  %v4572_v44 = vor.u32 %v5433_v40, %v4569_v61  ;;  %v5365_v45 = vld [vmem:[%s8428_s1 + $0x104] sm:$0xf] }
  0xe7   :  { %v1544_v22 = vadd.f32 %v1543_v11, %v1495_v10  ;;  %v6820_v42 = vadd.f32 %v1525_v51, %v1477_v0  ;;  %v5369_v11 = vld [vmem:[%s8428_s1 + $0x124] sm:$0xf]  ;;  %v4313_v0 = vld [vmem:[%s8428_s1 + $0x130] sm:$0xf0]  ;;  %v6889_v61 = vpack.c.bf16 %v177_v63, %v170_v53 }
  0xe8   :  { %v1545_v32 = vpop.f32.mrf.mxu1  ;;  %v169_v10 = vld [vmem:[%s8427_s0 + $0x2c0] sm:$0xff]  ;;  %1857 = vmatpush.bf16.msra.mxu0 %v4332_v16  ;;  %1906 = vmatpush.bf16.msra.mxu1 %v4460_v56  ;;  %v4316_v51 = vor.u32 %v5369_v11, %v4313_v0  ;;  %v4297_v31 = vld [vmem:[%s8428_s1 + $0x110] sm:$0xf0]  ;;  %v6876_v11 = vpack.c.bf16 %v175_v28, %v168_v52 }
  0xe9   :  { %v6837_v26 = vadd.f32 %v1592_v46, %v1544_v22  ;;  %v176_v46 = vld [vmem:[%s8427_s0 + $0x2f8] sm:$0xff]  ;;  %v5429_v5 = vld [vmem:[%s8428_s1 + $0x304] sm:$0xf]  ;;  %v4553_v20 = vld [vmem:[%s8428_s1 + $0x310] sm:$0xf0]  ;;  %8566 = vst [vmem:[#allocation47_spill] sm:$0xff] %v6889_v61  ;;  %v4300_v52 = vor.u32 %v5365_v45, %v4297_v31 }
  0xea   :  { %1955 = vmatpush.bf16.msra.mxu2 %v4588_v9  ;;  %8564 = vst [vmem:[#allocation45_spill] sm:$0xff] %v6876_v11  ;;  %v6878_v0 = vpack.c.bf16 %v176_v46, %v169_v10  ;;  %v4425_v9 = vld [vmem:[%s8428_s1 + $0x210] sm:$0xf0]  ;;  %v4556_v15 = vor.u32 %v5429_v5, %v4553_v20  ;;  %v192_v5 = vld [vmem:[%s8427_s0 + $0x378] sm:$0xff] }
  0xeb   :  { %v4428_v19 = vor.u32 %v5397_v54, %v4425_v9  ;;  %v4793_v54 = vld [vmem:[%s8428_s1 + $0x4f0] sm:$0xf0]  ;;  %v185_v9 = vld [vmem:[%s8427_s0 + $0x340] sm:$0xff] }
  0xec   :  { %v1496_v22 = vpop.f32.mrf.mxu3  ;;  %8565 = vst [vmem:[#allocation46_spill] sm:$0xff] %v6878_v0  ;;  %1858 = vmatpush.bf16.msra.mxu0 %v4316_v51  ;;  %1907 = vmatpush.bf16.msra.mxu1 %v4444_v21  ;;  %v182_v21 = vld [vmem:[%s8427_s0 + $0x328] sm:$0xff] }
  0xed   :  { %v1497_v16 = vadd.f32 %v1496_v22, %v6532_v18  ;;  %v6891_v22 = vpack.c.bf16 %v178_v33, %v171_v58 }
  0xee   :  { %v1594_v56 = vpop.f32.mrf.mxu2  ;;  %v1567_v40 = vpop.f32.mrf.mxu0  ;;  %1956 = vmatpush.bf16.msra.mxu2 %v4572_v44 }
  0xef   :  { %8567 = vst [vmem:[#allocation48_spill] sm:$0xff] %v6891_v22  ;;  %v1546_v28 = vadd.f32 %v1545_v32, %v1497_v16  ;;  %v6894_v46 = vadd.f32 %v1567_v40, %v6637_v60  ;;  %v5489_v60 = vld [vmem:[%s8428_s1 + $0x4e4] sm:$0xf]  ;;  %v190_v16 = vld [vmem:[%s8427_s0 + $0x368] sm:$0xff] }
  0xf0   :  { %v1548_v10 = vpop.f32.mrf.mxu1  ;;  %1859 = vmatpush.bf16.msra.mxu0 %v4300_v52  ;;  %1908 = vmatpush.bf16.msra.mxu1 %v4428_v19  ;;  %v4796_v31 = vor.u32 %v5489_v60, %v4793_v54  ;;  %v189_v19 = vld [vmem:[%s8427_s0 + $0x360] sm:$0xff] }
  0xf1   :  { %v6896_v12 = vadd.f32 %v1594_v56, %v1546_v28  ;;  %1645 = vmatmul.bf16.gmra.mxu3 %v6876_v11  ;;  %1694 = vmatmul.bf16.gmra.mxu0 %v6878_v0  ;;  %v191_v56 = vld [vmem:[%s8427_s0 + $0x370] sm:$0xff]  ;;  %v6938_v28 = vpack.c.bf16 %v189_v19, %v182_v21 }
  0xf2   :  { %1957 = vmatpush.bf16.msra.mxu2 %v4556_v15  ;;  %1999 = vmatpush.bf16.msrb.mxu3 %v4796_v31  ;;  %v183_v15 = vld [vmem:[%s8427_s0 + $0x330] sm:$0xff]  ;;  %v6944_v31 = vpack.c.bf16 %v192_v5, %v185_v9 }
  0xf3   :  { %1743 = vmatmul.bf16.gmra.mxu1 %v6889_v61  ;;  %4955 = vmatmul.msk.bf16.gmra.mxu2 %vm1435_vm0, %v6891_v22  ;;  %8568 = vst [vmem:[#allocation49_spill] sm:$0xff] %v6938_v28 }
  0xf4   :  { %v1499_v45 = vpop.f32.mrf.mxu3  ;;  %8571 = vst [vmem:[#allocation52_spill] sm:$0xff] %v6944_v31 }
  0xf5   :  { %v1500_v44 = vadd.f32 %v1499_v45, %v6532_v18 }
  0xf6   :  { %v1597_v32 = vpop.f32.mrf.mxu2  ;;  %v1569_v53 = vpop.f32.mrf.mxu0 }
  0xf7   :  { %v1549_v63 = vadd.f32 %v1548_v10, %v1500_v44  ;;  %v1570_v33 = vadd.f32 %v1569_v53, %v6691_v17  ;;  %v184_v17 = vld [vmem:[%s8427_s0 + $0x338] sm:$0xff]  ;;  %v6940_v10 = vpack.c.bf16 %v190_v16, %v183_v15  ;;  %s4151_s0 = sshll.u32 %s8436_s9, 4  ;;  %s4152_s0 = int_to_ptr.hbm [resolvable:$true] %s4151_s0 }
  0xf8   :  { %v1550_v58 = vpop.f32.mrf.mxu1  ;;  %v6942_v54 = vpack.c.bf16 %v191_v56, %v184_v17  ;;  %v5485_v17 = vld [vmem:[%s8428_s1 + $0x4c4] sm:$0xf]  ;;  %v4777_v56 = vld [vmem:[%s8428_s1 + $0x4d0] sm:$0xf0] }
  0xf9   :  { %v6911_v51 = vadd.f32 %v1597_v32, %v1549_v63  ;;  %8569 = vst [vmem:[#allocation50_spill] sm:$0xff] %v6940_v10  ;;  %v4780_v9 = vor.u32 %v5485_v17, %v4777_v56 }
  0xfa   :  { %8570 = vst [vmem:[#allocation51_spill] sm:$0xff] %v6942_v54 }
  0xfb   :  { %2000 = vmatpush.bf16.msrb.mxu3 %v4780_v9 }
  0xfc   :  { %v1501_v20 = vpop.f32.mrf.mxu3 }
  0xfd   :  { %v1502_v40 = vadd.f32 %v1501_v20, %v6532_v18 }
  0xfe   :  { %v1599_v52 = vpop.f32.mrf.mxu2  ;;  %v1572_v60 = vpop.f32.mrf.mxu0 }
  0xff   :  { %v1551_v45 = vadd.f32 %v1550_v58, %v1502_v40  ;;  %v1573_v32 = vadd.f32 %v1572_v60, %v6766_v8 }
 0x100   :  { %v1553_v44 = vpop.f32.mrf.mxu1 }
 0x101   :  { %v6947_v53 = vadd.f32 %v1599_v52, %v1551_v45  ;;  %1650 = vmatmul.bf16.gmra.mxu3 %v6938_v28  ;;  %1699 = vmatmul.bf16.gmra.mxu0 %v6940_v10 }
 0x103   :  { %1748 = vmatmul.bf16.gmra.mxu1 %v6942_v54  ;;  %4956 = vmatmul.msk.bf16.gmra.mxu2 %vm1435_vm0, %v6944_v31 }
 0x104   :  { %v1504_v63 = vpop.f32.mrf.mxu3 }
 0x105   :  { %v1505_v21 = vadd.f32 %v1504_v63, %v6532_v18 }
 0x106   :  { %v1602_v19 = vpop.f32.mrf.mxu2  ;;  %v1574_v15 = vpop.f32.mrf.mxu0 }
 0x107   :  { %v1554_v58 = vadd.f32 %v1553_v44, %v1505_v21  ;;  %v1575_v8 = vadd.f32 %v1574_v15, %v6820_v42  ;;  %v4761_v15 = vld [vmem:[%s8428_s1 + $0x4b0] sm:$0xf0] }
 0x108   :  { %v1555_v16 = vpop.f32.mrf.mxu1 }
 0x109   :  { %v6962_v5 = vadd.f32 %v1602_v19, %v1554_v58 }
 0x10c   :  { %v1506_v20 = vpop.f32.mrf.mxu3 }
 0x10d   :  { %v1507_v40 = vadd.f32 %v1506_v20, %v6532_v18  ;;  %v5481_v18 = vld [vmem:[%s8428_s1 + $0x4a4] sm:$0xf] }
 0x10e   :  { %v1604_v52 = vpop.f32.mrf.mxu2  ;;  %v1665_v60 = vpop.f32.mrf.mxu0 }
 0x10f   :  { %v1556_v45 = vadd.f32 %v1555_v16, %v1507_v40  ;;  %v4764_v16 = vor.u32 %v5481_v18, %v4761_v15 }
 0x110   :  { %v1714_v44 = vpop.f32.mrf.mxu1 }
 0x111   :  { %v6965_v42 = vadd.f32 %v1604_v52, %v1556_v45  ;;  %1811 = vmatmul.bf16.vlgmr.msra.gmra.mxu3 %v6045_v23  ;;  %1860 = vmatmul.bf16.vlgmr.msra.gmra.mxu0 %v6159_v2 }
 0x112   :  { %2001 = vmatpush.bf16.msrb.mxu3 %v4764_v16 }
 0x113   :  { %1909 = vmatmul.bf16.vlgmr.msra.gmra.mxu1 %v6317_v13  ;;  %1958 = vmatmul.bf16.vlgmr.msra.gmra.mxu2 %v6435_v14 }
 0x114   :  { %v1616_v63 = vpop.f32.mrf.mxu3 }
 0x115   :  { %v1617_v21 = vadd.f32 %v1616_v63, %v6894_v46 }
 0x116   :  { %v1763_v19 = vpop.f32.mrf.mxu2  ;;  %v1667_v58 = vpop.f32.mrf.mxu0 }
 0x117   :  { %v1666_v17 = vadd.f32 %v1665_v60, %v1617_v21 }
 0x118   :  { %v1716_v56 = vpop.f32.mrf.mxu1 }
 0x119   :  { %v1715_v9 = vadd.f32 %v1714_v44, %v1666_v17 }
 0x11b   :  { %v1764_v20 = vadd.f32 %v1763_v19, %v1715_v9 }
 0x11c   :  { %v1618_v40 = vpop.f32.mrf.mxu3 }
 0x11d   :  { %v1619_v52 = vadd.f32 %v1618_v40, %v1570_v33  ;;  %v2832_v18 = vmax.f32 %v1764_v20, 0.0  ;;  %v5477_v33 = vld [vmem:[%s8428_s1 + $0x484] sm:$0xf] }
 0x11e   :  { %v1765_v45 = vpop.f32.mrf.mxu2  ;;  %v1670_v46 = vpop.f32.mrf.mxu0 }
 0x11f   :  { %v1668_v63 = vadd.f32 %v1667_v58, %v1619_v52  ;;  %v4745_v58 = vld [vmem:[%s8428_s1 + $0x490] sm:$0xf0] }
 0x120   :  { %v1719_v14 = vpop.f32.mrf.mxu1  ;;  %v4748_v17 = vor.u32 %v5477_v33, %v4745_v58  ;;  %v4729_v33 = vld [vmem:[%s8428_s1 + $0x470] sm:$0xf0] }
 0x121   :  { %v1717_v13 = vadd.f32 %v1716_v56, %v1668_v63  ;;  %1816 = vmatmul.bf16.gmra.mxu3 %v6105_v47  ;;  %1865 = vmatmul.bf16.gmra.mxu0 %v6229_v36 }
 0x122   :  { %2002 = vmatpush.bf16.msrb.mxu3 %v4748_v17 }
 0x123   :  { %1914 = vmatmul.bf16.gmra.mxu1 %v6383_v43  ;;  %1963 = vmatmul.bf16.gmra.mxu2 %v6478_v41  ;;  %v1766_v60 = vadd.f32 %v1765_v45, %v1717_v13 }
 0x124   :  { %v1621_v21 = vpop.f32.mrf.mxu3 }
 0x125   :  { %v2836_v44 = vmax.f32 %v1766_v60, 0.0  ;;  %v1622_v19 = vadd.f32 %v1621_v21, %v1573_v32 }
 0x126   :  { %v1768_v15 = vpop.f32.mrf.mxu2  ;;  %v1672_v16 = vpop.f32.mrf.mxu0 }
 0x127   :  { %v6988_v56 = vpack.c.bf16 %v2836_v44, %v2832_v18  ;;  %v1671_v9 = vadd.f32 %v1670_v46, %v1622_v19 }
 0x128   :  { %v1721_v40 = vpop.f32.mrf.mxu1 }
 0x129   :  { %8572 = vst [vmem:[#allocation53_spill] sm:$0xff] %v6988_v56  ;;  %v1720_v13 = vadd.f32 %v1719_v14, %v1671_v9 }
 0x12b   :  { %v1769_v20 = vadd.f32 %v1768_v15, %v1720_v13  ;;  %v5473_v15 = vld [vmem:[%s8428_s1 + $0x464] sm:$0xf] }
 0x12c   :  { %v1623_v52 = vpop.f32.mrf.mxu3 }
 0x12d   :  { %v1624_v32 = vadd.f32 %v1623_v52, %v1575_v8  ;;  %v2840_v44 = vmax.f32 %v1769_v20, 0.0 }
 0x12e   :  { %v1770_v45 = vpop.f32.mrf.mxu2  ;;  %v1675_v63 = vpop.f32.mrf.mxu0 }
 0x12f   :  { %v1673_v60 = vadd.f32 %v1672_v16, %v1624_v32  ;;  %v4732_v16 = vor.u32 %v5473_v15, %v4729_v33 }
 0x130   :  { %v1724_v21 = vpop.f32.mrf.mxu1 }
 0x131   :  { %v1722_v41 = vadd.f32 %v1721_v40, %v1673_v60  ;;  %1821 = vmatmul.bf16.gmra.mxu3 %v6047_v24  ;;  %1870 = vmatmul.bf16.gmra.mxu0 %v6055_v29 }
 0x132   :  { %2003 = vmatpush.bf16.msrb.mxu3 %v4732_v16 }
 0x133   :  { %1919 = vmatmul.bf16.gmra.mxu1 %v6057_v30  ;;  %1968 = vmatmul.bf16.gmra.mxu2 %v6521_v62  ;;  %v1771_v46 = vadd.f32 %v1770_v45, %v1722_v41 }
 0x134   :  { %v1626_v18 = vpop.f32.mrf.mxu3 }
 0x135   :  { %v2844_v14 = vmax.f32 %v1771_v46, 0.0  ;;  %v1627_v19 = vadd.f32 %v1626_v18, %v6548_v39 }
 0x136   :  { %v1773_v8 = vpop.f32.mrf.mxu2  ;;  %v1677_v58 = vpop.f32.mrf.mxu0 }
 0x137   :  { %v1676_v17 = vadd.f32 %v1675_v63, %v1627_v19  ;;  %v7001_v40 = vpack.c.bf16 %v2844_v14, %v2840_v44  ;;  %v5469_v19 = vld [vmem:[%s8428_s1 + $0x444] sm:$0xf] }
 0x138   :  { %v1726_v9 = vpop.f32.mrf.mxu1 }
 0x139   :  { %8573 = vst [vmem:[#allocation54_spill] sm:$0xff] %v7001_v40  ;;  %v1725_v41 = vadd.f32 %v1724_v21, %v1676_v17 }
 0x13b   :  { %v1774_v13 = vadd.f32 %v1773_v8, %v1725_v41  ;;  %v4713_v8 = vld [vmem:[%s8428_s1 + $0x450] sm:$0xf0] }
 0x13c   :  { %v1628_v20 = vpop.f32.mrf.mxu3  ;;  %v4716_v33 = vor.u32 %v5469_v19, %v4713_v8  ;;  %v4905_v19 = vld [vmem:[%s8428_s1 + $0x5d0] sm:$0xf0]  ;;  %v4271_v8 = vld [vmem:[%s8428_s1 + $0xc8] sm:$0xf] }
 0x13d   :  { %v1629_v39 = vadd.f32 %v1628_v20, %v6585_v27  ;;  %v2848_v21 = vmax.f32 %v1774_v13, 0.0 }
 0x13e   :  { %v1775_v52 = vpop.f32.mrf.mxu2  ;;  %v1680_v32 = vpop.f32.mrf.mxu0  ;;  %2004 = vmatpush.bf16.msrb.mxu3 %v4716_v33 }
 0x13f   :  { %v1678_v45 = vadd.f32 %v1677_v58, %v1629_v39 }
 0x140   :  { %v1729_v60 = vpop.f32.mrf.mxu1 }
 0x141   :  { %v1727_v46 = vadd.f32 %v1726_v9, %v1678_v45  ;;  %1826 = vmatmul.bf16.gmra.mxu3 %v6107_v48  ;;  %1875 = vmatmul.bf16.gmra.mxu0 %v6109_v49 }
 0x143   :  { %1924 = vmatmul.bf16.gmra.mxu1 %v6111_v50  ;;  %1973 = vmatmul.bf16.gmra.mxu2 %v6575_v59  ;;  %v1776_v63 = vadd.f32 %v1775_v52, %v1727_v46  ;;  %v5521_v46 = vld [vmem:[%s8428_s1 + $0x5e4] sm:$0xf] }
 0x144   :  { %v1631_v18 = vpop.f32.mrf.mxu3 }
 0x145   :  { %v2852_v44 = vmax.f32 %v1776_v63, 0.0  ;;  %v1632_v14 = vadd.f32 %v1631_v18, %v6601_v34  ;;  %v5364_v18 = vld [vmem:[%s8428_s1 + $0xf4] sm:$0xf0] }
 0x146   :  { %v1778_v27 = vpop.f32.mrf.mxu2  ;;  %v1682_v15 = vpop.f32.mrf.mxu0 }
 0x147   :  { %v1681_v58 = vadd.f32 %v1680_v32, %v1632_v14  ;;  %v7015_v17 = vpack.c.bf16 %v2852_v44, %v2848_v21  ;;  %v4921_v32 = vld [vmem:[%s8428_s1 + $0x5f0] sm:$0xf0] }
 0x148   :  { %v1731_v16 = vpop.f32.mrf.mxu1 }
 0x149   :  { %8574 = vst [vmem:[#allocation55_spill] sm:$0xff] %v7015_v17  ;;  %v1730_v9 = vadd.f32 %v1729_v60, %v1681_v58  ;;  %v4287_v60 = vld [vmem:[%s8428_s1 + $0xe8] sm:$0xf] }
 0x14a   :  { %v4288_v21 = vor.u32 %v5364_v18, %v4287_v60  ;;  %v4255_v18 = vld [vmem:[%s8428_s1 + $0xa8] sm:$0xf] }
 0x14b   :  { %v1779_v41 = vadd.f32 %v1778_v27, %v1730_v9  ;;  %v5517_v27 = vld [vmem:[%s8428_s1 + $0x5c4] sm:$0xf] }
 0x14c   :  { %v1633_v13 = vpop.f32.mrf.mxu3  ;;  %2146 = vmatpush.bf16.msrb.mxu2 %v4288_v21  ;;  %v5465_v9 = vld [vmem:[%s8428_s1 + $0x424] sm:$0xf] }
 0x14d   :  { %v1634_v34 = vadd.f32 %v1633_v13, %v6639_v6  ;;  %v4924_v6 = vor.u32 %v5521_v46, %v4921_v32  ;;  %v4697_v13 = vld [vmem:[%s8428_s1 + $0x430] sm:$0xf0]  ;;  %v5360_v46 = vld [vmem:[%s8428_s1 + $0xd4] sm:$0xf0] }
 0x14e   :  { %v1780_v20 = vpop.f32.mrf.mxu2  ;;  %v1685_v39 = vpop.f32.mrf.mxu0 }
 0x14f   :  { %v1683_v52 = vadd.f32 %v1682_v15, %v1634_v34  ;;  %2048 = vmatpush.bf16.msrb.mxu0 %v4924_v6  ;;  %v2856_v15 = vmax.f32 %v1779_v41, 0.0  ;;  %v4908_v34 = vor.u32 %v5517_v27, %v4905_v19  ;;  %v4889_v6 = vld [vmem:[%s8428_s1 + $0x5b0] sm:$0xf0] }
 0x150   :  { %v1734_v45 = vpop.f32.mrf.mxu1 }
 0x151   :  { %v1732_v63 = vadd.f32 %v1731_v16, %v1683_v52  ;;  %1831 = vmatmul.bf16.gmra.mxu3 %v6157_v1  ;;  %1880 = vmatmul.bf16.gmra.mxu0 %v6162_v3  ;;  %v4700_v52 = vor.u32 %v5465_v9, %v4697_v13 }
 0x153   :  { %1929 = vmatmul.bf16.gmra.mxu1 %v6164_v4  ;;  %1978 = vmatmul.bf16.gmra.mxu2 %v6629_v35  ;;  %v1781_v44 = vadd.f32 %v1780_v20, %v1732_v63  ;;  %v5513_v63 = vld [vmem:[%s8428_s1 + $0x5a4] sm:$0xf] }
 0x154   :  { %v1636_v14 = vpop.f32.mrf.mxu3  ;;  %2049 = vmatpush.bf16.msrb.mxu0 %v4908_v34  ;;  %2005 = vmatpush.bf16.msrb.mxu3 %v4700_v52 }
 0x155   :  { %v2860_v33 = vmax.f32 %v1781_v44, 0.0  ;;  %v1637_v58 = vadd.f32 %v1636_v14, %v6708_v55  ;;  %v4272_v55 = vor.u32 %v5360_v46, %v4271_v8  ;;  %v5356_v44 = vld [vmem:[%s8428_s1 + $0xb4] sm:$0xf0]  ;;  %v5509_v8 = vld [vmem:[%s8428_s1 + $0x584] sm:$0xf] }
 0x156   :  { %v1783_v16 = vpop.f32.mrf.mxu2  ;;  %v1687_v20 = vpop.f32.mrf.mxu0  ;;  %v4256_v14 = vor.u32 %v5356_v44, %v4255_v18  ;;  %v4841_v44 = vld [vmem:[%s8428_s1 + $0x550] sm:$0xf0] }
 0x157   :  { %v1686_v41 = vadd.f32 %v1685_v39, %v1637_v58  ;;  %v7053_v60 = vpack.c.bf16 %v2860_v33, %v2856_v15  ;;  %2147 = vmatpush.bf16.msrb.mxu2 %v4272_v55  ;;  %v4892_v39 = vor.u32 %v5513_v63, %v4889_v6  ;;  %v4873_v15 = vld [vmem:[%s8428_s1 + $0x590] sm:$0xf0]  ;;  %v4223_v55 = vld [vmem:[%s8428_s1 + $0x68] sm:$0xf]  ;;  %v5348_v6 = vld [vmem:[%s8428_s1 + $0x74] sm:$0xf0] }
 0x158   :  { %v1736_v32 = vpop.f32.mrf.mxu1  ;;  %v4876_v9 = vor.u32 %v5509_v8, %v4873_v15 }
 0x159   :  { %8575 = vst [vmem:[#allocation56_spill] sm:$0xff] %v7053_v60  ;;  %v1735_v21 = vadd.f32 %v1734_v45, %v1686_v41  ;;  %2050 = vmatpush.bf16.msrb.mxu0 %v4892_v39  ;;  %v4239_v45 = vld [vmem:[%s8428_s1 + $0x88] sm:$0xf]  ;;  %v5505_v41 = vld [vmem:[%s8428_s1 + $0x564] sm:$0xf] }
 0x15b   :  { %v1784_v27 = vadd.f32 %v1783_v16, %v1735_v21  ;;  %2148 = vmatpush.bf16.msrb.mxu2 %v4256_v14  ;;  %v5352_v16 = vld [vmem:[%s8428_s1 + $0x94] sm:$0xf0]  ;;  %v4224_v21 = vor.u32 %v5348_v6, %v4223_v55  ;;  %v4207_v14 = vld [vmem:[%s8428_s1 + $0x48] sm:$0xf]  ;;  %v5497_v55 = vld [vmem:[%s8428_s1 + $0x524] sm:$0xf] }
 0x15c   :  { %v1638_v19 = vpop.f32.mrf.mxu3  ;;  %v4240_v46 = vor.u32 %v5352_v16, %v4239_v45 }
 0x15d   :  { %v1639_v33 = vadd.f32 %v1638_v19, %v6768_v57  ;;  %2051 = vmatpush.bf16.msrb.mxu0 %v4876_v9  ;;  %v4857_v57 = vld [vmem:[%s8428_s1 + $0x570] sm:$0xf0]  ;;  %v2864_v19 = vmax.f32 %v1784_v27, 0.0 }
 0x15e   :  { %v1785_v58 = vpop.f32.mrf.mxu2  ;;  %v1690_v13 = vpop.f32.mrf.mxu0 }
 0x15f   :  { %v1688_v34 = vadd.f32 %v1687_v20, %v1639_v33  ;;  %v4860_v20 = vor.u32 %v5505_v41, %v4857_v57  ;;  %2149 = vmatpush.bf16.msrb.mxu2 %v4240_v46  ;;  %v5461_v33 = vld [vmem:[%s8428_s1 + $0x404] sm:$0xf]  ;;  %v5344_v46 = vld [vmem:[%s8428_s1 + $0x54] sm:$0xf0] }
 0x160   :  { %v1739_v52 = vpop.f32.mrf.mxu1 }
 0x161   :  { %v1737_v63 = vadd.f32 %v1736_v32, %v1688_v34  ;;  %1836 = vmatmul.bf16.gmra.mxu3 %v6227_v7  ;;  %1885 = vmatmul.bf16.gmra.mxu0 %v6231_v37  ;;  %v5501_v32 = vld [vmem:[%s8428_s1 + $0x544] sm:$0xf] }
 0x162   :  { %2052 = vmatpush.bf16.msrb.mxu0 %v4860_v20  ;;  %v4844_v9 = vor.u32 %v5501_v32, %v4841_v44  ;;  %v4191_v20 = vld [vmem:[%s8428_s1 + $0x28] sm:$0xf]  ;;  %v5493_v44 = vld [vmem:[%s8428_s1 + $0x504] sm:$0xf] }
 0x163   :  { %1934 = vmatmul.bf16.gmra.mxu1 %v6233_v38  ;;  %1983 = vmatmul.bf16.gmra.mxu2 %v6749_v25  ;;  %v1786_v18 = vadd.f32 %v1785_v58, %v1737_v63  ;;  %v4681_v58 = vld [vmem:[%s8428_s1 + $0x410] sm:$0xf0] }
 0x164   :  { %v1641_v39 = vpop.f32.mrf.mxu3  ;;  %v4684_v34 = vor.u32 %v5461_v33, %v4681_v58  ;;  %2150 = vmatpush.bf16.msrb.mxu2 %v4224_v21  ;;  %v4825_v63 = vld [vmem:[%s8428_s1 + $0x530] sm:$0xf0]  ;;  %v4175_v33 = vld [vmem:[%s8428_s1 + $0x8] sm:$0xf] }
 0x165   :  { %v2868_v8 = vmax.f32 %v1786_v18, 0.0  ;;  %v1642_v15 = vadd.f32 %v1641_v39, %v6837_v26  ;;  %v4208_v26 = vor.u32 %v5344_v46, %v4207_v14  ;;  %v4828_v6 = vor.u32 %v5497_v55, %v4825_v63  ;;  %v5340_v18 = vld [vmem:[%s8428_s1 + $0x34] sm:$0xf0]  ;;  %v4809_v14 = vld [vmem:[%s8428_s1 + $0x510] sm:$0xf0]  ;;  %v8578_v63 = vld [vmem:[#allocation20_spill] sm:$0xff] }
 0x166   :  { %v1788_v45 = vpop.f32.mrf.mxu2  ;;  %v1692_v16 = vpop.f32.mrf.mxu0  ;;  %2053 = vmatpush.bf16.msrb.mxu0 %v4844_v9  ;;  %2006 = vmatpush.bf16.msrb.mxu3 %v4684_v34  ;;  %v4192_v39 = vor.u32 %v5340_v18, %v4191_v20  ;;  %v5336_v34 = vld [vmem:[%s8428_s1 + $0x14] sm:$0xf0]  ;;  %v8577_v55 = vld [vmem:[#allocation18_spill] sm:$0xff]  ;;  %v8579_v20 = vld [vmem:[#allocation21_spill] sm:$0xff] }
 0x167   :  { %v1691_v27 = vadd.f32 %v1690_v13, %v1642_v15  ;;  %v7115_v57 = vpack.c.bf16 %v2868_v8, %v2864_v19  ;;  %v4812_v15 = vor.u32 %v5493_v44, %v4809_v14  ;;  %v5396_v44 = vld [vmem:[%s8428_s1 + $0x1f4] sm:$0xf0] }
 0x168   :  { %v1741_v41 = vpop.f32.mrf.mxu1  ;;  %2151 = vmatpush.bf16.msrb.mxu2 %v4208_v26 }
 0x169   :  { %8576 = vst [vmem:[#allocation57_spill] sm:$0xff] %v7115_v57  ;;  %v1740_v13 = vadd.f32 %v1739_v52, %v1691_v27  ;;  %v5525_v52 = vld [vmem:[%s8428_s1 + $0x604] sm:$0xf] }
 0x16a   :  { %2054 = vmatpush.bf16.msrb.mxu0 %v4828_v6 }
 0x16b   :  { %v1789_v21 = vadd.f32 %v1788_v45, %v1740_v13  ;;  %v4937_v45 = vld [vmem:[%s8428_s1 + $0x610] sm:$0xf0] }
 0x16c   :  { %v1643_v32 = vpop.f32.mrf.mxu3  ;;  %v4940_v9 = vor.u32 %v5525_v52, %v4937_v45  ;;  %2152 = vmatpush.bf16.msrb.mxu2 %v4192_v39 }
 0x16d   :  { %v1644_v19 = vadd.f32 %v1643_v32, %v6896_v12  ;;  %v4176_v12 = vor.u32 %v5336_v34, %v4175_v33  ;;  %v2872_v18 = vmax.f32 %v1789_v21, 0.0 }
 0x16e   :  { %v1790_v8 = vpop.f32.mrf.mxu2  ;;  %v1695_v58 = vpop.f32.mrf.mxu0  ;;  %2055 = vmatpush.bf16.msrb.mxu0 %v4812_v15  ;;  %2104 = vmatpush.bf16.msrb.mxu1 %v4940_v9 }
 0x16f   :  { %v1693_v46 = vadd.f32 %v1692_v16, %v1644_v19 }
 0x170   :  { %v1744_v27 = vpop.f32.mrf.mxu1  ;;  %2153 = vmatpush.bf16.msrb.mxu2 %v4176_v12 }
 0x171   :  { %v1742_v26 = vadd.f32 %v1741_v41, %v1693_v46  ;;  %1841 = vmatmul.bf16.gmra.mxu3 %v8577_v55  ;;  %1890 = vmatmul.bf16.gmra.mxu0 %v8578_v63  ;;  %v4415_v41 = vld [vmem:[%s8428_s1 + $0x1e8] sm:$0xf] }
 0x172   :  { %v4416_v52 = vor.u32 %v5396_v44, %v4415_v41  ;;  %v8583_v41 = vld [vmem:[#allocation24_spill] sm:$0xff] }
 0x173   :  { %1939 = vmatmul.bf16.gmra.mxu1 %v8579_v20  ;;  %1988 = vmatmul.bf16.gmra.mxu2 %v6876_v11  ;;  %v1791_v13 = vadd.f32 %v1790_v8, %v1742_v26 }
 0x174   :  { %v1646_v6 = vpop.f32.mrf.mxu3  ;;  %2195 = vmatpush.bf16.msra.mxu3 %v4416_v52 }
 0x175   :  { %v2876_v32 = vmax.f32 %v1791_v13, 0.0  ;;  %v1647_v16 = vadd.f32 %v1646_v6, %v6911_v51  ;;  %v8581_v13 = vld [vmem:[#allocation22_spill] sm:$0xff]  ;;  %v8582_v6 = vld [vmem:[#allocation23_spill] sm:$0xff] }
 0x176   :  { %v1793_v39 = vpop.f32.mrf.mxu2  ;;  %v1697_v14 = vpop.f32.mrf.mxu0 }
 0x177   :  { %v1696_v19 = vadd.f32 %v1695_v58, %v1647_v16  ;;  %v7159_v8 = vpack.c.bf16 %v2876_v32, %v2872_v18 }
 0x178   :  { %v1746_v15 = vpop.f32.mrf.mxu1 }
 0x179   :  { %8580 = vst [vmem:[#allocation20_spill] sm:$0xff] %v7159_v8  ;;  %v1745_v21 = vadd.f32 %v1744_v27, %v1696_v19  ;;  %v4399_v27 = vld [vmem:[%s8428_s1 + $0x1c8] sm:$0xf] }
 0x17b   :  { %v1794_v45 = vadd.f32 %v1793_v39, %v1745_v21 }
 0x17c   :  { %v1648_v33 = vpop.f32.mrf.mxu3 }
 0x17d   :  { %v1649_v51 = vadd.f32 %v1648_v33, %v6947_v53  ;;  %v5392_v53 = vld [vmem:[%s8428_s1 + $0x1d4] sm:$0xf0]  ;;  %v2880_v16 = vmax.f32 %v1794_v45, 0.0 }
 0x17e   :  { %v1795_v9 = vpop.f32.mrf.mxu2  ;;  %v1700_v34 = vpop.f32.mrf.mxu0  ;;  %v4400_v32 = vor.u32 %v5392_v53, %v4399_v27 }
 0x17f   :  { %v1698_v46 = vadd.f32 %v1697_v14, %v1649_v51 }
 0x180   :  { %v1749_v12 = vpop.f32.mrf.mxu1  ;;  %2196 = vmatpush.bf16.msra.mxu3 %v4400_v32 }
 0x181   :  { %v1747_v26 = vadd.f32 %v1746_v15, %v1698_v46  ;;  %1846 = vmatmul.bf16.gmra.mxu3 %v8581_v13  ;;  %1895 = vmatmul.bf16.gmra.mxu0 %v8582_v6 }
 0x183   :  { %1944 = vmatmul.bf16.gmra.mxu1 %v8583_v41  ;;  %1993 = vmatmul.bf16.gmra.mxu2 %v6938_v28  ;;  %v1796_v58 = vadd.f32 %v1795_v9, %v1747_v26 }
 0x184   :  { %v1651_v18 = vpop.f32.mrf.mxu3 }
 0x185   :  { %v2884_v39 = vmax.f32 %v1796_v58, 0.0  ;;  %v1652_v44 = vadd.f32 %v1651_v18, %v6962_v5  ;;  %v8585_v58 = vld [vmem:[#allocation26_spill] sm:$0xff]  ;;  %v8586_v5 = vld [vmem:[#allocation27_spill] sm:$0xff] }
 0x186   :  { %v1798_v14 = vpop.f32.mrf.mxu2  ;;  %v1702_v52 = vpop.f32.mrf.mxu0  ;;  %v5388_v18 = vld [vmem:[%s8428_s1 + $0x1b4] sm:$0xf0] }
 0x187   :  { %v1701_v19 = vadd.f32 %v1700_v34, %v1652_v44  ;;  %v7173_v21 = vpack.c.bf16 %v2884_v39, %v2880_v16  ;;  %v5651_v34 = vld [vmem:[%s8429_s2] sm:$0xf] }
 0x188   :  { %v1751_v15 = vpop.f32.mrf.mxu1  ;;  %v7181_v53 = vperm.slane %v5651_v34, 1 }
 0x189   :  { %8584 = vst [vmem:[#allocation21_spill] sm:$0xff] %v7173_v21  ;;  %v1750_v33 = vadd.f32 %v1749_v12, %v1701_v19  ;;  %v8587_v12 = vld [vmem:[#allocation28_spill] sm:$0xff] }
 0x18b   :  { %v1799_v51 = vadd.f32 %v1798_v14, %v1750_v33 }
 0x18c   :  { %v1653_v9 = vpop.f32.mrf.mxu3 }
 0x18d   :  { %v1654_v46 = vadd.f32 %v1653_v9, %v6965_v42  ;;  %v2888_v39 = vmax.f32 %v1799_v51, 0.0 }
 0x18e   :  { %v1800_v26 = vpop.f32.mrf.mxu2  ;;  %v1861_v8 = vpop.f32.mrf.mxu0 }
 0x18f   :  { %v1703_v57 = vadd.f32 %v1702_v52, %v1654_v46 }
 0x190   :  { %v1910_v27 = vpop.f32.mrf.mxu1 }
 0x191   :  { %v1752_v45 = vadd.f32 %v1751_v15, %v1703_v57  ;;  %2007 = vmatmul.bf16.vlgmr.msrb.gmra.mxu3 %v8585_v58  ;;  %2056 = vmatmul.bf16.vlgmr.msrb.gmra.mxu0 %v8586_v5  ;;  %v4383_v57 = vld [vmem:[%s8428_s1 + $0x1a8] sm:$0xf] }
 0x192   :  { %v4384_v16 = vor.u32 %v5388_v18, %v4383_v57  ;;  %v8589_v18 = vld [vmem:[#allocation30_spill] sm:$0xff]  ;;  %v4575_v5 = vld [vmem:[%s8428_s1 + $0x328] sm:$0xf] }
 0x193   :  { %4957 = vmatmul.msk.bf16.vlgmr.msrb.gmra.mxu1 %vm1435_vm0, %v8587_v12  ;;  %2154 = vmatmul.bf16.vlgmr.msrb.gmra.mxu2 %v6045_v23  ;;  %v1801_v42 = vadd.f32 %v1800_v26, %v1752_v45  ;;  %v4639_v23 = vld [vmem:[%s8428_s1 + $0x3a8] sm:$0xf] }
 0x194   :  { %v1812_v32 = vpop.f32.mrf.mxu3  ;;  %2197 = vmatpush.bf16.msra.mxu3 %v4384_v16  ;;  %v8591_v16 = vld [vmem:[#allocation32_spill] sm:$0xff] }
 0x195   :  { %v2892_v44 = vmax.f32 %v1801_v42, 0.0  ;;  %v1813_v14 = vadd.f32 %v1812_v32, %v7181_v53  ;;  %v8590_v32 = vld [vmem:[#allocation31_spill] sm:$0xff] }
 0x196   :  { %v1959_v52 = vpop.f32.mrf.mxu2  ;;  %v1863_v19 = vpop.f32.mrf.mxu0 }
 0x197   :  { %v1862_v15 = vadd.f32 %v1861_v8, %v1813_v14  ;;  %v7193_v9 = vpack.c.bf16 %v2892_v44, %v2888_v39  ;;  %v5384_v39 = vld [vmem:[%s8428_s1 + $0x194] sm:$0xf0] }
 0x198   :  { %v1912_v33 = vpop.f32.mrf.mxu1 }
 0x199   :  { %8588 = vst [vmem:[#allocation23_spill] sm:$0xff] %v7193_v9  ;;  %v1911_v46 = vadd.f32 %v1910_v27, %v1862_v15  ;;  %v4367_v27 = vld [vmem:[%s8428_s1 + $0x188] sm:$0xf] }
 0x19a   :  { %v4368_v14 = vor.u32 %v5384_v39, %v4367_v27  ;;  %v8593_v27 = vld [vmem:[#allocation34_spill] sm:$0xff]  ;;  %v8594_v39 = vld [vmem:[#allocation35_spill] sm:$0xff] }
 0x19b   :  { %v7195_v26 = vadd.f32 %v1959_v52, %v1911_v46 }
 0x19c   :  { %v1814_v45 = vpop.f32.mrf.mxu3  ;;  %2198 = vmatpush.bf16.msra.mxu3 %v4368_v14 }
 0x19d   :  { %v1815_v34 = vadd.f32 %v1814_v45, %v7181_v53 }
 0x19e   :  { %v1961_v21 = vpop.f32.mrf.mxu2  ;;  %v1866_v60 = vpop.f32.mrf.mxu0 }
 0x19f   :  { %v1864_v57 = vadd.f32 %v1863_v19, %v1815_v34 }
 0x1a0   :  { %v1915_v51 = vpop.f32.mrf.mxu1 }
 0x1a1   :  { %v1913_v42 = vadd.f32 %v1912_v33, %v1864_v57  ;;  %2012 = vmatmul.bf16.gmra.mxu3 %v8589_v18  ;;  %2061 = vmatmul.bf16.gmra.mxu0 %v8590_v32  ;;  %v8595_v32 = vld [vmem:[#allocation36_spill] sm:$0xff] }
 0x1a3   :  { %4958 = vmatmul.msk.bf16.gmra.mxu1 %vm1435_vm0, %v8591_v16  ;;  %2159 = vmatmul.bf16.gmra.mxu2 %v6105_v47  ;;  %v7203_v8 = vadd.f32 %v1961_v21, %v1913_v42  ;;  %v8592_v47 = vld [vmem:[#allocation33_spill] sm:$0xff] }
 0x1a4   :  { %v1817_v44 = vpop.f32.mrf.mxu3 }
 0x1a5   :  { %v1818_v52 = vadd.f32 %v1817_v44, %v7181_v53  ;;  %v5380_v44 = vld [vmem:[%s8428_s1 + $0x174] sm:$0xf0] }
 0x1a6   :  { %v1964_v19 = vpop.f32.mrf.mxu2  ;;  %v1868_v15 = vpop.f32.mrf.mxu0 }
 0x1a7   :  { %v1867_v33 = vadd.f32 %v1866_v60, %v1818_v52 }
 0x1a8   :  { %v1917_v46 = vpop.f32.mrf.mxu1 }
 0x1a9   :  { %v1916_v45 = vadd.f32 %v1915_v51, %v1867_v33  ;;  %v4351_v51 = vld [vmem:[%s8428_s1 + $0x168] sm:$0xf] }
 0x1aa   :  { %v4352_v14 = vor.u32 %v5380_v44, %v4351_v51  ;;  %v8596_v51 = vld [vmem:[#allocation37_spill] sm:$0xff]  ;;  %v8597_v44 = vld [vmem:[#allocation38_spill] sm:$0xff] }
 0x1ab   :  { %v7212_v21 = vadd.f32 %v1964_v19, %v1916_v45 }
 0x1ac   :  { %v1819_v34 = vpop.f32.mrf.mxu3  ;;  %2199 = vmatpush.bf16.msra.mxu3 %v4352_v14 }
 0x1ad   :  { %v1820_v57 = vadd.f32 %v1819_v34, %v7181_v53 }
 0x1ae   :  { %v1966_v42 = vpop.f32.mrf.mxu2  ;;  %v1871_v9 = vpop.f32.mrf.mxu0 }
 0x1af   :  { %v1869_v17 = vadd.f32 %v1868_v15, %v1820_v57 }
 0x1b0   :  { %v1920_v40 = vpop.f32.mrf.mxu1 }
 0x1b1   :  { %v1918_v56 = vadd.f32 %v1917_v46, %v1869_v17  ;;  %2017 = vmatmul.bf16.gmra.mxu3 %v8592_v47  ;;  %2066 = vmatmul.bf16.gmra.mxu0 %v8593_v27 }
 0x1b3   :  { %4959 = vmatmul.msk.bf16.gmra.mxu1 %vm1435_vm0, %v8594_v39  ;;  %2164 = vmatmul.bf16.gmra.mxu2 %v6047_v24  ;;  %v7220_v60 = vadd.f32 %v1966_v42, %v1918_v56 }
 0x1b4   :  { %v1822_v17 = vpop.f32.mrf.mxu3 }
 0x1b5   :  { %v1823_v52 = vadd.f32 %v1822_v17, %v7181_v53  ;;  %v5376_v17 = vld [vmem:[%s8428_s1 + $0x154] sm:$0xf0] }
 0x1b6   :  { %v1969_v19 = vpop.f32.mrf.mxu2  ;;  %v1873_v15 = vpop.f32.mrf.mxu0 }
 0x1b7   :  { %v1872_v33 = vadd.f32 %v1871_v9, %v1823_v52  ;;  %v4335_v9 = vld [vmem:[%s8428_s1 + $0x148] sm:$0xf] }
 0x1b8   :  { %v1922_v46 = vpop.f32.mrf.mxu1  ;;  %v4336_v14 = vor.u32 %v5376_v17, %v4335_v9  ;;  %v4543_v9 = vld [vmem:[%s8428_s1 + $0x2e8] sm:$0xf]  ;;  %v5428_v17 = vld [vmem:[%s8428_s1 + $0x2f4] sm:$0xf0] }
 0x1b9   :  { %v1921_v45 = vadd.f32 %v1920_v40, %v1872_v33 }
 0x1ba   :  { %2200 = vmatpush.bf16.msra.mxu3 %v4336_v14  ;;  %v8599_v14 = vld [vmem:[#allocation40_spill] sm:$0xff] }
 0x1bb   :  { %v7229_v56 = vadd.f32 %v1969_v19, %v1921_v45 }
 0x1bc   :  { %v1824_v34 = vpop.f32.mrf.mxu3 }
 0x1bd   :  { %v1825_v57 = vadd.f32 %v1824_v34, %v7181_v53 }
 0x1be   :  { %v1971_v42 = vpop.f32.mrf.mxu2  ;;  %v1876_v24 = vpop.f32.mrf.mxu0 }
 0x1bf   :  { %v1874_v39 = vadd.f32 %v1873_v15, %v1825_v57 }
 0x1c0   :  { %v1925_v27 = vpop.f32.mrf.mxu1 }
 0x1c1   :  { %v1923_v16 = vadd.f32 %v1922_v46, %v1874_v39  ;;  %2022 = vmatmul.bf16.gmra.mxu3 %v8595_v32  ;;  %2071 = vmatmul.bf16.gmra.mxu0 %v8596_v51 }
 0x1c3   :  { %4960 = vmatmul.msk.bf16.gmra.mxu1 %vm1435_vm0, %v8597_v44  ;;  %2169 = vmatmul.bf16.gmra.mxu2 %v6107_v48  ;;  %v7237_v40 = vadd.f32 %v1971_v42, %v1923_v16 }
 0x1c4   :  { %v1827_v39 = vpop.f32.mrf.mxu3 }
 0x1c5   :  { %v1828_v52 = vadd.f32 %v1827_v39, %v7181_v53  ;;  %v8598_v39 = vld [vmem:[#allocation39_spill] sm:$0xff] }
 0x1c6   :  { %v1974_v19 = vpop.f32.mrf.mxu2  ;;  %v1878_v15 = vpop.f32.mrf.mxu0 }
 0x1c7   :  { %v1877_v33 = vadd.f32 %v1876_v24, %v1828_v52  ;;  %v4671_v24 = vld [vmem:[%s8428_s1 + $0x3e8] sm:$0xf]  ;;  %v4544_v52 = vor.u32 %v5428_v17, %v4543_v9  ;;  %v5372_v9 = vld [vmem:[%s8428_s1 + $0x134] sm:$0xf0] }
 0x1c8   :  { %v1927_v46 = vpop.f32.mrf.mxu1 }
 0x1c9   :  { %v1926_v45 = vadd.f32 %v1925_v27, %v1877_v33  ;;  %v5492_v33 = vld [vmem:[%s8428_s1 + $0x4f4] sm:$0xf0]  ;;  %2244 = vmatpush.bf16.msra.mxu0 %v4544_v52 }
 0x1cb   :  { %v7246_v16 = vadd.f32 %v1974_v19, %v1926_v45  ;;  %v5460_v19 = vld [vmem:[%s8428_s1 + $0x3f4] sm:$0xf0]  ;;  %v8600_v45 = vld [vmem:[#allocation41_spill] sm:$0xff] }
 0x1cc   :  { %v1829_v34 = vpop.f32.mrf.mxu3 }
 0x1cd   :  { %v1830_v57 = vadd.f32 %v1829_v34, %v7181_v53 }
 0x1ce   :  { %v1976_v42 = vpop.f32.mrf.mxu2  ;;  %v1881_v48 = vpop.f32.mrf.mxu0 }
 0x1cf   :  { %v1879_v44 = vadd.f32 %v1878_v15, %v1830_v57  ;;  %v4799_v15 = vld [vmem:[%s8428_s1 + $0x4e8] sm:$0xf] }
 0x1d0   :  { %v1930_v51 = vpop.f32.mrf.mxu1  ;;  %v4319_v57 = vld [vmem:[%s8428_s1 + $0x128] sm:$0xf] }
 0x1d1   :  { %v1928_v27 = vadd.f32 %v1927_v46, %v1879_v44  ;;  %2027 = vmatmul.bf16.gmra.mxu3 %v8598_v39  ;;  %2076 = vmatmul.bf16.gmra.mxu0 %v8599_v14  ;;  %v4672_v44 = vor.u32 %v5460_v19, %v4671_v24  ;;  %v4800_v46 = vor.u32 %v5492_v33, %v4799_v15  ;;  %v4527_v24 = vld [vmem:[%s8428_s1 + $0x2c8] sm:$0xf]  ;;  %v5456_v33 = vld [vmem:[%s8428_s1 + $0x3d4] sm:$0xf0] }
 0x1d2   :  { %v4320_v14 = vor.u32 %v5372_v9, %v4319_v57 }
 0x1d3   :  { %4961 = vmatmul.msk.bf16.gmra.mxu1 %vm1435_vm0, %v8600_v45  ;;  %2174 = vmatmul.bf16.gmra.mxu2 %v6157_v1  ;;  %v7272_v34 = vadd.f32 %v1976_v42, %v1928_v27  ;;  %v5424_v42 = vld [vmem:[%s8428_s1 + $0x2d4] sm:$0xf0]  ;;  %v4655_v27 = vld [vmem:[%s8428_s1 + $0x3c8] sm:$0xf] }
 0x1d4   :  { %v1832_v17 = vpop.f32.mrf.mxu3  ;;  %2293 = vmatpush.bf16.msra.mxu1 %v4672_v44  ;;  %2342 = vmatpush.bf16.msra.mxu2 %v4800_v46  ;;  %v4528_v52 = vor.u32 %v5424_v42, %v4527_v24  ;;  %v4783_v44 = vld [vmem:[%s8428_s1 + $0x4c8] sm:$0xf]  ;;  %v5488_v46 = vld [vmem:[%s8428_s1 + $0x4d4] sm:$0xf0]  ;;  %v4656_v9 = vor.u32 %v5456_v33, %v4655_v27 }
 0x1d5   :  { %v1833_v19 = vadd.f32 %v1832_v17, %v7181_v53  ;;  %2201 = vmatpush.bf16.msra.mxu3 %v4320_v14  ;;  %v4784_v1 = vor.u32 %v5488_v46, %v4783_v44  ;;  %v4511_v24 = vld [vmem:[%s8428_s1 + $0x2a8] sm:$0xf]  ;;  %v5420_v42 = vld [vmem:[%s8428_s1 + $0x2b4] sm:$0xf0] }
 0x1d6   :  { %v1979_v15 = vpop.f32.mrf.mxu2  ;;  %v1883_v57 = vpop.f32.mrf.mxu0  ;;  %2245 = vmatpush.bf16.msra.mxu0 %v4528_v52  ;;  %v4512_v27 = vor.u32 %v5420_v42, %v4511_v24  ;;  %v5448_v42 = vld [vmem:[%s8428_s1 + $0x394] sm:$0xf0] }
 0x1d7   :  { %v1882_v45 = vadd.f32 %v1881_v48, %v1833_v19  ;;  %v5452_v48 = vld [vmem:[%s8428_s1 + $0x3b4] sm:$0xf0] }
 0x1d8   :  { %v1932_v17 = vpop.f32.mrf.mxu1  ;;  %2294 = vmatpush.bf16.msra.mxu1 %v4656_v9  ;;  %2343 = vmatpush.bf16.msra.mxu2 %v4784_v1  ;;  %v4767_v1 = vld [vmem:[%s8428_s1 + $0x4a8] sm:$0xf]  ;;  %v5484_v19 = vld [vmem:[%s8428_s1 + $0x4b4] sm:$0xf0]  ;;  %v4640_v52 = vor.u32 %v5452_v48, %v4639_v23 }
 0x1d9   :  { %v1931_v14 = vadd.f32 %v1930_v51, %v1882_v45  ;;  %v4768_v33 = vor.u32 %v5484_v19, %v4767_v1  ;;  %v4495_v51 = vld [vmem:[%s8428_s1 + $0x288] sm:$0xf]  ;;  %v5416_v45 = vld [vmem:[%s8428_s1 + $0x294] sm:$0xf0] }
 0x1da   :  { %2246 = vmatpush.bf16.msra.mxu0 %v4512_v27  ;;  %v4623_v9 = vld [vmem:[%s8428_s1 + $0x388] sm:$0xf]  ;;  %v4496_v24 = vor.u32 %v5416_v45, %v4495_v51  ;;  %v5480_v27 = vld [vmem:[%s8428_s1 + $0x494] sm:$0xf0] }
 0x1db   :  { %v7317_v44 = vadd.f32 %v1979_v15, %v1931_v14  ;;  %v4751_v14 = vld [vmem:[%s8428_s1 + $0x488] sm:$0xf]  ;;  %v4624_v1 = vor.u32 %v5448_v42, %v4623_v9  ;;  %v5412_v51 = vld [vmem:[%s8428_s1 + $0x274] sm:$0xf0]  ;;  %v8601_v9 = vld [vmem:[#allocation42_spill] sm:$0xff] }
 0x1dc   :  { %v1834_v46 = vpop.f32.mrf.mxu3  ;;  %2295 = vmatpush.bf16.msra.mxu1 %v4640_v52  ;;  %2344 = vmatpush.bf16.msra.mxu2 %v4768_v33  ;;  %v4752_v19 = vor.u32 %v5480_v27, %v4751_v14  ;;  %v4607_v45 = vld [vmem:[%s8428_s1 + $0x368] sm:$0xf]  ;;  %v5476_v14 = vld [vmem:[%s8428_s1 + $0x474] sm:$0xf0]  ;;  %v8603_v27 = vld [vmem:[#allocation44_spill] sm:$0xff] }
 0x1dd   :  { %v1835_v23 = vadd.f32 %v1834_v46, %v7181_v53  ;;  %v4479_v46 = vld [vmem:[%s8428_s1 + $0x268] sm:$0xf] }
 0x1de   :  { %v1981_v15 = vpop.f32.mrf.mxu2  ;;  %v1886_v48 = vpop.f32.mrf.mxu0  ;;  %2247 = vmatpush.bf16.msra.mxu0 %v4496_v24  ;;  %v5444_v24 = vld [vmem:[%s8428_s1 + $0x374] sm:$0xf0]  ;;  %v4735_v42 = vld [vmem:[%s8428_s1 + $0x468] sm:$0xf] }
 0x1df   :  { %v1884_v52 = vadd.f32 %v1883_v57, %v1835_v23  ;;  %v8602_v57 = vld [vmem:[#allocation43_spill] sm:$0xff]  ;;  %v4480_v23 = vor.u32 %v5412_v51, %v4479_v46 }
 0x1e0   :  { %v1935_v33 = vpop.f32.mrf.mxu1  ;;  %2296 = vmatpush.bf16.msra.mxu1 %v4624_v1  ;;  %2345 = vmatpush.bf16.msra.mxu2 %v4752_v19  ;;  %v4736_v1 = vor.u32 %v5476_v14, %v4735_v42  ;;  %v5368_v46 = vld [vmem:[%s8428_s1 + $0x114] sm:$0xf0] }
 0x1e1   :  { %v1933_v12 = vadd.f32 %v1932_v17, %v1884_v52  ;;  %2032 = vmatmul.bf16.gmra.mxu3 %v8601_v9  ;;  %2081 = vmatmul.bf16.gmra.mxu0 %v8602_v57  ;;  %v4608_v17 = vor.u32 %v5444_v24, %v4607_v45  ;;  %v4303_v52 = vld [vmem:[%s8428_s1 + $0x108] sm:$0xf]  ;;  %v5440_v14 = vld [vmem:[%s8428_s1 + $0x354] sm:$0xf0] }
 0x1e2   :  { %2248 = vmatpush.bf16.msra.mxu0 %v4480_v23  ;;  %v4304_v57 = vor.u32 %v5368_v46, %v4303_v52  ;;  %v4463_v45 = vld [vmem:[%s8428_s1 + $0x248] sm:$0xf] }
 0x1e3   :  { %4962 = vmatmul.msk.bf16.gmra.mxu1 %vm1435_vm0, %v8603_v27  ;;  %2179 = vmatmul.bf16.gmra.mxu2 %v6227_v7  ;;  %v7361_v19 = vadd.f32 %v1981_v15, %v1933_v12  ;;  %v5408_v12 = vld [vmem:[%s8428_s1 + $0x254] sm:$0xf0]  ;;  %v4591_v15 = vld [vmem:[%s8428_s1 + $0x348] sm:$0xf] }
 0x1e4   :  { %v1837_v51 = vpop.f32.mrf.mxu3  ;;  %2297 = vmatpush.bf16.msra.mxu1 %v4608_v17  ;;  %2346 = vmatpush.bf16.msra.mxu2 %v4736_v1  ;;  %v4464_v23 = vor.u32 %v5408_v12, %v4463_v45  ;;  %v4719_v17 = vld [vmem:[%s8428_s1 + $0x448] sm:$0xf]  ;;  %v5472_v1 = vld [vmem:[%s8428_s1 + $0x454] sm:$0xf0]  ;;  %v4592_v46 = vor.u32 %v5440_v14, %v4591_v15 }
 0x1e5   :  { %v1838_v24 = vadd.f32 %v1837_v51, %v7181_v53  ;;  %2202 = vmatpush.bf16.msra.mxu3 %v4304_v57  ;;  %v4720_v7 = vor.u32 %v5472_v1, %v4719_v17  ;;  %v4447_v45 = vld [vmem:[%s8428_s1 + $0x228] sm:$0xf]  ;;  %v5404_v12 = vld [vmem:[%s8428_s1 + $0x234] sm:$0xf0] }
 0x1e6   :  { %v1984_v42 = vpop.f32.mrf.mxu2  ;;  %v1888_v52 = vpop.f32.mrf.mxu0  ;;  %2249 = vmatpush.bf16.msra.mxu0 %v4464_v23  ;;  %v4448_v15 = vor.u32 %v5404_v12, %v4447_v45  ;;  %v5432_v12 = vld [vmem:[%s8428_s1 + $0x314] sm:$0xf0] }
 0x1e7   :  { %v1887_v27 = vadd.f32 %v1886_v48, %v1838_v24  ;;  %v5436_v48 = vld [vmem:[%s8428_s1 + $0x334] sm:$0xf0] }
 0x1e8   :  { %v1937_v51 = vpop.f32.mrf.mxu1  ;;  %2298 = vmatpush.bf16.msra.mxu1 %v4592_v46  ;;  %2347 = vmatpush.bf16.msra.mxu2 %v4720_v7  ;;  %v4703_v7 = vld [vmem:[%s8428_s1 + $0x428] sm:$0xf]  ;;  %v5468_v24 = vld [vmem:[%s8428_s1 + $0x434] sm:$0xf0]  ;;  %v4576_v23 = vor.u32 %v5436_v48, %v4575_v5 }
 0x1e9   :  { %v1936_v57 = vadd.f32 %v1935_v33, %v1887_v27  ;;  %v4704_v14 = vor.u32 %v5468_v24, %v4703_v7  ;;  %v4431_v33 = vld [vmem:[%s8428_s1 + $0x208] sm:$0xf]  ;;  %v5400_v27 = vld [vmem:[%s8428_s1 + $0x214] sm:$0xf0] }
 0x1ea   :  { %2250 = vmatpush.bf16.msra.mxu0 %v4448_v15  ;;  %v4559_v46 = vld [vmem:[%s8428_s1 + $0x308] sm:$0xf]  ;;  %v4432_v45 = vor.u32 %v5400_v27, %v4431_v33  ;;  %v5464_v15 = vld [vmem:[%s8428_s1 + $0x414] sm:$0xf0] }
 0x1eb   :  { %v7406_v17 = vadd.f32 %v1984_v42, %v1936_v57  ;;  %v4687_v57 = vld [vmem:[%s8428_s1 + $0x408] sm:$0xf]  ;;  %v4560_v7 = vor.u32 %v5432_v12, %v4559_v46  ;;  %v5524_v27 = vld [vmem:[%s8428_s1 + $0x5f4] sm:$0xf0] }
 0x1ec   :  { %v1839_v1 = vpop.f32.mrf.mxu3  ;;  %2299 = vmatpush.bf16.msra.mxu1 %v4576_v23  ;;  %2348 = vmatpush.bf16.msra.mxu2 %v4704_v14  ;;  %v4688_v24 = vor.u32 %v5464_v15, %v4687_v57 }
 0x1ed   :  { %v1840_v5 = vadd.f32 %v1839_v1, %v7181_v53 }
 0x1ee   :  { %v1986_v42 = vpop.f32.mrf.mxu2  ;;  %v1891_v48 = vpop.f32.mrf.mxu0  ;;  %2251 = vmatpush.bf16.msra.mxu0 %v4432_v45 }
 0x1ef   :  { %v1889_v23 = vadd.f32 %v1888_v52, %v1840_v5  ;;  %v4927_v52 = vld [vmem:[%s8428_s1 + $0x5e8] sm:$0xf] }
 0x1f0   :  { %v1940_v14 = vpop.f32.mrf.mxu1  ;;  %2300 = vmatpush.bf16.msra.mxu1 %v4560_v7  ;;  %2349 = vmatpush.bf16.msra.mxu2 %v4688_v24  ;;  %v4928_v46 = vor.u32 %v5524_v27, %v4927_v52 }
 0x1f1   :  { %v1938_v1 = vadd.f32 %v1937_v51, %v1889_v23  ;;  %2037 = vmatmul.bf16.gmra.mxu3 %v6878_v0  ;;  %2086 = vmatmul.bf16.gmra.mxu0 %v6889_v61 }
 0x1f2   :  { %2391 = vmatpush.bf16.msrb.mxu3 %v4928_v46 }
 0x1f3   :  { %4963 = vmatmul.msk.bf16.gmra.mxu1 %vm1435_vm0, %v6891_v22  ;;  %2184 = vmatmul.bf16.gmra.mxu2 %v8577_v55  ;;  %v7432_v33 = vadd.f32 %v1986_v42, %v1938_v1 }
 0x1f4   :  { %v1842_v51 = vpop.f32.mrf.mxu3 }
 0x1f5   :  { %v1843_v5 = vadd.f32 %v1842_v51, %v7181_v53  ;;  %v4911_v51 = vld [vmem:[%s8428_s1 + $0x5c8] sm:$0xf] }
 0x1f6   :  { %v1989_v45 = vpop.f32.mrf.mxu2  ;;  %v1893_v12 = vpop.f32.mrf.mxu0 }
 0x1f7   :  { %v1892_v57 = vadd.f32 %v1891_v48, %v1843_v5 }
 0x1f8   :  { %v1942_v15 = vpop.f32.mrf.mxu1 }
 0x1f9   :  { %v1941_v7 = vadd.f32 %v1940_v14, %v1892_v57 }
 0x1fb   :  { %v7441_v42 = vadd.f32 %v1989_v45, %v1941_v7 }
 0x1fc   :  { %v1844_v24 = vpop.f32.mrf.mxu3 }
 0x1fd   :  { %v1845_v23 = vadd.f32 %v1844_v24, %v7181_v53 }
 0x1fe   :  { %v1991_v1 = vpop.f32.mrf.mxu2  ;;  %v1896_v55 = vpop.f32.mrf.mxu0 }
 0x1ff   :  { %v1894_v22 = vadd.f32 %v1893_v12, %v1845_v23 }
 0x200   :  { %v1945_v61 = vpop.f32.mrf.mxu1 }
 0x201   :  { %v1943_v28 = vadd.f32 %v1942_v15, %v1894_v22  ;;  %2042 = vmatmul.bf16.gmra.mxu3 %v6940_v10  ;;  %2091 = vmatmul.bf16.gmra.mxu0 %v6942_v54  ;;  %v5520_v22 = vld [vmem:[%s8428_s1 + $0x5d4] sm:$0xf0]  ;;  %v8605_v54 = vld [vmem:[#allocation25_spill] sm:$0xff] }
 0x202   :  { %v4912_v5 = vor.u32 %v5520_v22, %v4911_v51 }
 0x203   :  { %4964 = vmatmul.msk.bf16.gmra.mxu1 %vm1435_vm0, %v6944_v31  ;;  %2189 = vmatmul.bf16.gmra.mxu2 %v8581_v13  ;;  %v7449_v48 = vadd.f32 %v1991_v1, %v1943_v28  ;;  %v8604_v31 = vld [vmem:[#allocation19_spill] sm:$0xff] }
 0x204   :  { %v1847_v14 = vpop.f32.mrf.mxu3  ;;  %2392 = vmatpush.bf16.msrb.mxu3 %v4912_v5 }
 0x205   :  { %v1848_v52 = vadd.f32 %v1847_v14, %v7181_v53 }
 0x206   :  { %v1994_v27 = vpop.f32.mrf.mxu2  ;;  %v1898_v46 = vpop.f32.mrf.mxu0 }
 0x207   :  { %v1897_v45 = vadd.f32 %v1896_v55, %v1848_v52  ;;  %v5516_v55 = vld [vmem:[%s8428_s1 + $0x5b4] sm:$0xf0] }
 0x208   :  { %v1947_v12 = vpop.f32.mrf.mxu1 }
 0x209   :  { %v1946_v57 = vadd.f32 %v1945_v61, %v1897_v45  ;;  %v4895_v61 = vld [vmem:[%s8428_s1 + $0x5a8] sm:$0xf] }
 0x20a   :  { %v4896_v52 = vor.u32 %v5516_v55, %v4895_v61 }
 0x20b   :  { %v7458_v28 = vadd.f32 %v1994_v27, %v1946_v57 }
 0x20c   :  { %v1849_v15 = vpop.f32.mrf.mxu3  ;;  %2393 = vmatpush.bf16.msrb.mxu3 %v4896_v52 }
 0x20d   :  { %v1850_v7 = vadd.f32 %v1849_v15, %v7181_v53 }
 0x20e   :  { %v1996_v24 = vpop.f32.mrf.mxu2  ;;  %v2057_v23 = vpop.f32.mrf.mxu0 }
 0x20f   :  { %v1899_v1 = vadd.f32 %v1898_v46, %v1850_v7 }
 0x210   :  { %v2106_v14 = vpop.f32.mrf.mxu1 }
 0x211   :  { %v1948_v13 = vadd.f32 %v1947_v12, %v1899_v1  ;;  %2203 = vmatmul.bf16.vlgmr.msra.gmra.mxu3 %v6159_v2  ;;  %2252 = vmatmul.bf16.vlgmr.msra.gmra.mxu0 %v8604_v31 }
 0x213   :  { %2301 = vmatmul.bf16.vlgmr.msra.gmra.mxu1 %v8605_v54  ;;  %2350 = vmatmul.bf16.vlgmr.msra.gmra.mxu2 %v8585_v58  ;;  %v7471_v53 = vadd.f32 %v1996_v24, %v1948_v13 }
 0x214   :  { %v2008_v27 = vpop.f32.mrf.mxu3 }
 0x215   :  { %v2009_v51 = vadd.f32 %v2008_v27, %v7195_v26  ;;  %v8606_v26 = vld [vmem:[#allocation29_spill] sm:$0xff] }
 0x216   :  { %v7474_v22 = vpop.f32.mrf.mxu2  ;;  %v2059_v46 = vpop.f32.mrf.mxu0 }
 0x217   :  { %v2058_v5 = vadd.f32 %v2057_v23, %v2009_v51  ;;  %v4879_v23 = vld [vmem:[%s8428_s1 + $0x588] sm:$0xf] }
 0x218   :  { %v2108_v45 = vpop.f32.mrf.mxu1 }
 0x219   :  { %v2107_v12 = vadd.f32 %v2106_v14, %v2058_v5 }
 0x21b   :  { %v2833_v14 = vmax.f32 %v2107_v12, 0.0 }
 0x21c   :  { %v2010_v57 = vpop.f32.mrf.mxu3 }
 0x21d   :  { %v2011_v15 = vadd.f32 %v2010_v57, %v7203_v8  ;;  %v5512_v8 = vld [vmem:[%s8428_s1 + $0x594] sm:$0xf0] }
 0x21e   :  { %v7477_v7 = vpop.f32.mrf.mxu2  ;;  %v2062_v1 = vpop.f32.mrf.mxu0  ;;  %v4880_v55 = vor.u32 %v5512_v8, %v4879_v23 }
 0x21f   :  { %v2060_v58 = vadd.f32 %v2059_v46, %v2011_v15 }
 0x220   :  { %v2111_v13 = vpop.f32.mrf.mxu1  ;;  %2394 = vmatpush.bf16.msrb.mxu3 %v4880_v55 }
 0x221   :  { %v2109_v24 = vadd.f32 %v2108_v45, %v2060_v58  ;;  %2208 = vmatmul.bf16.gmra.mxu3 %v6229_v36  ;;  %2257 = vmatmul.bf16.gmra.mxu0 %v6383_v43 }
 0x223   :  { %2306 = vmatmul.bf16.gmra.mxu1 %v8606_v26  ;;  %2355 = vmatmul.bf16.gmra.mxu2 %v8589_v18  ;;  %v2837_v61 = vmax.f32 %v2109_v24, 0.0 }
 0x224   :  { %v2013_v58 = vpop.f32.mrf.mxu3 }
 0x225   :  { %v7489_v52 = vpack.c.bf16 %v2837_v61, %v2833_v14  ;;  %v2014_v27 = vadd.f32 %v2013_v58, %v7212_v21  ;;  %v4863_v21 = vld [vmem:[%s8428_s1 + $0x568] sm:$0xf] }
 0x226   :  { %v7492_v51 = vpop.f32.mrf.mxu2  ;;  %v2064_v46 = vpop.f32.mrf.mxu0 }
 0x227   :  { %8607 = vst [vmem:[#allocation33_spill] sm:$0xff] %v7489_v52  ;;  %v2063_v5 = vadd.f32 %v2062_v1, %v2014_v27 }
 0x228   :  { %v2113_v45 = vpop.f32.mrf.mxu1 }
 0x229   :  { %v2112_v57 = vadd.f32 %v2111_v13, %v2063_v5 }
 0x22b   :  { %v2841_v1 = vmax.f32 %v2112_v57, 0.0 }
 0x22c   :  { %v2015_v15 = vpop.f32.mrf.mxu3 }
 0x22d   :  { %v2016_v18 = vadd.f32 %v2015_v15, %v7220_v60  ;;  %v5508_v60 = vld [vmem:[%s8428_s1 + $0x574] sm:$0xf0] }
 0x22e   :  { %v7495_v26 = vpop.f32.mrf.mxu2  ;;  %v2067_v12 = vpop.f32.mrf.mxu0 }
 0x22f   :  { %v2065_v24 = vadd.f32 %v2064_v46, %v2016_v18  ;;  %v4864_v18 = vor.u32 %v5508_v60, %v4863_v21 }
 0x230   :  { %v2116_v23 = vpop.f32.mrf.mxu1 }
 0x231   :  { %v2114_v8 = vadd.f32 %v2113_v45, %v2065_v24  ;;  %2213 = vmatmul.bf16.gmra.mxu3 %v6055_v29  ;;  %2262 = vmatmul.bf16.gmra.mxu0 %v6057_v30 }
 0x232   :  { %2395 = vmatpush.bf16.msrb.mxu3 %v4864_v18 }
 0x233   :  { %2311 = vmatmul.bf16.gmra.mxu1 %v6521_v62  ;;  %2360 = vmatmul.bf16.gmra.mxu2 %v8592_v47  ;;  %v2845_v13 = vmax.f32 %v2114_v8, 0.0 }
 0x234   :  { %v2018_v14 = vpop.f32.mrf.mxu3 }
 0x235   :  { %v2019_v61 = vadd.f32 %v2018_v14, %v7229_v56  ;;  %v7510_v58 = vpack.c.bf16 %v2845_v13, %v2841_v1  ;;  %v4847_v56 = vld [vmem:[%s8428_s1 + $0x548] sm:$0xf] }
 0x236   :  { %v7508_v55 = vpop.f32.mrf.mxu2  ;;  %v2069_v27 = vpop.f32.mrf.mxu0 }
 0x237   :  { %8608 = vst [vmem:[#allocation36_spill] sm:$0xff] %v7510_v58  ;;  %v2068_v46 = vadd.f32 %v2067_v12, %v2019_v61 }
 0x238   :  { %v2118_v5 = vpop.f32.mrf.mxu1 }
 0x239   :  { %v2117_v45 = vadd.f32 %v2116_v23, %v2068_v46 }
 0x23b   :  { %v2849_v12 = vmax.f32 %v2117_v45, 0.0 }
 0x23c   :  { %v2020_v15 = vpop.f32.mrf.mxu3 }
 0x23d   :  { %v2021_v24 = vadd.f32 %v2020_v15, %v7237_v40  ;;  %v5504_v40 = vld [vmem:[%s8428_s1 + $0x554] sm:$0xf0] }
 0x23e   :  { %v7513_v52 = vpop.f32.mrf.mxu2  ;;  %v2072_v57 = vpop.f32.mrf.mxu0  ;;  %v4848_v23 = vor.u32 %v5504_v40, %v4847_v56  ;;  %v4289_v40 = vld [vmem:[%s8428_s1 + $0xf8] sm:$0xf0] }
 0x23f   :  { %v2070_v21 = vadd.f32 %v2069_v27, %v2021_v24 }
 0x240   :  { %v2121_v8 = vpop.f32.mrf.mxu1  ;;  %2396 = vmatpush.bf16.msrb.mxu3 %v4848_v23  ;;  %v4831_v23 = vld [vmem:[%s8428_s1 + $0x528] sm:$0xf] }
 0x241   :  { %v2119_v60 = vadd.f32 %v2118_v5, %v2070_v21  ;;  %2218 = vmatmul.bf16.gmra.mxu3 %v6109_v49  ;;  %2267 = vmatmul.bf16.gmra.mxu0 %v6111_v50 }
 0x243   :  { %2316 = vmatmul.bf16.gmra.mxu1 %v6575_v59  ;;  %2365 = vmatmul.bf16.gmra.mxu2 %v8595_v32  ;;  %v2853_v1 = vmax.f32 %v2119_v60, 0.0 }
 0x244   :  { %v2023_v18 = vpop.f32.mrf.mxu3 }
 0x245   :  { %v2024_v13 = vadd.f32 %v2023_v18, %v7246_v16  ;;  %v7528_v61 = vpack.c.bf16 %v2853_v1, %v2849_v12  ;;  %v5362_v16 = vld [vmem:[%s8428_s1 + $0xec] sm:$0xf]  ;;  %v4417_v12 = vld [vmem:[%s8428_s1 + $0x1f8] sm:$0xf0]  ;;  %v5500_v1 = vld [vmem:[%s8428_s1 + $0x534] sm:$0xf0] }
 0x246   :  { %v7526_v14 = vpop.f32.mrf.mxu2  ;;  %v2074_v27 = vpop.f32.mrf.mxu0 }
 0x247   :  { %8609 = vst [vmem:[#allocation39_spill] sm:$0xff] %v7528_v61  ;;  %v2073_v46 = vadd.f32 %v2072_v57, %v2024_v13  ;;  %v5394_v57 = vld [vmem:[%s8428_s1 + $0x1ec] sm:$0xf] }
 0x248   :  { %v2123_v5 = vpop.f32.mrf.mxu1  ;;  %v4420_v18 = vor.u32 %v5394_v57, %v4417_v12  ;;  %v4401_v57 = vld [vmem:[%s8428_s1 + $0x1d8] sm:$0xf0] }
 0x249   :  { %v2122_v15 = vadd.f32 %v2121_v8, %v2073_v46 }
 0x24a   :  { %2538 = vmatpush.bf16.msrb.mxu2 %v4420_v18  ;;  %v4257_v18 = vld [vmem:[%s8428_s1 + $0xb8] sm:$0xf0] }
 0x24b   :  { %v2857_v13 = vmax.f32 %v2122_v15, 0.0 }
 0x24c   :  { %v2025_v24 = vpop.f32.mrf.mxu3 }
 0x24d   :  { %v2026_v21 = vadd.f32 %v2025_v24, %v7272_v34  ;;  %v4292_v34 = vor.u32 %v5362_v16, %v4289_v40  ;;  %v5358_v24 = vld [vmem:[%s8428_s1 + $0xcc] sm:$0xf] }
 0x24e   :  { %v7531_v58 = vpop.f32.mrf.mxu2  ;;  %v2077_v45 = vpop.f32.mrf.mxu0 }
 0x24f   :  { %v2075_v56 = vadd.f32 %v2074_v27, %v2026_v21  ;;  %v4832_v27 = vor.u32 %v5500_v1, %v4831_v23  ;;  %2489 = vmatpush.bf16.msrb.mxu1 %v4292_v34  ;;  %v4273_v21 = vld [vmem:[%s8428_s1 + $0xd8] sm:$0xf0] }
 0x250   :  { %v2126_v60 = vpop.f32.mrf.mxu1  ;;  %v4276_v40 = vor.u32 %v5358_v24, %v4273_v21  ;;  %v5350_v21 = vld [vmem:[%s8428_s1 + $0x8c] sm:$0xf] }
 0x251   :  { %v2124_v8 = vadd.f32 %v2123_v5, %v2075_v56  ;;  %2223 = vmatmul.bf16.gmra.mxu3 %v6162_v3  ;;  %2272 = vmatmul.bf16.gmra.mxu0 %v6164_v4  ;;  %v5390_v56 = vld [vmem:[%s8428_s1 + $0x1cc] sm:$0xf] }
 0x252   :  { %2397 = vmatpush.bf16.msrb.mxu3 %v4832_v27  ;;  %v4404_v12 = vor.u32 %v5390_v56, %v4401_v57  ;;  %v5386_v27 = vld [vmem:[%s8428_s1 + $0x1ac] sm:$0xf]  ;;  %v4241_v56 = vld [vmem:[%s8428_s1 + $0x98] sm:$0xf0] }
 0x253   :  { %2321 = vmatmul.bf16.gmra.mxu1 %v6629_v35  ;;  %2370 = vmatmul.bf16.gmra.mxu2 %v8598_v39  ;;  %v2861_v46 = vmax.f32 %v2124_v8, 0.0  ;;  %v4244_v57 = vor.u32 %v5350_v21, %v4241_v56  ;;  %v4815_v21 = vld [vmem:[%s8428_s1 + $0x508] sm:$0xf] }
 0x254   :  { %v2028_v5 = vpop.f32.mrf.mxu3  ;;  %2490 = vmatpush.bf16.msrb.mxu1 %v4276_v40  ;;  %2539 = vmatpush.bf16.msrb.mxu2 %v4404_v12  ;;  %v4369_v12 = vld [vmem:[%s8428_s1 + $0x198] sm:$0xf0] }
 0x255   :  { %v2029_v16 = vadd.f32 %v2028_v5, %v7317_v44  ;;  %v7570_v8 = vpack.c.bf16 %v2861_v46, %v2857_v13  ;;  %v5354_v44 = vld [vmem:[%s8428_s1 + $0xac] sm:$0xf] }
 0x256   :  { %v7565_v15 = vpop.f32.mrf.mxu2  ;;  %v2079_v34 = vpop.f32.mrf.mxu0  ;;  %v4260_v46 = vor.u32 %v5354_v44, %v4257_v18 }
 0x257   :  { %8610 = vst [vmem:[#allocation42_spill] sm:$0xff] %v7570_v8  ;;  %v2078_v23 = vadd.f32 %v2077_v45, %v2029_v16  ;;  %v4385_v45 = vld [vmem:[%s8428_s1 + $0x1b8] sm:$0xf0] }
 0x258   :  { %v2128_v1 = vpop.f32.mrf.mxu1  ;;  %v4388_v5 = vor.u32 %v5386_v27, %v4385_v45  ;;  %2491 = vmatpush.bf16.msrb.mxu1 %v4260_v46  ;;  %v5346_v46 = vld [vmem:[%s8428_s1 + $0x6c] sm:$0xf] }
 0x259   :  { %v2127_v13 = vadd.f32 %v2126_v60, %v2078_v23  ;;  %v5382_v60 = vld [vmem:[%s8428_s1 + $0x18c] sm:$0xf] }
 0x25a   :  { %2540 = vmatpush.bf16.msrb.mxu2 %v4388_v5  ;;  %v4372_v44 = vor.u32 %v5382_v60, %v4369_v12  ;;  %v5378_v45 = vld [vmem:[%s8428_s1 + $0x16c] sm:$0xf] }
 0x25b   :  { %v2865_v60 = vmax.f32 %v2127_v13, 0.0 }
 0x25c   :  { %v2030_v24 = vpop.f32.mrf.mxu3  ;;  %2492 = vmatpush.bf16.msrb.mxu1 %v4244_v57 }
 0x25d   :  { %v2031_v16 = vadd.f32 %v2030_v24, %v7361_v19  ;;  %v4225_v19 = vld [vmem:[%s8428_s1 + $0x78] sm:$0xf0] }
 0x25e   :  { %v7594_v40 = vpop.f32.mrf.mxu2  ;;  %v2082_v23 = vpop.f32.mrf.mxu0  ;;  %2541 = vmatpush.bf16.msrb.mxu2 %v4372_v44  ;;  %v4353_v24 = vld [vmem:[%s8428_s1 + $0x178] sm:$0xf0]  ;;  %v5342_v44 = vld [vmem:[%s8428_s1 + $0x4c] sm:$0xf] }
 0x25f   :  { %v2080_v18 = vadd.f32 %v2079_v34, %v2031_v16  ;;  %v4228_v34 = vor.u32 %v5346_v46, %v4225_v19  ;;  %v4356_v56 = vor.u32 %v5378_v45, %v4353_v24  ;;  %v5374_v46 = vld [vmem:[%s8428_s1 + $0x14c] sm:$0xf] }
 0x260   :  { %v2131_v27 = vpop.f32.mrf.mxu1 }
 0x261   :  { %v2129_v5 = vadd.f32 %v2128_v1, %v2080_v18  ;;  %2228 = vmatmul.bf16.gmra.mxu3 %v6231_v37  ;;  %2277 = vmatmul.bf16.gmra.mxu0 %v6233_v38  ;;  %v5496_v1 = vld [vmem:[%s8428_s1 + $0x514] sm:$0xf0]  ;;  %v4209_v18 = vld [vmem:[%s8428_s1 + $0x58] sm:$0xf0] }
 0x262   :  { %v4816_v16 = vor.u32 %v5496_v1, %v4815_v21  ;;  %2493 = vmatpush.bf16.msrb.mxu1 %v4228_v34  ;;  %2542 = vmatpush.bf16.msrb.mxu2 %v4356_v56  ;;  %v4212_v45 = vor.u32 %v5342_v44, %v4209_v18 }
 0x263   :  { %2326 = vmatmul.bf16.gmra.mxu1 %v6749_v25  ;;  %2375 = vmatmul.bf16.gmra.mxu2 %v8601_v9  ;;  %v2869_v57 = vmax.f32 %v2129_v5, 0.0  ;;  %v4337_v5 = vld [vmem:[%s8428_s1 + $0x158] sm:$0xf0] }
 0x264   :  { %v2033_v12 = vpop.f32.mrf.mxu3  ;;  %2398 = vmatpush.bf16.msrb.mxu3 %v4816_v16  ;;  %v4340_v21 = vor.u32 %v5374_v46, %v4337_v5  ;;  %v4193_v16 = vld [vmem:[%s8428_s1 + $0x38] sm:$0xf0]  ;;  %v4943_v46 = vld [vmem:[%s8428_s1 + $0x608] sm:$0xf] }
 0x265   :  { %v2034_v19 = vadd.f32 %v2033_v12, %v7406_v17  ;;  %v7636_v34 = vpack.c.bf16 %v2869_v57, %v2865_v60  ;;  %v5338_v17 = vld [vmem:[%s8428_s1 + $0x2c] sm:$0xf] }
 0x266   :  { %v7631_v13 = vpop.f32.mrf.mxu2  ;;  %v2084_v24 = vpop.f32.mrf.mxu0  ;;  %2494 = vmatpush.bf16.msrb.mxu1 %v4212_v45  ;;  %2543 = vmatpush.bf16.msrb.mxu2 %v4340_v21  ;;  %v5370_v12 = vld [vmem:[%s8428_s1 + $0x12c] sm:$0xf]  ;;  %v4196_v57 = vor.u32 %v5338_v17, %v4193_v16  ;;  %v4305_v16 = vld [vmem:[%s8428_s1 + $0x118] sm:$0xf0] }
 0x267   :  { %8611 = vst [vmem:[#allocation19_spill] sm:$0xff] %v7636_v34  ;;  %v2083_v1 = vadd.f32 %v2082_v23, %v2034_v19  ;;  %v4321_v23 = vld [vmem:[%s8428_s1 + $0x138] sm:$0xf0]  ;;  %v5528_v19 = vld [vmem:[%s8428_s1 + $0x614] sm:$0xf0] }
 0x268   :  { %v2133_v56 = vpop.f32.mrf.mxu1  ;;  %v4324_v44 = vor.u32 %v5370_v12, %v4321_v23  ;;  %v4944_v21 = vor.u32 %v5528_v19, %v4943_v46  ;;  %v5366_v17 = vld [vmem:[%s8428_s1 + $0x10c] sm:$0xf] }
 0x269   :  { %v2132_v60 = vadd.f32 %v2131_v27, %v2083_v1  ;;  %v5334_v27 = vld [vmem:[%s8428_s1 + $0xc] sm:$0xf]  ;;  %v4177_v1 = vld [vmem:[%s8428_s1 + $0x18] sm:$0xf0]  ;;  %v4308_v23 = vor.u32 %v5366_v17, %v4305_v16 }
 0x26a   :  { %2495 = vmatpush.bf16.msrb.mxu1 %v4196_v57  ;;  %2544 = vmatpush.bf16.msrb.mxu2 %v4324_v44  ;;  %v4180_v57 = vor.u32 %v5334_v27, %v4177_v1  ;;  %v5426_v46 = vld [vmem:[%s8428_s1 + $0x2ec] sm:$0xf] }
 0x26b   :  { %2447 = vmatpush.bf16.msrb.mxu0 %v4944_v21  ;;  %v2873_v19 = vmax.f32 %v2132_v60, 0.0 }
 0x26c   :  { %v2035_v18 = vpop.f32.mrf.mxu3 }
 0x26d   :  { %v2036_v45 = vadd.f32 %v2035_v18, %v7432_v33 }
 0x26e   :  { %v7660_v5 = vpop.f32.mrf.mxu2  ;;  %v2087_v12 = vpop.f32.mrf.mxu0  ;;  %2496 = vmatpush.bf16.msrb.mxu1 %v4180_v57  ;;  %2545 = vmatpush.bf16.msrb.mxu2 %v4308_v23 }
 0x26f   :  { %v2085_v44 = vadd.f32 %v2084_v24, %v2036_v45  ;;  %v4545_v24 = vld [vmem:[%s8428_s1 + $0x2f8] sm:$0xf0] }
 0x270   :  { %v2136_v33 = vpop.f32.mrf.mxu1  ;;  %v4548_v27 = vor.u32 %v5426_v46, %v4545_v24 }
 0x271   :  { %v2134_v18 = vadd.f32 %v2133_v56, %v2085_v44  ;;  %2233 = vmatmul.bf16.gmra.mxu3 %v8578_v63  ;;  %2282 = vmatmul.bf16.gmra.mxu0 %v8579_v20 }
 0x272   :  { %2587 = vmatpush.bf16.msra.mxu3 %v4548_v27 }
 0x273   :  { %2331 = vmatmul.bf16.gmra.mxu1 %v6876_v11  ;;  %2380 = vmatmul.bf16.gmra.mxu2 %v6878_v0  ;;  %v2877_v45 = vmax.f32 %v2134_v18, 0.0 }
 0x274   :  { %v2038_v56 = vpop.f32.mrf.mxu3 }
 0x275   :  { %v2039_v21 = vadd.f32 %v2038_v56, %v7441_v42  ;;  %v7684_v17 = vpack.c.bf16 %v2877_v45, %v2873_v19  ;;  %v8613_v42 = vld [vmem:[#allocation49_spill] sm:$0xff] }
 0x276   :  { %v7682_v1 = vpop.f32.mrf.mxu2  ;;  %v2089_v16 = vpop.f32.mrf.mxu0 }
 0x277   :  { %8612 = vst [vmem:[#allocation25_spill] sm:$0xff] %v7684_v17  ;;  %v2088_v57 = vadd.f32 %v2087_v12, %v2039_v21 }
 0x278   :  { %v2138_v23 = vpop.f32.mrf.mxu1 }
 0x279   :  { %v2137_v44 = vadd.f32 %v2136_v33, %v2088_v57  ;;  %v5422_v33 = vld [vmem:[%s8428_s1 + $0x2cc] sm:$0xf] }
 0x27b   :  { %v2881_v12 = vmax.f32 %v2137_v44, 0.0 }
 0x27c   :  { %v2040_v34 = vpop.f32.mrf.mxu3 }
 0x27d   :  { %v2041_v8 = vadd.f32 %v2040_v34, %v7449_v48  ;;  %v4529_v48 = vld [vmem:[%s8428_s1 + $0x2d8] sm:$0xf0] }
 0x27e   :  { %v7687_v61 = vpop.f32.mrf.mxu2  ;;  %v2092_v60 = vpop.f32.mrf.mxu0  ;;  %v4532_v19 = vor.u32 %v5422_v33, %v4529_v48 }
 0x27f   :  { %v2090_v46 = vadd.f32 %v2089_v16, %v2041_v8 }
 0x280   :  { %v2141_v18 = vpop.f32.mrf.mxu1  ;;  %2588 = vmatpush.bf16.msra.mxu3 %v4532_v19  ;;  %v8616_v19 = vld [vmem:[#allocation28_spill] sm:$0xff] }
 0x281   :  { %v2139_v24 = vadd.f32 %v2138_v23, %v2090_v46  ;;  %2238 = vmatmul.bf16.gmra.mxu3 %v8582_v6  ;;  %2287 = vmatmul.bf16.gmra.mxu0 %v8583_v41  ;;  %v7707_v46 = vld [vmem:[%s8429_s2] sm:$0xf] }
 0x283   :  { %2336 = vmatmul.bf16.gmra.mxu1 %v8613_v42  ;;  %2385 = vmatmul.bf16.gmra.mxu2 %v6940_v10  ;;  %v2885_v8 = vmax.f32 %v2139_v24, 0.0  ;;  %v7710_v24 = vperm.slane %v7707_v46, 2 }
 0x284   :  { %v2043_v34 = vpop.f32.mrf.mxu3 }
 0x285   :  { %v2044_v27 = vadd.f32 %v2043_v34, %v7458_v28  ;;  %v7702_v56 = vpack.c.bf16 %v2885_v8, %v2881_v12  ;;  %v8615_v34 = vld [vmem:[#allocation27_spill] sm:$0xff] }
 0x286   :  { %v7700_v45 = vpop.f32.mrf.mxu2  ;;  %v2094_v21 = vpop.f32.mrf.mxu0 }
 0x287   :  { %8614 = vst [vmem:[#allocation58_spill] sm:$0xff] %v7702_v56  ;;  %v2093_v16 = vadd.f32 %v2092_v60, %v2044_v27  ;;  %v2156_v60 = vadd.f32 %v7474_v22, %v7710_v24  ;;  %v8617_v27 = vld [vmem:[#allocation12_spill] sm:$0xff] }
 0x288   :  { %v2143_v57 = vpop.f32.mrf.mxu1 }
 0x289   :  { %v2142_v23 = vadd.f32 %v2141_v18, %v2093_v16 }
 0x28b   :  { %v2889_v16 = vmax.f32 %v2142_v23, 0.0 }
 0x28c   :  { %v2045_v44 = vpop.f32.mrf.mxu3 }
 0x28d   :  { %v2046_v28 = vadd.f32 %v2045_v44, %v7471_v53  ;;  %v5418_v53 = vld [vmem:[%s8428_s1 + $0x2ac] sm:$0xf] }
 0x28e   :  { %v7713_v33 = vpop.f32.mrf.mxu2  ;;  %v2253_v12 = vpop.f32.mrf.mxu0 }
 0x28f   :  { %v2095_v48 = vadd.f32 %v2094_v21, %v2046_v28  ;;  %v4513_v21 = vld [vmem:[%s8428_s1 + $0x2b8] sm:$0xf0] }
 0x290   :  { %v2302_v8 = vpop.f32.mrf.mxu1  ;;  %v4516_v44 = vor.u32 %v5418_v53, %v4513_v21  ;;  %v8619_v21 = vld [vmem:[#allocation31_spill] sm:$0xff] }
 0x291   :  { %v2144_v18 = vadd.f32 %v2143_v57, %v2095_v48  ;;  %2399 = vmatmul.bf16.vlgmr.msrb.gmra.mxu3 %v8615_v34  ;;  %4965 = vmatmul.msk.bf16.vlgmr.msrb.gmra.mxu0 %vm1435_vm0, %v8616_v19  ;;  %v2158_v19 = vadd.f32 %v7477_v7, %v7710_v24 }
 0x292   :  { %2589 = vmatpush.bf16.msra.mxu3 %v4516_v44 }
 0x293   :  { %2497 = vmatmul.bf16.vlgmr.msrb.gmra.mxu1 %v8617_v27  ;;  %2546 = vmatmul.bf16.vlgmr.msrb.gmra.mxu2 %v6159_v2  ;;  %v2893_v22 = vmax.f32 %v2144_v18, 0.0 }
 0x294   :  { %v2204_v57 = vpop.f32.mrf.mxu3 }
 0x295   :  { %v2205_v28 = vadd.f32 %v2204_v57, %v2156_v60  ;;  %v7728_v56 = vpack.c.bf16 %v2893_v22, %v2889_v16  ;;  %v2161_v60 = vadd.f32 %v7492_v51, %v7710_v24  ;;  %v4497_v51 = vld [vmem:[%s8428_s1 + $0x298] sm:$0xf0] }
 0x296   :  { %v2351_v48 = vpop.f32.mrf.mxu2  ;;  %v2255_v17 = vpop.f32.mrf.mxu0 }
 0x297   :  { %8618 = vst [vmem:[#allocation27_spill] sm:$0xff] %v7728_v56  ;;  %v2254_v27 = vadd.f32 %v2253_v12, %v2205_v28  ;;  %v8620_v12 = vld [vmem:[#allocation32_spill] sm:$0xff] }
 0x298   :  { %v2304_v2 = vpop.f32.mrf.mxu1 }
 0x299   :  { %v2303_v23 = vadd.f32 %v2302_v8, %v2254_v27  ;;  %v8621_v8 = vld [vmem:[#allocation14_spill] sm:$0xff] }
 0x29b   :  { %v7732_v10 = vadd.f32 %v2351_v48, %v2303_v23 }
 0x29c   :  { %v2206_v42 = vpop.f32.mrf.mxu3 }
 0x29d   :  { %v2207_v41 = vadd.f32 %v2206_v42, %v2158_v19 }
 0x29e   :  { %v2353_v0 = vpop.f32.mrf.mxu2  ;;  %v2258_v18 = vpop.f32.mrf.mxu0 }
 0x29f   :  { %v2256_v11 = vadd.f32 %v2255_v17, %v2207_v41  ;;  %v5414_v41 = vld [vmem:[%s8428_s1 + $0x28c] sm:$0xf] }
 0x2a0   :  { %v2307_v53 = vpop.f32.mrf.mxu1  ;;  %v4500_v17 = vor.u32 %v5414_v41, %v4497_v51  ;;  %v8622_v51 = vld [vmem:[#allocation34_spill] sm:$0xff] }
 0x2a1   :  { %v2305_v16 = vadd.f32 %v2304_v2, %v2256_v11  ;;  %2404 = vmatmul.bf16.gmra.mxu3 %v8619_v21  ;;  %4966 = vmatmul.msk.bf16.gmra.mxu0 %vm1435_vm0, %v8620_v12 }
 0x2a2   :  { %2590 = vmatpush.bf16.msra.mxu3 %v4500_v17 }
 0x2a3   :  { %2502 = vmatmul.bf16.gmra.mxu1 %v8621_v8  ;;  %2551 = vmatmul.bf16.gmra.mxu2 %v6229_v36  ;;  %v7741_v7 = vadd.f32 %v2353_v0, %v2305_v16  ;;  %v2163_v36 = vadd.f32 %v7495_v26, %v7710_v24 }
 0x2a4   :  { %v2209_v11 = vpop.f32.mrf.mxu3 }
 0x2a5   :  { %v2210_v42 = vadd.f32 %v2209_v11, %v2161_v60  ;;  %v2166_v60 = vadd.f32 %v7508_v55, %v7710_v24  ;;  %v5410_v11 = vld [vmem:[%s8428_s1 + $0x26c] sm:$0xf]  ;;  %v4481_v55 = vld [vmem:[%s8428_s1 + $0x278] sm:$0xf0] }
 0x2a6   :  { %v2356_v19 = vpop.f32.mrf.mxu2  ;;  %v2260_v22 = vpop.f32.mrf.mxu0 }
 0x2a7   :  { %v2259_v57 = vadd.f32 %v2258_v18, %v2210_v42  ;;  %v8623_v18 = vld [vmem:[#allocation35_spill] sm:$0xff]  ;;  %v4484_v42 = vor.u32 %v5410_v11, %v4481_v55  ;;  %v8625_v55 = vld [vmem:[#allocation37_spill] sm:$0xff] }
 0x2a8   :  { %v2309_v44 = vpop.f32.mrf.mxu1 }
 0x2a9   :  { %v2308_v28 = vadd.f32 %v2307_v53, %v2259_v57  ;;  %v8624_v53 = vld [vmem:[#allocation13_spill] sm:$0xff]  ;;  %2591 = vmatpush.bf16.msra.mxu3 %v4484_v42 }
 0x2ab   :  { %v7751_v0 = vadd.f32 %v2356_v19, %v2308_v28 }
 0x2ac   :  { %v2211_v48 = vpop.f32.mrf.mxu3 }
 0x2ad   :  { %v2212_v27 = vadd.f32 %v2211_v48, %v2163_v36 }
 0x2ae   :  { %v2358_v2 = vpop.f32.mrf.mxu2  ;;  %v2263_v23 = vpop.f32.mrf.mxu0 }
 0x2af   :  { %v2261_v16 = vadd.f32 %v2260_v22, %v2212_v27 }
 0x2b0   :  { %v2312_v8 = vpop.f32.mrf.mxu1 }
 0x2b1   :  { %v2310_v41 = vadd.f32 %v2309_v44, %v2261_v16  ;;  %2409 = vmatmul.bf16.gmra.mxu3 %v8622_v51  ;;  %4967 = vmatmul.msk.bf16.gmra.mxu0 %vm1435_vm0, %v8623_v18 }
 0x2b3   :  { %2507 = vmatmul.bf16.gmra.mxu1 %v8624_v53  ;;  %2556 = vmatmul.bf16.gmra.mxu2 %v6055_v29  ;;  %v7760_v26 = vadd.f32 %v2358_v2, %v2310_v41  ;;  %v2168_v29 = vadd.f32 %v7513_v52, %v7710_v24 }
 0x2b4   :  { %v2214_v17 = vpop.f32.mrf.mxu3 }
 0x2b5   :  { %v2215_v19 = vadd.f32 %v2214_v17, %v2166_v60  ;;  %v2171_v60 = vadd.f32 %v7526_v14, %v7710_v24  ;;  %v5406_v17 = vld [vmem:[%s8428_s1 + $0x24c] sm:$0xf]  ;;  %v4465_v14 = vld [vmem:[%s8428_s1 + $0x258] sm:$0xf0] }
 0x2b6   :  { %v2361_v22 = vpop.f32.mrf.mxu2  ;;  %v2265_v57 = vpop.f32.mrf.mxu0 }
 0x2b7   :  { %v2264_v44 = vadd.f32 %v2263_v23, %v2215_v19  ;;  %v8626_v23 = vld [vmem:[#allocation38_spill] sm:$0xff]  ;;  %v4468_v19 = vor.u32 %v5406_v17, %v4465_v14  ;;  %v8628_v14 = vld [vmem:[#allocation40_spill] sm:$0xff] }
 0x2b8   :  { %v2314_v28 = vpop.f32.mrf.mxu1 }
 0x2b9   :  { %v2313_v36 = vadd.f32 %v2312_v8, %v2264_v44  ;;  %v8627_v8 = vld [vmem:[#allocation15_spill] sm:$0xff]  ;;  %2592 = vmatpush.bf16.msra.mxu3 %v4468_v19 }
 0x2bb   :  { %v7770_v48 = vadd.f32 %v2361_v22, %v2313_v36 }
 0x2bc   :  { %v2216_v27 = vpop.f32.mrf.mxu3 }
 0x2bd   :  { %v2217_v2 = vadd.f32 %v2216_v27, %v2168_v29 }
 0x2be   :  { %v2363_v16 = vpop.f32.mrf.mxu2  ;;  %v2268_v41 = vpop.f32.mrf.mxu0 }
 0x2bf   :  { %v2266_v53 = vadd.f32 %v2265_v57, %v2217_v2 }
 0x2c0   :  { %v2317_v56 = vpop.f32.mrf.mxu1 }
 0x2c1   :  { %v2315_v11 = vadd.f32 %v2314_v28, %v2266_v53  ;;  %2414 = vmatmul.bf16.gmra.mxu3 %v8625_v55  ;;  %4968 = vmatmul.msk.bf16.gmra.mxu0 %vm1435_vm0, %v8626_v23 }
 0x2c3   :  { %2512 = vmatmul.bf16.gmra.mxu1 %v8627_v8  ;;  %2561 = vmatmul.bf16.gmra.mxu2 %v6109_v49  ;;  %v7779_v52 = vadd.f32 %v2363_v16, %v2315_v11  ;;  %v2173_v49 = vadd.f32 %v7531_v58, %v7710_v24  ;;  %v5490_v58 = vld [vmem:[%s8428_s1 + $0x4ec] sm:$0xf] }
 0x2c4   :  { %v2219_v42 = vpop.f32.mrf.mxu3 }
 0x2c5   :  { %v2220_v22 = vadd.f32 %v2219_v42, %v2171_v60  ;;  %v5458_v60 = vld [vmem:[%s8428_s1 + $0x3ec] sm:$0xf] }
 0x2c6   :  { %v2366_v57 = vpop.f32.mrf.mxu2  ;;  %v2270_v44 = vpop.f32.mrf.mxu0  ;;  %v8629_v42 = vld [vmem:[#allocation41_spill] sm:$0xff] }
 0x2c7   :  { %v2269_v28 = vadd.f32 %v2268_v41, %v2220_v22  ;;  %v4673_v41 = vld [vmem:[%s8428_s1 + $0x3f8] sm:$0xf0] }
 0x2c8   :  { %v2319_v36 = vpop.f32.mrf.mxu1  ;;  %v4676_v19 = vor.u32 %v5458_v60, %v4673_v41  ;;  %v4801_v22 = vld [vmem:[%s8428_s1 + $0x4f8] sm:$0xf0]  ;;  %v5486_v60 = vld [vmem:[%s8428_s1 + $0x4cc] sm:$0xf] }
 0x2c9   :  { %v2318_v29 = vadd.f32 %v2317_v56, %v2269_v28  ;;  %v2176_v56 = vadd.f32 %v7565_v15, %v7710_v24  ;;  %v8630_v15 = vld [vmem:[#allocation16_spill] sm:$0xff]  ;;  %v4804_v28 = vor.u32 %v5490_v58, %v4801_v22  ;;  %v5518_v22 = vld [vmem:[%s8428_s1 + $0x5cc] sm:$0xf] }
 0x2ca   :  { %2636 = vmatpush.bf16.msra.mxu0 %v4676_v19  ;;  %v4785_v19 = vld [vmem:[%s8428_s1 + $0x4d8] sm:$0xf0] }
 0x2cb   :  { %v7789_v27 = vadd.f32 %v2366_v57, %v2318_v29  ;;  %v5522_v57 = vld [vmem:[%s8428_s1 + $0x5ec] sm:$0xf]  ;;  %2685 = vmatpush.bf16.msra.mxu1 %v4804_v28 }
 0x2cc   :  { %v2221_v2 = vpop.f32.mrf.mxu3 }
 0x2cd   :  { %v2222_v16 = vadd.f32 %v2221_v2, %v2173_v49  ;;  %v5402_v49 = vld [vmem:[%s8428_s1 + $0x22c] sm:$0xf]  ;;  %v4449_v2 = vld [vmem:[%s8428_s1 + $0x238] sm:$0xf0] }
 0x2ce   :  { %v2368_v53 = vpop.f32.mrf.mxu2  ;;  %v2273_v11 = vpop.f32.mrf.mxu0 }
 0x2cf   :  { %v2271_v8 = vadd.f32 %v2270_v44, %v2222_v16  ;;  %v4929_v44 = vld [vmem:[%s8428_s1 + $0x5f8] sm:$0xf0] }
 0x2d0   :  { %v2322_v23 = vpop.f32.mrf.mxu1 }
 0x2d1   :  { %v2320_v17 = vadd.f32 %v2319_v36, %v2271_v8  ;;  %2419 = vmatmul.bf16.gmra.mxu3 %v8628_v14  ;;  %4969 = vmatmul.msk.bf16.gmra.mxu0 %vm1435_vm0, %v8629_v42  ;;  %v4932_v36 = vor.u32 %v5522_v57, %v4929_v44  ;;  %v4452_v8 = vor.u32 %v5402_v49, %v4449_v2  ;;  %v4913_v57 = vld [vmem:[%s8428_s1 + $0x5d8] sm:$0xf0]  ;;  %v5450_v49 = vld [vmem:[%s8428_s1 + $0x3ac] sm:$0xf] }
 0x2d2   :  { %v4916_v28 = vor.u32 %v5518_v22, %v4913_v57  ;;  %v4641_v2 = vld [vmem:[%s8428_s1 + $0x3b8] sm:$0xf0]  ;;  %v5446_v57 = vld [vmem:[%s8428_s1 + $0x38c] sm:$0xf] }
 0x2d3   :  { %2517 = vmatmul.bf16.gmra.mxu1 %v8630_v15  ;;  %2566 = vmatmul.bf16.gmra.mxu2 %v6162_v3  ;;  %v7816_v29 = vadd.f32 %v2368_v53, %v2320_v17  ;;  %v5454_v3 = vld [vmem:[%s8428_s1 + $0x3cc] sm:$0xf]  ;;  %v4657_v53 = vld [vmem:[%s8428_s1 + $0x3d8] sm:$0xf0]  ;;  %v4788_v15 = vor.u32 %v5486_v60, %v4785_v19  ;;  %v2178_v19 = vadd.f32 %v7594_v40, %v7710_v24 }
 0x2d4   :  { %v2224_v16 = vpop.f32.mrf.mxu3  ;;  %2734 = vmatpush.bf16.msra.mxu2 %v4932_v36  ;;  %v4660_v17 = vor.u32 %v5454_v3, %v4657_v53  ;;  %2593 = vmatpush.bf16.msra.mxu3 %v4452_v8  ;;  %v4644_v3 = vor.u32 %v5450_v49, %v4641_v2  ;;  %v5514_v53 = vld [vmem:[%s8428_s1 + $0x5ac] sm:$0xf]  ;;  %v4897_v60 = vld [vmem:[%s8428_s1 + $0x5b8] sm:$0xf0] }
 0x2d5   :  { %v2225_v41 = vadd.f32 %v2224_v16, %v2176_v56  ;;  %2686 = vmatpush.bf16.msra.mxu1 %v4788_v15  ;;  %v5482_v16 = vld [vmem:[%s8428_s1 + $0x4ac] sm:$0xf]  ;;  %v4625_v15 = vld [vmem:[%s8428_s1 + $0x398] sm:$0xf0] }
 0x2d6   :  { %v2371_v58 = vpop.f32.mrf.mxu2  ;;  %v2275_v44 = vpop.f32.mrf.mxu0  ;;  %2637 = vmatpush.bf16.msra.mxu0 %v4660_v17  ;;  %v4900_v17 = vor.u32 %v5514_v53, %v4897_v60  ;;  %v4753_v49 = vld [vmem:[%s8428_s1 + $0x498] sm:$0xf0]  ;;  %v5510_v2 = vld [vmem:[%s8428_s1 + $0x58c] sm:$0xf] }
 0x2d7   :  { %v2274_v36 = vadd.f32 %v2273_v11, %v2225_v41  ;;  %v4769_v11 = vld [vmem:[%s8428_s1 + $0x4b8] sm:$0xf0] }
 0x2d8   :  { %v2324_v56 = vpop.f32.mrf.mxu1  ;;  %2735 = vmatpush.bf16.msra.mxu2 %v4916_v28  ;;  %v4772_v41 = vor.u32 %v5482_v16, %v4769_v11  ;;  %v5478_v28 = vld [vmem:[%s8428_s1 + $0x48c] sm:$0xf]  ;;  %v4881_v16 = vld [vmem:[%s8428_s1 + $0x598] sm:$0xf0] }
 0x2d9   :  { %v2323_v8 = vadd.f32 %v2322_v23, %v2274_v36  ;;  %v4884_v11 = vor.u32 %v5510_v2, %v4881_v16 }
 0x2da   :  { %2638 = vmatpush.bf16.msra.mxu0 %v4644_v3  ;;  %2687 = vmatpush.bf16.msra.mxu1 %v4772_v41  ;;  %v4756_v3 = vor.u32 %v5478_v28, %v4753_v49  ;;  %v5442_v41 = vld [vmem:[%s8428_s1 + $0x36c] sm:$0xf]  ;;  %v4865_v49 = vld [vmem:[%s8428_s1 + $0x578] sm:$0xf0] }
 0x2db   :  { %v7862_v22 = vadd.f32 %v2371_v58, %v2323_v8  ;;  %v4628_v58 = vor.u32 %v5446_v57, %v4625_v15  ;;  %v8631_v57 = vld [vmem:[#allocation43_spill] sm:$0xff]  ;;  %v8632_v15 = vld [vmem:[#allocation44_spill] sm:$0xff] }
 0x2dc   :  { %v2226_v23 = vpop.f32.mrf.mxu3  ;;  %2736 = vmatpush.bf16.msra.mxu2 %v4900_v17  ;;  %v4609_v17 = vld [vmem:[%s8428_s1 + $0x378] sm:$0xf0] }
 0x2dd   :  { %v2227_v36 = vadd.f32 %v2226_v23, %v2178_v19  ;;  %v5474_v19 = vld [vmem:[%s8428_s1 + $0x46c] sm:$0xf]  ;;  %v2181_v23 = vadd.f32 %v7631_v13, %v7710_v24  ;;  %v4612_v28 = vor.u32 %v5442_v41, %v4609_v17 }
 0x2de   :  { %v2373_v40 = vpop.f32.mrf.mxu2  ;;  %v2278_v8 = vpop.f32.mrf.mxu0  ;;  %2639 = vmatpush.bf16.msra.mxu0 %v4628_v58  ;;  %2688 = vmatpush.bf16.msra.mxu1 %v4756_v3  ;;  %v5506_v58 = vld [vmem:[%s8428_s1 + $0x56c] sm:$0xf] }
 0x2df   :  { %v2276_v53 = vadd.f32 %v2275_v44, %v2227_v36  ;;  %v4737_v36 = vld [vmem:[%s8428_s1 + $0x478] sm:$0xf0]  ;;  %v8633_v13 = vld [vmem:[#allocation17_spill] sm:$0xff]  ;;  %v4868_v2 = vor.u32 %v5506_v58, %v4865_v49 }
 0x2e0   :  { %v2327_v60 = vpop.f32.mrf.mxu1  ;;  %2737 = vmatpush.bf16.msra.mxu2 %v4884_v11  ;;  %v5398_v3 = vld [vmem:[%s8428_s1 + $0x20c] sm:$0xf]  ;;  %v4433_v11 = vld [vmem:[%s8428_s1 + $0x218] sm:$0xf0] }
 0x2e1   :  { %v2325_v44 = vadd.f32 %v2324_v56, %v2276_v53  ;;  %2424 = vmatmul.bf16.gmra.mxu3 %v8631_v57  ;;  %4970 = vmatmul.msk.bf16.gmra.mxu0 %vm1435_vm0, %v8632_v15  ;;  %v4740_v56 = vor.u32 %v5474_v19, %v4737_v36  ;;  %v4436_v41 = vor.u32 %v5398_v3, %v4433_v11  ;;  %v5470_v17 = vld [vmem:[%s8428_s1 + $0x44c] sm:$0xf]  ;;  %v4849_v49 = vld [vmem:[%s8428_s1 + $0x558] sm:$0xf0] }
 0x2e2   :  { %2640 = vmatpush.bf16.msra.mxu0 %v4612_v28  ;;  %v4721_v28 = vld [vmem:[%s8428_s1 + $0x458] sm:$0xf0]  ;;  %v5502_v58 = vld [vmem:[%s8428_s1 + $0x54c] sm:$0xf] }
 0x2e3   :  { %2522 = vmatmul.bf16.gmra.mxu1 %v8633_v13  ;;  %2571 = vmatmul.bf16.gmra.mxu2 %v6231_v37  ;;  %v7907_v16 = vadd.f32 %v2373_v40, %v2325_v44  ;;  %v5438_v37 = vld [vmem:[%s8428_s1 + $0x34c] sm:$0xf]  ;;  %v4593_v40 = vld [vmem:[%s8428_s1 + $0x358] sm:$0xf0] }
 0x2e4   :  { %v2229_v53 = vpop.f32.mrf.mxu3  ;;  %2689 = vmatpush.bf16.msra.mxu1 %v4740_v56  ;;  %2738 = vmatpush.bf16.msra.mxu2 %v4868_v2  ;;  %v4596_v36 = vor.u32 %v5438_v37, %v4593_v40  ;;  %v4724_v56 = vor.u32 %v5470_v17, %v4721_v28  ;;  %v4852_v2 = vor.u32 %v5502_v58, %v4849_v49  ;;  %v5434_v11 = vld [vmem:[%s8428_s1 + $0x32c] sm:$0xf] }
 0x2e5   :  { %v2230_v19 = vadd.f32 %v2229_v53, %v2181_v23  ;;  %2594 = vmatpush.bf16.msra.mxu3 %v4436_v41  ;;  %v4577_v53 = vld [vmem:[%s8428_s1 + $0x338] sm:$0xf0]  ;;  %v5466_v37 = vld [vmem:[%s8428_s1 + $0x42c] sm:$0xf]  ;;  %v2183_v58 = vadd.f32 %v7660_v5, %v7710_v24 }
 0x2e6   :  { %v2376_v44 = vpop.f32.mrf.mxu2  ;;  %v2280_v13 = vpop.f32.mrf.mxu0  ;;  %2641 = vmatpush.bf16.msra.mxu0 %v4596_v36  ;;  %v4580_v40 = vor.u32 %v5434_v11, %v4577_v53  ;;  %v5498_v17 = vld [vmem:[%s8428_s1 + $0x52c] sm:$0xf]  ;;  %v4689_v53 = vld [vmem:[%s8428_s1 + $0x418] sm:$0xf0] }
 0x2e7   :  { %v2279_v3 = vadd.f32 %v2278_v8, %v2230_v19  ;;  %v4705_v8 = vld [vmem:[%s8428_s1 + $0x438] sm:$0xf0] }
 0x2e8   :  { %v2329_v23 = vpop.f32.mrf.mxu1  ;;  %2690 = vmatpush.bf16.msra.mxu1 %v4724_v56  ;;  %2739 = vmatpush.bf16.msra.mxu2 %v4852_v2  ;;  %v4833_v19 = vld [vmem:[%s8428_s1 + $0x538] sm:$0xf0]  ;;  %v4708_v36 = vor.u32 %v5466_v37, %v4705_v8  ;;  %v5430_v56 = vld [vmem:[%s8428_s1 + $0x30c] sm:$0xf] }
 0x2e9   :  { %v2328_v41 = vadd.f32 %v2327_v60, %v2279_v3  ;;  %v4836_v28 = vor.u32 %v5498_v17, %v4833_v19  ;;  %v4561_v2 = vld [vmem:[%s8428_s1 + $0x318] sm:$0xf0]  ;;  %v5462_v3 = vld [vmem:[%s8428_s1 + $0x40c] sm:$0xf] }
 0x2ea   :  { %2642 = vmatpush.bf16.msra.mxu0 %v4580_v40  ;;  %v5494_v37 = vld [vmem:[%s8428_s1 + $0x50c] sm:$0xf]  ;;  %v4692_v8 = vor.u32 %v5462_v3, %v4689_v53 }
 0x2eb   :  { %v7953_v49 = vadd.f32 %v2376_v44, %v2328_v41  ;;  %v4564_v44 = vor.u32 %v5430_v56, %v4561_v2  ;;  %v4817_v41 = vld [vmem:[%s8428_s1 + $0x518] sm:$0xf0]  ;;  %v8635_v56 = vld [vmem:[#allocation48_spill] sm:$0xff]  ;;  %v8636_v2 = vld [vmem:[#allocation18_spill] sm:$0xff] }
 0x2ec   :  { %v2231_v60 = vpop.f32.mrf.mxu3  ;;  %2691 = vmatpush.bf16.msra.mxu1 %v4708_v36  ;;  %2740 = vmatpush.bf16.msra.mxu2 %v4836_v28  ;;  %v4820_v17 = vor.u32 %v5494_v37, %v4817_v41  ;;  %v2186_v28 = vadd.f32 %v7682_v1, %v7710_v24  ;;  %v4945_v1 = vld [vmem:[%s8428_s1 + $0x618] sm:$0xf0] }
 0x2ed   :  { %v2232_v11 = vadd.f32 %v2231_v60, %v2183_v58  ;;  %v8634_v60 = vld [vmem:[#allocation47_spill] sm:$0xff] }
 0x2ee   :  { %v2378_v5 = vpop.f32.mrf.mxu2  ;;  %v2283_v40 = vpop.f32.mrf.mxu0  ;;  %2643 = vmatpush.bf16.msra.mxu0 %v4564_v44 }
 0x2ef   :  { %v2281_v19 = vadd.f32 %v2280_v13, %v2232_v11  ;;  %v5526_v13 = vld [vmem:[%s8428_s1 + $0x60c] sm:$0xf] }
 0x2f0   :  { %v2332_v36 = vpop.f32.mrf.mxu1  ;;  %2692 = vmatpush.bf16.msra.mxu1 %v4692_v8  ;;  %2741 = vmatpush.bf16.msra.mxu2 %v4820_v17  ;;  %v4948_v11 = vor.u32 %v5526_v13, %v4945_v1  ;;  %v8637_v1 = vld [vmem:[#allocation51_spill] sm:$0xff] }
 0x2f1   :  { %v2330_v58 = vadd.f32 %v2329_v23, %v2281_v19  ;;  %2429 = vmatmul.bf16.gmra.mxu3 %v8634_v60  ;;  %4971 = vmatmul.msk.bf16.gmra.mxu0 %vm1435_vm0, %v8635_v56 }
 0x2f2   :  { %2790 = vmatpush.bf16.msrb.mxu3 %v4948_v11 }
 0x2f3   :  { %2527 = vmatmul.bf16.gmra.mxu1 %v8636_v2  ;;  %2576 = vmatmul.bf16.gmra.mxu2 %v8578_v63  ;;  %v7980_v3 = vadd.f32 %v2378_v5, %v2330_v58  ;;  %v2188_v63 = vadd.f32 %v7687_v61, %v7710_v24 }
 0x2f4   :  { %v2234_v23 = vpop.f32.mrf.mxu3 }
 0x2f5   :  { %v2235_v44 = vadd.f32 %v2234_v23, %v2186_v28  ;;  %v2191_v28 = vadd.f32 %v7700_v45, %v7710_v24  ;;  %v2193_v45 = vadd.f32 %v7713_v33, %v7710_v24 }
 0x2f6   :  { %v2381_v53 = vpop.f32.mrf.mxu2  ;;  %v2285_v37 = vpop.f32.mrf.mxu0 }
 0x2f7   :  { %v2284_v41 = vadd.f32 %v2283_v40, %v2235_v44  ;;  %v8638_v40 = vld [vmem:[#allocation52_spill] sm:$0xff] }
 0x2f8   :  { %v2334_v8 = vpop.f32.mrf.mxu1 }
 0x2f9   :  { %v2333_v17 = vadd.f32 %v2332_v36, %v2284_v41  ;;  %v8639_v36 = vld [vmem:[#allocation22_spill] sm:$0xff] }
 0x2fb   :  { %v7990_v5 = vadd.f32 %v2381_v53, %v2333_v17 }
 0x2fc   :  { %v2236_v19 = vpop.f32.mrf.mxu3 }
 0x2fd   :  { %v2237_v58 = vadd.f32 %v2236_v19, %v2188_v63 }
 0x2fe   :  { %v2383_v2 = vpop.f32.mrf.mxu2  ;;  %v2288_v56 = vpop.f32.mrf.mxu0 }
 0x2ff   :  { %v2286_v15 = vadd.f32 %v2285_v37, %v2237_v58 }
 0x300   :  { %v2337_v42 = vpop.f32.mrf.mxu1 }
 0x301   :  { %v2335_v13 = vadd.f32 %v2334_v8, %v2286_v15  ;;  %2434 = vmatmul.bf16.gmra.mxu3 %v8637_v1  ;;  %4972 = vmatmul.msk.bf16.gmra.mxu0 %vm1435_vm0, %v8638_v40 }
 0x303   :  { %2532 = vmatmul.bf16.gmra.mxu1 %v8639_v36  ;;  %2581 = vmatmul.bf16.gmra.mxu2 %v8582_v6  ;;  %v7999_v61 = vadd.f32 %v2383_v2, %v2335_v13  ;;  %v8006_v6 = vperm.slane %v7707_v46, 3 }
 0x304   :  { %v2239_v23 = vpop.f32.mrf.mxu3 }
 0x305   :  { %v2240_v11 = vadd.f32 %v2239_v23, %v2191_v28 }
 0x306   :  { %v2386_v44 = vpop.f32.mrf.mxu2  ;;  %v2290_v53 = vpop.f32.mrf.mxu0 }
 0x307   :  { %v2289_v37 = vadd.f32 %v2288_v56, %v2240_v11  ;;  %v8640_v56 = vld [vmem:[#allocation26_spill] sm:$0xff] }
 0x308   :  { %v2339_v41 = vpop.f32.mrf.mxu1 }
 0x309   :  { %v2338_v17 = vadd.f32 %v2337_v42, %v2289_v37 }
 0x30b   :  { %v8003_v15 = vadd.f32 %v2386_v44, %v2338_v17 }
 0x30c   :  { %v2241_v8 = vpop.f32.mrf.mxu3 }
 0x30d   :  { %v2242_v63 = vadd.f32 %v2241_v8, %v2193_v45 }
 0x30e   :  { %v2388_v19 = vpop.f32.mrf.mxu2  ;;  %v2449_v58 = vpop.f32.mrf.mxu0 }
 0x30f   :  { %v2291_v2 = vadd.f32 %v2290_v53, %v2242_v63 }
 0x310   :  { %v2498_v13 = vpop.f32.mrf.mxu1 }
 0x311   :  { %v2340_v28 = vadd.f32 %v2339_v41, %v2291_v2  ;;  %2595 = vmatmul.bf16.vlgmr.msra.gmra.mxu3 %v8604_v31  ;;  %2644 = vmatmul.bf16.vlgmr.msra.gmra.mxu0 %v8605_v54  ;;  %v2499_v42 = vadd.f32 %v2498_v13, %v8006_v6  ;;  %v8642_v2 = vld [vmem:[#allocation30_spill] sm:$0xff] }
 0x313   :  { %2693 = vmatmul.bf16.vlgmr.msra.gmra.mxu1 %v8640_v56  ;;  %2742 = vmatmul.bf16.vlgmr.msra.gmra.mxu2 %v8615_v34  ;;  %v8013_v24 = vadd.f32 %v2388_v19, %v2340_v28 }
 0x314   :  { %v2400_v33 = vpop.f32.mrf.mxu3 }
 0x315   :  { %v2401_v36 = vadd.f32 %v2400_v33, %v7732_v10  ;;  %v8641_v10 = vld [vmem:[#allocation29_spill] sm:$0xff] }
 0x316   :  { %v2547_v46 = vpop.f32.mrf.mxu2  ;;  %v2451_v11 = vpop.f32.mrf.mxu0 }
 0x317   :  { %v8016_v23 = vadd.f32 %v2547_v46, %v2499_v42  ;;  %v2450_v44 = vadd.f32 %v2449_v58, %v2401_v36 }
 0x318   :  { %v2500_v53 = vpop.f32.mrf.mxu1 }
 0x319   :  { %v2501_v31 = vadd.f32 %v2500_v53, %v8006_v6  ;;  %v2834_v63 = vmax.f32 %v2450_v44, 0.0 }
 0x31c   :  { %v2402_v54 = vpop.f32.mrf.mxu3 }
 0x31d   :  { %v2403_v37 = vadd.f32 %v2402_v54, %v7741_v7 }
 0x31e   :  { %v2549_v41 = vpop.f32.mrf.mxu2  ;;  %v2454_v34 = vpop.f32.mrf.mxu0 }
 0x31f   :  { %v8020_v17 = vadd.f32 %v2549_v41, %v2501_v31  ;;  %v2452_v45 = vadd.f32 %v2451_v11, %v2403_v37 }
 0x320   :  { %v2503_v8 = vpop.f32.mrf.mxu1 }
 0x321   :  { %v2838_v19 = vmax.f32 %v2452_v45, 0.0  ;;  %2600 = vmatmul.bf16.gmra.mxu3 %v6383_v43  ;;  %2649 = vmatmul.bf16.gmra.mxu0 %v8641_v10  ;;  %v2504_v58 = vadd.f32 %v2503_v8, %v8006_v6 }
 0x323   :  { %2698 = vmatmul.bf16.gmra.mxu1 %v8642_v2  ;;  %2747 = vmatmul.bf16.gmra.mxu2 %v8619_v21  ;;  %v8027_v13 = vpack.c.bf16 %v2838_v19, %v2834_v63 }
 0x324   :  { %v2405_v7 = vpop.f32.mrf.mxu3 }
 0x325   :  { %v2406_v28 = vadd.f32 %v2405_v7, %v7751_v0 }
 0x326   :  { %v2552_v42 = vpop.f32.mrf.mxu2  ;;  %v2456_v33 = vpop.f32.mrf.mxu0 }
 0x327   :  { %v8030_v56 = vadd.f32 %v2552_v42, %v2504_v58  ;;  %v2455_v36 = vadd.f32 %v2454_v34, %v2406_v28 }
 0x328   :  { %v2505_v46 = vpop.f32.mrf.mxu1 }
 0x329   :  { %v2506_v43 = vadd.f32 %v2505_v46, %v8006_v6  ;;  %v2842_v41 = vmax.f32 %v2455_v36, 0.0 }
 0x32c   :  { %v2407_v11 = vpop.f32.mrf.mxu3 }
 0x32d   :  { %v2408_v44 = vadd.f32 %v2407_v11, %v7760_v26 }
 0x32e   :  { %v2554_v53 = vpop.f32.mrf.mxu2  ;;  %v2459_v21 = vpop.f32.mrf.mxu0 }
 0x32f   :  { %v8034_v31 = vadd.f32 %v2554_v53, %v2506_v43  ;;  %v2457_v54 = vadd.f32 %v2456_v33, %v2408_v44 }
 0x330   :  { %v2508_v37 = vpop.f32.mrf.mxu1 }
 0x331   :  { %v2846_v45 = vmax.f32 %v2457_v54, 0.0  ;;  %2605 = vmatmul.bf16.gmra.mxu3 %v6057_v30  ;;  %2654 = vmatmul.bf16.gmra.mxu0 %v6521_v62  ;;  %v2509_v0 = vadd.f32 %v2508_v37, %v8006_v6 }
 0x333   :  { %2703 = vmatmul.bf16.gmra.mxu1 %v8592_v47  ;;  %2752 = vmatmul.bf16.gmra.mxu2 %v8622_v51  ;;  %v8041_v34 = vpack.c.bf16 %v2846_v45, %v2842_v41 }
 0x334   :  { %v2410_v26 = vpop.f32.mrf.mxu3 }
 0x335   :  { %v2411_v8 = vadd.f32 %v2410_v26, %v7770_v48 }
 0x336   :  { %v2557_v63 = vpop.f32.mrf.mxu2  ;;  %v2461_v10 = vpop.f32.mrf.mxu0 }
 0x337   :  { %v8044_v19 = vadd.f32 %v2557_v63, %v2509_v0  ;;  %v2460_v58 = vadd.f32 %v2459_v21, %v2411_v8  ;;  %v5039_v8 = vld [vmem:[#allocation2 + $0x70] sm:$0xf]  ;;  %v5544_v63 = vld [vmem:[#allocation2 + $0x74] sm:$0xf0] }
 0x338   :  { %v2510_v2 = vpop.f32.mrf.mxu1 }
 0x339   :  { %v2511_v30 = vadd.f32 %v2510_v2, %v8006_v6  ;;  %v2850_v36 = vmax.f32 %v2460_v58, 0.0  ;;  %v5040_v2 = vor.u32 %v5544_v63, %v5039_v8  ;;  %v5151_v8 = vld [vmem:[#allocation2 + $0x150] sm:$0xf] }
 0x33b   :  { %3318 = vmatpush.bf16.msrb.mxu0 %v5040_v2 }
 0x33c   :  { %v2412_v62 = vpop.f32.mrf.mxu3 }
 0x33d   :  { %v2413_v7 = vadd.f32 %v2412_v62, %v7779_v52  ;;  %v5167_v62 = vld [vmem:[#allocation2 + $0x170] sm:$0xf] }
 0x33e   :  { %v2559_v28 = vpop.f32.mrf.mxu2  ;;  %v2464_v51 = vpop.f32.mrf.mxu0 }
 0x33f   :  { %v8048_v47 = vadd.f32 %v2559_v28, %v2511_v30  ;;  %v2462_v42 = vadd.f32 %v2461_v10, %v2413_v7  ;;  %v5560_v30 = vld [vmem:[#allocation2 + $0xf4] sm:$0xf0] }
 0x340   :  { %v2513_v33 = vpop.f32.mrf.mxu1  ;;  %v5576_v28 = vld [vmem:[#allocation2 + $0x174] sm:$0xf0] }
 0x341   :  { %v2854_v46 = vmax.f32 %v2462_v42, 0.0  ;;  %2610 = vmatmul.bf16.gmra.mxu3 %v6111_v50  ;;  %2659 = vmatmul.bf16.gmra.mxu0 %v6575_v59  ;;  %v2514_v48 = vadd.f32 %v2513_v33, %v8006_v6 }
 0x343   :  { %2708 = vmatmul.bf16.gmra.mxu1 %v8595_v32  ;;  %2757 = vmatmul.bf16.gmra.mxu2 %v8625_v55  ;;  %v8055_v43 = vpack.c.bf16 %v2854_v46, %v2850_v36  ;;  %v5542_v36 = vld [vmem:[#allocation2 + $0x64] sm:$0xf0] }
 0x344   :  { %v2415_v52 = vpop.f32.mrf.mxu3 }
 0x345   :  { %v2416_v11 = vadd.f32 %v2415_v52, %v7789_v27  ;;  %v5103_v27 = vld [vmem:[#allocation2 + $0xf0] sm:$0xf] }
 0x346   :  { %v2562_v44 = vpop.f32.mrf.mxu2  ;;  %v2466_v21 = vpop.f32.mrf.mxu0  ;;  %v5104_v7 = vor.u32 %v5560_v30, %v5103_v27  ;;  %v5015_v30 = vld [vmem:[#allocation2 + $0x40] sm:$0xf] }
 0x347   :  { %v8058_v53 = vadd.f32 %v2562_v44, %v2514_v48  ;;  %v2465_v54 = vadd.f32 %v2464_v51, %v2416_v11  ;;  %v5168_v51 = vor.u32 %v5576_v28, %v5167_v62  ;;  %v5558_v11 = vld [vmem:[#allocation2 + $0xe4] sm:$0xf0]  ;;  %v5079_v62 = vld [vmem:[#allocation2 + $0xc0] sm:$0xf] }
 0x348   :  { %v2515_v37 = vpop.f32.mrf.mxu1  ;;  %3367 = vmatpush.bf16.msrb.mxu1 %v5104_v7  ;;  %v5574_v44 = vld [vmem:[#allocation2 + $0x164] sm:$0xf0] }
 0x349   :  { %v2516_v50 = vadd.f32 %v2515_v37, %v8006_v6  ;;  %v2858_v10 = vmax.f32 %v2465_v54, 0.0  ;;  %3416 = vmatpush.bf16.msrb.mxu2 %v5168_v51  ;;  %v5554_v51 = vld [vmem:[#allocation2 + $0xc4] sm:$0xf0] }
 0x34c   :  { %v2417_v59 = vpop.f32.mrf.mxu3 }
 0x34d   :  { %v2418_v41 = vadd.f32 %v2417_v59, %v7816_v29 }
 0x34e   :  { %v2564_v45 = vpop.f32.mrf.mxu2  ;;  %v2469_v55 = vpop.f32.mrf.mxu0 }
 0x34f   :  { %v8062_v32 = vadd.f32 %v2564_v45, %v2516_v50  ;;  %v2467_v0 = vadd.f32 %v2466_v21, %v2418_v41  ;;  %v5023_v41 = vld [vmem:[#allocation2 + $0x50] sm:$0xf]  ;;  %v5540_v45 = vld [vmem:[#allocation2 + $0x54] sm:$0xf0] }
 0x350   :  { %v2518_v26 = vpop.f32.mrf.mxu1 }
 0x351   :  { %v2862_v58 = vmax.f32 %v2467_v0, 0.0  ;;  %2615 = vmatmul.bf16.gmra.mxu3 %v6164_v4  ;;  %2664 = vmatmul.bf16.gmra.mxu0 %v6629_v35  ;;  %v2519_v29 = vadd.f32 %v2518_v26, %v8006_v6  ;;  %v5031_v4 = vld [vmem:[#allocation2 + $0x60] sm:$0xf]  ;;  %v5087_v0 = vld [vmem:[#allocation2 + $0xd0] sm:$0xf] }
 0x352   :  { %v5095_v35 = vld [vmem:[#allocation2 + $0xe0] sm:$0xf]  ;;  %v5032_v52 = vor.u32 %v5542_v36, %v5031_v4  ;;  %v5556_v26 = vld [vmem:[#allocation2 + $0xd4] sm:$0xf0]  ;;  %v5570_v4 = vld [vmem:[#allocation2 + $0x144] sm:$0xf0] }
 0x353   :  { %2713 = vmatmul.bf16.gmra.mxu1 %v8598_v39  ;;  %2762 = vmatmul.bf16.gmra.mxu2 %v8628_v14  ;;  %v8069_v42 = vpack.c.bf16 %v2862_v58, %v2858_v10  ;;  %v5159_v39 = vld [vmem:[#allocation2 + $0x160] sm:$0xf]  ;;  %v5096_v54 = vor.u32 %v5558_v11, %v5095_v35  ;;  %v5088_v27 = vor.u32 %v5556_v26, %v5087_v0  ;;  %v5572_v10 = vld [vmem:[#allocation2 + $0x154] sm:$0xf0] }
 0x354   :  { %v2420_v33 = vpop.f32.mrf.mxu3  ;;  %v5160_v37 = vor.u32 %v5574_v44, %v5159_v39  ;;  %3319 = vmatpush.bf16.msrb.mxu0 %v5032_v52  ;;  %v5152_v58 = vor.u32 %v5572_v10, %v5151_v8  ;;  %v5007_v39 = vld [vmem:[#allocation2 + $0x30] sm:$0xf]  ;;  %v5536_v44 = vld [vmem:[#allocation2 + $0x34] sm:$0xf0] }
 0x355   :  { %v2421_v46 = vadd.f32 %v2420_v33, %v7862_v22  ;;  %3368 = vmatpush.bf16.msrb.mxu1 %v5096_v54  ;;  %v5024_v22 = vor.u32 %v5540_v45, %v5023_v41  ;;  %v5143_v33 = vld [vmem:[#allocation2 + $0x140] sm:$0xf]  ;;  %v5071_v54 = vld [vmem:[#allocation2 + $0xb0] sm:$0xf]  ;;  %v5552_v41 = vld [vmem:[#allocation2 + $0xb4] sm:$0xf0] }
 0x356   :  { %v2567_v48 = vpop.f32.mrf.mxu2  ;;  %v2471_v21 = vpop.f32.mrf.mxu0  ;;  %3417 = vmatpush.bf16.msrb.mxu2 %v5160_v37  ;;  %v5144_v11 = vor.u32 %v5570_v4, %v5143_v33  ;;  %v5135_v45 = vld [vmem:[#allocation2 + $0x130] sm:$0xf]  ;;  %v5532_v33 = vld [vmem:[#allocation2 + $0x14] sm:$0xf0] }
 0x357   :  { %v8072_v14 = vadd.f32 %v2567_v48, %v2519_v29  ;;  %v2470_v50 = vadd.f32 %v2469_v55, %v2421_v46  ;;  %v5538_v55 = vld [vmem:[#allocation2 + $0x44] sm:$0xf0]  ;;  %v5080_v46 = vor.u32 %v5554_v51, %v5079_v62  ;;  %v4991_v51 = vld [vmem:[#allocation2 + $0x10] sm:$0xf] }
 0x358   :  { %v2520_v59 = vpop.f32.mrf.mxu1  ;;  %3320 = vmatpush.bf16.msrb.mxu0 %v5024_v22  ;;  %v5016_v28 = vor.u32 %v5538_v55, %v5015_v30  ;;  %v5568_v22 = vld [vmem:[#allocation2 + $0x134] sm:$0xf0]  ;;  %v5566_v30 = vld [vmem:[#allocation2 + $0x124] sm:$0xf0]  ;;  %v5055_v4 = vld [vmem:[#allocation2 + $0x90] sm:$0xf] }
 0x359   :  { %v2521_v63 = vadd.f32 %v2520_v59, %v8006_v6  ;;  %3369 = vmatpush.bf16.msrb.mxu1 %v5088_v27  ;;  %v2866_v37 = vmax.f32 %v2470_v50, 0.0  ;;  %v5008_v59 = vor.u32 %v5536_v44, %v5007_v39  ;;  %v5136_v26 = vor.u32 %v5568_v22, %v5135_v45  ;;  %v5564_v39 = vld [vmem:[#allocation2 + $0x114] sm:$0xf0]  ;;  %v5562_v22 = vld [vmem:[#allocation2 + $0x104] sm:$0xf0] }
 0x35a   :  { %3418 = vmatpush.bf16.msrb.mxu2 %v5152_v58 }
 0x35c   :  { %v2422_v2 = vpop.f32.mrf.mxu3  ;;  %3321 = vmatpush.bf16.msrb.mxu0 %v5016_v28 }
 0x35d   :  { %v2423_v29 = vadd.f32 %v2422_v2, %v7907_v16  ;;  %3370 = vmatpush.bf16.msrb.mxu1 %v5080_v46  ;;  %v5550_v2 = vld [vmem:[#allocation2 + $0xa4] sm:$0xf0]  ;;  %v4992_v46 = vor.u32 %v5532_v33, %v4991_v51 }
 0x35e   :  { %v2569_v7 = vpop.f32.mrf.mxu2  ;;  %v2474_v35 = vpop.f32.mrf.mxu0  ;;  %3419 = vmatpush.bf16.msrb.mxu2 %v5144_v11 }
 0x35f   :  { %v8076_v36 = vadd.f32 %v2569_v7, %v2521_v63  ;;  %v2472_v48 = vadd.f32 %v2471_v21, %v2423_v29  ;;  %v5072_v21 = vor.u32 %v5552_v41, %v5071_v54  ;;  %v5063_v63 = vld [vmem:[#allocation2 + $0xa0] sm:$0xf] }
 0x360   :  { %v2523_v52 = vpop.f32.mrf.mxu1  ;;  %3322 = vmatpush.bf16.msrb.mxu0 %v5008_v59  ;;  %v5064_v62 = vor.u32 %v5550_v2, %v5063_v63 }
 0x361   :  { %v2870_v16 = vmax.f32 %v2472_v48, 0.0  ;;  %2620 = vmatmul.bf16.gmra.mxu3 %v6233_v38  ;;  %2669 = vmatmul.bf16.gmra.mxu0 %v6749_v25  ;;  %v2524_v0 = vadd.f32 %v2523_v52, %v8006_v6  ;;  %v4999_v38 = vld [vmem:[#allocation2 + $0x20] sm:$0xf]  ;;  %v5534_v25 = vld [vmem:[#allocation2 + $0x24] sm:$0xf0] }
 0x362   :  { %3371 = vmatpush.bf16.msrb.mxu1 %v5072_v21  ;;  %v5000_v58 = vor.u32 %v5534_v25, %v4999_v38  ;;  %3420 = vmatpush.bf16.msrb.mxu2 %v5136_v26  ;;  %v5119_v48 = vld [vmem:[#allocation2 + $0x110] sm:$0xf]  ;;  %v5111_v21 = vld [vmem:[#allocation2 + $0x100] sm:$0xf] }
 0x363   :  { %2718 = vmatmul.bf16.gmra.mxu1 %v8601_v9  ;;  %2767 = vmatmul.bf16.gmra.mxu2 %v8631_v57  ;;  %v8083_v50 = vpack.c.bf16 %v2870_v16, %v2866_v37  ;;  %v5127_v9 = vld [vmem:[#allocation2 + $0x120] sm:$0xf]  ;;  %v5120_v44 = vor.u32 %v5564_v39, %v5119_v48  ;;  %v5530_v37 = vld [vmem:[#allocation2 + $0x4] sm:$0xf0] }
 0x364   :  { %v2425_v8 = vpop.f32.mrf.mxu3  ;;  %3323 = vmatpush.bf16.msrb.mxu0 %v5000_v58  ;;  %v5128_v28 = vor.u32 %v5566_v30, %v5127_v9  ;;  %v5047_v16 = vld [vmem:[#allocation2 + $0x80] sm:$0xf]  ;;  %v8644_v9 = vld [vmem:[#allocation46_spill] sm:$0xff] }
 0x365   :  { %v2426_v27 = vadd.f32 %v2425_v8, %v7953_v49  ;;  %v5548_v49 = vld [vmem:[#allocation2 + $0x94] sm:$0xf0] }
 0x366   :  { %v2572_v10 = vpop.f32.mrf.mxu2  ;;  %v2476_v55 = vpop.f32.mrf.mxu0  ;;  %3372 = vmatpush.bf16.msrb.mxu1 %v5064_v62  ;;  %v5056_v11 = vor.u32 %v5548_v49, %v5055_v4  ;;  %3421 = vmatpush.bf16.msrb.mxu2 %v5128_v28 }
 0x367   :  { %v8086_v57 = vadd.f32 %v2572_v10, %v2524_v0  ;;  %v2475_v29 = vadd.f32 %v2474_v35, %v2426_v27  ;;  %v4983_v35 = vld [vmem:[#allocation2] sm:$0xf]  ;;  %v5546_v0 = vld [vmem:[#allocation2 + $0x84] sm:$0xf0]  ;;  %v5112_v27 = vor.u32 %v5562_v22, %v5111_v21 }
 0x368   :  { %v2525_v7 = vpop.f32.mrf.mxu1  ;;  %3324 = vmatpush.bf16.msrb.mxu0 %v4992_v46  ;;  %v4984_v45 = vor.u32 %v5530_v37, %v4983_v35  ;;  %v5048_v38 = vor.u32 %v5546_v0, %v5047_v16  ;;  %v8647_v37 = vld [vmem:[#allocation50_spill] sm:$0xff] }
 0x369   :  { %v2526_v52 = vadd.f32 %v2525_v7, %v8006_v6  ;;  %v2874_v10 = vmax.f32 %v2475_v29, 0.0  ;;  %v5231_v16 = vld [vmem:[#allocation2 + $0x1f0] sm:$0xf] }
 0x36a   :  { %3373 = vmatpush.bf16.msrb.mxu1 %v5056_v11  ;;  %3422 = vmatpush.bf16.msrb.mxu2 %v5120_v44 }
 0x36c   :  { %v2427_v54 = vpop.f32.mrf.mxu3  ;;  %3325 = vmatpush.bf16.msrb.mxu0 %v4984_v45 }
 0x36d   :  { %v2428_v59 = vadd.f32 %v2427_v54, %v7980_v3  ;;  %v8643_v3 = vld [vmem:[#allocation45_spill] sm:$0xff] }
 0x36e   :  { %v2574_v41 = vpop.f32.mrf.mxu2  ;;  %v2479_v8 = vpop.f32.mrf.mxu0  ;;  %3374 = vmatpush.bf16.msrb.mxu1 %v5048_v38  ;;  %3423 = vmatpush.bf16.msrb.mxu2 %v5112_v27  ;;  %v8646_v54 = vld [vmem:[#allocation49_spill] sm:$0xff] }
 0x36f   :  { %v8090_v26 = vadd.f32 %v2574_v41, %v2526_v52  ;;  %v2477_v25 = vadd.f32 %v2476_v55, %v2428_v59 }
 0x370   :  { %v2528_v63 = vpop.f32.mrf.mxu1 }
 0x371   :  { %v2878_v58 = vmax.f32 %v2477_v25, 0.0  ;;  %2625 = vmatmul.bf16.gmra.mxu3 %v8579_v20  ;;  %2674 = vmatmul.bf16.gmra.mxu0 %v8643_v3  ;;  %v2529_v2 = vadd.f32 %v2528_v63, %v8006_v6 }
 0x373   :  { %2723 = vmatmul.bf16.gmra.mxu1 %v8644_v9  ;;  %2772 = vmatmul.bf16.gmra.mxu2 %v8634_v60  ;;  %v8097_v30 = vpack.c.bf16 %v2878_v58, %v2874_v10 }
 0x374   :  { %v2430_v55 = vpop.f32.mrf.mxu3 }
 0x375   :  { %v2431_v62 = vadd.f32 %v2430_v55, %v7990_v5  ;;  %v8645_v5 = vld [vmem:[#allocation24_spill] sm:$0xff] }
 0x376   :  { %v2577_v7 = vpop.f32.mrf.mxu2  ;;  %v2481_v29 = vpop.f32.mrf.mxu0 }
 0x377   :  { %v8100_v28 = vadd.f32 %v2577_v7, %v2529_v2  ;;  %v2480_v51 = vadd.f32 %v2479_v8, %v2431_v62  ;;  %v8648_v62 = vld [vmem:[#allocation28_spill] sm:$0xff]  ;;  %v8649_v7 = vld [vmem:[#allocation53_spill] sm:$0xff] }
 0x378   :  { %v2530_v20 = vpop.f32.mrf.mxu1 }
 0x379   :  { %v2531_v33 = vadd.f32 %v2530_v20, %v8006_v6  ;;  %v2882_v39 = vmax.f32 %v2480_v51, 0.0  ;;  %v5590_v51 = vld [vmem:[#allocation2 + $0x1e4] sm:$0xf0] }
 0x37c   :  { %v2432_v4 = vpop.f32.mrf.mxu3 }
 0x37d   :  { %v2433_v46 = vadd.f32 %v2432_v4, %v7999_v61  ;;  %v5592_v61 = vld [vmem:[#allocation2 + $0x1f4] sm:$0xf0] }
 0x37e   :  { %v2579_v49 = vpop.f32.mrf.mxu2  ;;  %v2484_v60 = vpop.f32.mrf.mxu0  ;;  %v5232_v45 = vor.u32 %v5592_v61, %v5231_v16 }
 0x37f   :  { %v8104_v48 = vadd.f32 %v2579_v49, %v2531_v33  ;;  %v2482_v52 = vadd.f32 %v2481_v29, %v2433_v46  ;;  %v8650_v29 = vld [vmem:[#allocation33_spill] sm:$0xff] }
 0x380   :  { %v2533_v11 = vpop.f32.mrf.mxu1  ;;  %3465 = vmatpush.bf16.msra.mxu3 %v5232_v45 }
 0x381   :  { %v2886_v44 = vmax.f32 %v2482_v52, 0.0  ;;  %2630 = vmatmul.bf16.gmra.mxu3 %v8645_v5  ;;  %2679 = vmatmul.bf16.gmra.mxu0 %v8646_v54  ;;  %v2534_v35 = vadd.f32 %v2533_v11, %v8006_v6 }
 0x383   :  { %2728 = vmatmul.bf16.gmra.mxu1 %v8647_v37  ;;  %2777 = vmatmul.bf16.gmra.mxu2 %v8637_v1  ;;  %v8111_v59 = vpack.c.bf16 %v2886_v44, %v2882_v39 }
 0x384   :  { %v2435_v41 = vpop.f32.mrf.mxu3 }
 0x385   :  { %v2436_v0 = vadd.f32 %v2435_v41, %v8003_v15  ;;  %v8652_v41 = vld [vmem:[#allocation36_spill] sm:$0xff] }
 0x386   :  { %v2582_v21 = vpop.f32.mrf.mxu2  ;;  %v2486_v8 = vpop.f32.mrf.mxu0 }
 0x387   :  { %v8114_v22 = vadd.f32 %v2582_v21, %v2534_v35  ;;  %v2485_v38 = vadd.f32 %v2484_v60, %v2436_v0  ;;  %v5215_v0 = vld [vmem:[#allocation2 + $0x1d0] sm:$0xf]  ;;  %v5588_v21 = vld [vmem:[#allocation2 + $0x1d4] sm:$0xf0] }
 0x388   :  { %v2535_v25 = vpop.f32.mrf.mxu1 }
 0x389   :  { %v2536_v63 = vadd.f32 %v2535_v25, %v8006_v6  ;;  %v2890_v55 = vmax.f32 %v2485_v38, 0.0  ;;  %v5223_v6 = vld [vmem:[#allocation2 + $0x1e0] sm:$0xf] }
 0x38a   :  { %v5224_v33 = vor.u32 %v5590_v51, %v5223_v6  ;;  %v8654_v51 = vld [vmem:[#allocation39_spill] sm:$0xff] }
 0x38c   :  { %v2437_v27 = vpop.f32.mrf.mxu3  ;;  %3466 = vmatpush.bf16.msra.mxu3 %v5224_v33  ;;  %v5207_v33 = vld [vmem:[#allocation2 + $0x1c0] sm:$0xf] }
 0x38d   :  { %v2438_v1 = vadd.f32 %v2437_v27, %v8013_v24 }
 0x38e   :  { %v2584_v10 = vpop.f32.mrf.mxu2  ;;  %v2645_v3 = vpop.f32.mrf.mxu0 }
 0x38f   :  { %v8118_v58 = vadd.f32 %v2584_v10, %v2536_v63  ;;  %v2487_v2 = vadd.f32 %v2486_v8, %v2438_v1 }
 0x390   :  { %v2694_v9 = vpop.f32.mrf.mxu1 }
 0x391   :  { %v2894_v15 = vmax.f32 %v2487_v2, 0.0  ;;  %4973 = vmatmul.msk.bf16.vlgmr.msrb.gmra.mxu3 %vm1435_vm0, %v8648_v62  ;;  %3326 = vmatmul.bf16.vlgmr.msrb.gmra.mxu0 %v8649_v7 }
 0x393   :  { %3375 = vmatmul.bf16.vlgmr.msrb.gmra.mxu1 %v8650_v29  ;;  %3424 = vmatmul.bf16.vlgmr.msrb.gmra.mxu2 %v8027_v13  ;;  %v8125_v24 = vpack.c.bf16 %v2894_v15, %v2890_v55 }
 0x394   :  { %v2596_v20 = vpop.f32.mrf.mxu3 }
 0x395   :  { %v2597_v4 = vadd.f32 %v2596_v20, %v8016_v23  ;;  %v8651_v23 = vld [vmem:[#allocation54_spill] sm:$0xff] }
 0x396   :  { %v2743_v46 = vpop.f32.mrf.mxu2  ;;  %v2647_v49 = vpop.f32.mrf.mxu0 }
 0x397   :  { %v2646_v60 = vadd.f32 %v2645_v3, %v2597_v4  ;;  %v5586_v4 = vld [vmem:[#allocation2 + $0x1c4] sm:$0xf0] }
 0x398   :  { %v2696_v52 = vpop.f32.mrf.mxu1 }
 0x399   :  { %v2695_v11 = vadd.f32 %v2694_v9, %v2646_v60 }
 0x39b   :  { %v8128_v39 = vadd.f32 %v2743_v46, %v2695_v11 }
 0x39c   :  { %v2598_v44 = vpop.f32.mrf.mxu3 }
 0x39d   :  { %v2599_v5 = vadd.f32 %v2598_v44, %v8020_v17  ;;  %v5216_v17 = vor.u32 %v5588_v21, %v5215_v0 }
 0x39e   :  { %v2745_v54 = vpop.f32.mrf.mxu2  ;;  %v2650_v35 = vpop.f32.mrf.mxu0 }
 0x39f   :  { %v2648_v37 = vadd.f32 %v2647_v49, %v2599_v5  ;;  %3467 = vmatpush.bf16.msra.mxu3 %v5216_v17  ;;  %v8657_v17 = vld [vmem:[#allocation42_spill] sm:$0xff] }
 0x3a0   :  { %v2699_v16 = vpop.f32.mrf.mxu1 }
 0x3a1   :  { %v2697_v61 = vadd.f32 %v2696_v52, %v2648_v37  ;;  %4974 = vmatmul.msk.bf16.gmra.mxu3 %vm1435_vm0, %v8620_v12  ;;  %3331 = vmatmul.bf16.gmra.mxu0 %v8651_v23 }
 0x3a3   :  { %3380 = vmatmul.bf16.gmra.mxu1 %v8652_v41  ;;  %3429 = vmatmul.bf16.gmra.mxu2 %v8041_v34  ;;  %v8136_v45 = vadd.f32 %v2745_v54, %v2697_v61 }
 0x3a4   :  { %v2601_v8 = vpop.f32.mrf.mxu3 }
 0x3a5   :  { %v2602_v38 = vadd.f32 %v2601_v8, %v8030_v56  ;;  %v8653_v56 = vld [vmem:[#allocation55_spill] sm:$0xff]  ;;  %v8655_v8 = vld [vmem:[#allocation38_spill] sm:$0xff] }
 0x3a6   :  { %v2748_v25 = vpop.f32.mrf.mxu2  ;;  %v2652_v63 = vpop.f32.mrf.mxu0 }
 0x3a7   :  { %v2651_v27 = vadd.f32 %v2650_v35, %v2602_v38 }
 0x3a8   :  { %v2701_v1 = vpop.f32.mrf.mxu1 }
 0x3a9   :  { %v2700_v12 = vadd.f32 %v2699_v16, %v2651_v27 }
 0x3ab   :  { %v8139_v10 = vadd.f32 %v2748_v25, %v2700_v12  ;;  %v5199_v25 = vld [vmem:[#allocation2 + $0x1b0] sm:$0xf] }
 0x3ac   :  { %v2603_v3 = vpop.f32.mrf.mxu3 }
 0x3ad   :  { %v2604_v2 = vadd.f32 %v2603_v3, %v8034_v31  ;;  %v5208_v31 = vor.u32 %v5586_v4, %v5207_v33 }
 0x3ae   :  { %v2750_v9 = vpop.f32.mrf.mxu2  ;;  %v2655_v55 = vpop.f32.mrf.mxu0 }
 0x3af   :  { %v2653_v15 = vadd.f32 %v2652_v63, %v2604_v2  ;;  %3468 = vmatpush.bf16.msra.mxu3 %v5208_v31  ;;  %v5584_v63 = vld [vmem:[#allocation2 + $0x1b4] sm:$0xf0] }
 0x3b0   :  { %v2704_v62 = vpop.f32.mrf.mxu1 }
 0x3b1   :  { %v2702_v6 = vadd.f32 %v2701_v1, %v2653_v15  ;;  %4975 = vmatmul.msk.bf16.gmra.mxu3 %vm1435_vm0, %v8623_v18  ;;  %3336 = vmatmul.bf16.gmra.mxu0 %v8653_v56 }
 0x3b3   :  { %3385 = vmatmul.bf16.gmra.mxu1 %v8654_v51  ;;  %3434 = vmatmul.bf16.gmra.mxu2 %v8055_v43  ;;  %v8147_v20 = vadd.f32 %v2750_v9, %v2702_v6 }
 0x3b4   :  { %v2606_v46 = vpop.f32.mrf.mxu3 }
 0x3b5   :  { %v2607_v49 = vadd.f32 %v2606_v46, %v8044_v19  ;;  %v8656_v19 = vld [vmem:[#allocation56_spill] sm:$0xff] }
 0x3b6   :  { %v2753_v60 = vpop.f32.mrf.mxu2  ;;  %v2657_v52 = vpop.f32.mrf.mxu0 }
 0x3b7   :  { %v2656_v11 = vadd.f32 %v2655_v55, %v2607_v49  ;;  %v5543_v49 = vld [vmem:[#allocation2 + $0x74] sm:$0xf] }
 0x3b8   :  { %v2706_v44 = vpop.f32.mrf.mxu1 }
 0x3b9   :  { %v2705_v18 = vadd.f32 %v2704_v62, %v2656_v11 }
 0x3bb   :  { %v8150_v5 = vadd.f32 %v2753_v60, %v2705_v18  ;;  %v5041_v60 = vld [vmem:[#allocation2 + $0x78] sm:$0xf0] }
 0x3bc   :  { %v2608_v54 = vpop.f32.mrf.mxu3  ;;  %v5044_v18 = vor.u32 %v5543_v49, %v5041_v60 }
 0x3bd   :  { %v2609_v35 = vadd.f32 %v2608_v54, %v8048_v47  ;;  %v5200_v47 = vor.u32 %v5584_v63, %v5199_v25  ;;  %v5105_v54 = vld [vmem:[#allocation2 + $0xf8] sm:$0xf0] }
 0x3be   :  { %v2755_v37 = vpop.f32.mrf.mxu2  ;;  %v2660_v16 = vpop.f32.mrf.mxu0  ;;  %3514 = vmatpush.bf16.msra.mxu0 %v5044_v18 }
 0x3bf   :  { %v2658_v61 = vadd.f32 %v2657_v52, %v2609_v35  ;;  %3469 = vmatpush.bf16.msra.mxu3 %v5200_v47  ;;  %v5559_v52 = vld [vmem:[#allocation2 + $0xf4] sm:$0xf]  ;;  %v5033_v47 = vld [vmem:[#allocation2 + $0x68] sm:$0xf0] }
 0x3c0   :  { %v2709_v0 = vpop.f32.mrf.mxu1  ;;  %v5575_v35 = vld [vmem:[#allocation2 + $0x174] sm:$0xf] }
 0x3c1   :  { %v2707_v21 = vadd.f32 %v2706_v44, %v2658_v61  ;;  %4976 = vmatmul.msk.bf16.gmra.mxu3 %vm1435_vm0, %v8655_v8  ;;  %3341 = vmatmul.bf16.gmra.mxu0 %v8656_v19  ;;  %v8659_v44 = vld [vmem:[#allocation57_spill] sm:$0xff] }
 0x3c2   :  { %v5582_v8 = vld [vmem:[#allocation2 + $0x1a4] sm:$0xf0] }
 0x3c3   :  { %3390 = vmatmul.bf16.gmra.mxu1 %v8657_v17  ;;  %3439 = vmatmul.bf16.gmra.mxu2 %v8069_v42  ;;  %v8158_v38 = vadd.f32 %v2755_v37, %v2707_v21  ;;  %v5169_v37 = vld [vmem:[#allocation2 + $0x178] sm:$0xf0]  ;;  %v5191_v21 = vld [vmem:[#allocation2 + $0x1a0] sm:$0xf] }
 0x3c4   :  { %v2611_v27 = vpop.f32.mrf.mxu3  ;;  %v5172_v61 = vor.u32 %v5575_v35, %v5169_v37  ;;  %v5192_v63 = vor.u32 %v5582_v8, %v5191_v21  ;;  %v5571_v35 = vld [vmem:[#allocation2 + $0x154] sm:$0xf]  ;;  %v5153_v37 = vld [vmem:[#allocation2 + $0x158] sm:$0xf0] }
 0x3c5   :  { %v2612_v1 = vadd.f32 %v2611_v27, %v8058_v53  ;;  %v8658_v53 = vld [vmem:[#allocation41_spill] sm:$0xff]  ;;  %v5541_v27 = vld [vmem:[#allocation2 + $0x64] sm:$0xf] }
 0x3c6   :  { %v2758_v12 = vpop.f32.mrf.mxu2  ;;  %v2662_v3 = vpop.f32.mrf.mxu0  ;;  %3612 = vmatpush.bf16.msra.mxu2 %v5172_v61  ;;  %3470 = vmatpush.bf16.msra.mxu3 %v5192_v63  ;;  %v5156_v61 = vor.u32 %v5571_v35, %v5153_v37  ;;  %v5553_v63 = vld [vmem:[#allocation2 + $0xc4] sm:$0xf]  ;;  %v5137_v35 = vld [vmem:[#allocation2 + $0x138] sm:$0xf0]  ;;  %v8663_v37 = vld [vmem:[#allocation25_spill] sm:$0xff] }
 0x3c7   :  { %v2661_v2 = vadd.f32 %v2660_v16, %v2612_v1  ;;  %v8660_v16 = vld [vmem:[#allocation19_spill] sm:$0xff]  ;;  %v5557_v1 = vld [vmem:[#allocation2 + $0xe4] sm:$0xf] }
 0x3c8   :  { %v2711_v9 = vpop.f32.mrf.mxu1 }
 0x3c9   :  { %v2710_v55 = vadd.f32 %v2709_v0, %v2661_v2  ;;  %v5036_v2 = vor.u32 %v5541_v27, %v5033_v47 }
 0x3cb   :  { %v8161_v15 = vadd.f32 %v2758_v12, %v2710_v55  ;;  %v5573_v55 = vld [vmem:[#allocation2 + $0x164] sm:$0xf]  ;;  %3515 = vmatpush.bf16.msra.mxu0 %v5036_v2  ;;  %v5145_v2 = vld [vmem:[#allocation2 + $0x148] sm:$0xf0] }
 0x3cc   :  { %v2613_v62 = vpop.f32.mrf.mxu3 }
 0x3cd   :  { %v2614_v6 = vadd.f32 %v2613_v62, %v8062_v32  ;;  %v5108_v32 = vor.u32 %v5559_v52, %v5105_v54  ;;  %v5161_v62 = vld [vmem:[#allocation2 + $0x168] sm:$0xf0]  ;;  %v5539_v52 = vld [vmem:[#allocation2 + $0x54] sm:$0xf] }
 0x3ce   :  { %v2760_v33 = vpop.f32.mrf.mxu2  ;;  %v2665_v4 = vpop.f32.mrf.mxu0 }
 0x3cf   :  { %v2663_v46 = vadd.f32 %v2662_v3, %v2614_v6  ;;  %3563 = vmatpush.bf16.msra.mxu1 %v5108_v32 }
 0x3d0   :  { %v2714_v31 = vpop.f32.mrf.mxu1 }
 0x3d1   :  { %v2712_v11 = vadd.f32 %v2711_v9, %v2663_v46  ;;  %4977 = vmatmul.msk.bf16.gmra.mxu3 %vm1435_vm0, %v8658_v53  ;;  %3346 = vmatmul.bf16.gmra.mxu0 %v8659_v44  ;;  %v5097_v9 = vld [vmem:[#allocation2 + $0xe8] sm:$0xf0]  ;;  %v5164_v46 = vor.u32 %v5573_v55, %v5161_v62  ;;  %v5555_v53 = vld [vmem:[#allocation2 + $0xd4] sm:$0xf] }
 0x3d3   :  { %3395 = vmatmul.bf16.gmra.mxu1 %v8660_v16  ;;  %3444 = vmatmul.bf16.gmra.mxu2 %v8083_v50  ;;  %v8169_v0 = vadd.f32 %v2760_v33, %v2712_v11  ;;  %v5100_v33 = vor.u32 %v5557_v1, %v5097_v9  ;;  %v5025_v11 = vld [vmem:[#allocation2 + $0x58] sm:$0xf0] }
 0x3d4   :  { %v2616_v25 = vpop.f32.mrf.mxu3  ;;  %3613 = vmatpush.bf16.msra.mxu2 %v5164_v46  ;;  %v5028_v54 = vor.u32 %v5539_v52, %v5025_v11  ;;  %v5535_v46 = vld [vmem:[#allocation2 + $0x34] sm:$0xf] }
 0x3d5   :  { %v2617_v12 = vadd.f32 %v2616_v25, %v8072_v14  ;;  %3564 = vmatpush.bf16.msra.mxu1 %v5100_v33  ;;  %v5089_v14 = vld [vmem:[#allocation2 + $0xd8] sm:$0xf0]  ;;  %v5017_v25 = vld [vmem:[#allocation2 + $0x48] sm:$0xf0]  ;;  %v5551_v52 = vld [vmem:[#allocation2 + $0xb4] sm:$0xf] }
 0x3d6   :  { %v2763_v3 = vpop.f32.mrf.mxu2  ;;  %v2667_v6 = vpop.f32.mrf.mxu0  ;;  %v5092_v32 = vor.u32 %v5555_v53, %v5089_v14  ;;  %3516 = vmatpush.bf16.msra.mxu0 %v5028_v54  ;;  %v8661_v53 = vld [vmem:[#allocation44_spill] sm:$0xff]  ;;  %v5073_v54 = vld [vmem:[#allocation2 + $0xb8] sm:$0xf0]  ;;  %v5567_v14 = vld [vmem:[#allocation2 + $0x134] sm:$0xf] }
 0x3d7   :  { %v2666_v49 = vadd.f32 %v2665_v4, %v2617_v12  ;;  %v5537_v4 = vld [vmem:[#allocation2 + $0x44] sm:$0xf] }
 0x3d8   :  { %v2716_v60 = vpop.f32.mrf.mxu1  ;;  %3614 = vmatpush.bf16.msra.mxu2 %v5156_v61  ;;  %v5020_v1 = vor.u32 %v5537_v4, %v5017_v25  ;;  %v5569_v12 = vld [vmem:[#allocation2 + $0x144] sm:$0xf] }
 0x3d9   :  { %v2715_v18 = vadd.f32 %v2714_v31, %v2666_v49  ;;  %3565 = vmatpush.bf16.msra.mxu1 %v5092_v32  ;;  %v5081_v31 = vld [vmem:[#allocation2 + $0xc8] sm:$0xf0]  ;;  %v5148_v62 = vor.u32 %v5569_v12, %v5145_v2  ;;  %v5009_v49 = vld [vmem:[#allocation2 + $0x38] sm:$0xf0]  ;;  %v5140_v32 = vor.u32 %v5567_v14, %v5137_v35 }
 0x3da   :  { %v5084_v55 = vor.u32 %v5553_v63, %v5081_v31  ;;  %3517 = vmatpush.bf16.msra.mxu0 %v5020_v1  ;;  %v5533_v63 = vld [vmem:[#allocation2 + $0x24] sm:$0xf] }
 0x3db   :  { %v8172_v21 = vadd.f32 %v2763_v3, %v2715_v18  ;;  %v5012_v18 = vor.u32 %v5535_v46, %v5009_v49  ;;  %v5549_v1 = vld [vmem:[#allocation2 + $0xa4] sm:$0xf] }
 0x3dc   :  { %v2618_v8 = vpop.f32.mrf.mxu3  ;;  %3615 = vmatpush.bf16.msra.mxu2 %v5148_v62  ;;  %v5565_v62 = vld [vmem:[#allocation2 + $0x124] sm:$0xf] }
 0x3dd   :  { %v2619_v27 = vadd.f32 %v2618_v8, %v8076_v36  ;;  %3566 = vmatpush.bf16.msra.mxu1 %v5084_v55  ;;  %v8662_v36 = vld [vmem:[#allocation20_spill] sm:$0xff]  ;;  %v5183_v8 = vld [vmem:[#allocation2 + $0x190] sm:$0xf]  ;;  %v5065_v55 = vld [vmem:[#allocation2 + $0xa8] sm:$0xf0] }
 0x3de   :  { %v2765_v47 = vpop.f32.mrf.mxu2  ;;  %v2670_v9 = vpop.f32.mrf.mxu0  ;;  %3518 = vmatpush.bf16.msra.mxu0 %v5012_v18  ;;  %v4993_v18 = vld [vmem:[#allocation2 + $0x18] sm:$0xf0] }
 0x3df   :  { %v2668_v33 = vadd.f32 %v2667_v6, %v2619_v27  ;;  %v5076_v6 = vor.u32 %v5551_v52, %v5073_v54  ;;  %v5001_v27 = vld [vmem:[#allocation2 + $0x28] sm:$0xf0]  ;;  %v5547_v54 = vld [vmem:[#allocation2 + $0x94] sm:$0xf] }
 0x3e0   :  { %v2719_v3 = vpop.f32.mrf.mxu1  ;;  %3616 = vmatpush.bf16.msra.mxu2 %v5140_v32  ;;  %v5004_v2 = vor.u32 %v5533_v63, %v5001_v27  ;;  %v5121_v32 = vld [vmem:[#allocation2 + $0x118] sm:$0xf0]  ;;  %v4985_v63 = vld [vmem:[#allocation2 + $0x8] sm:$0xf0]  ;;  %v5545_v27 = vld [vmem:[#allocation2 + $0x84] sm:$0xf] }
 0x3e1   :  { %v2717_v11 = vadd.f32 %v2716_v60, %v2668_v33  ;;  %4978 = vmatmul.msk.bf16.gmra.mxu3 %vm1435_vm0, %v8661_v53  ;;  %3351 = vmatmul.bf16.gmra.mxu0 %v8662_v36  ;;  %v5580_v60 = vld [vmem:[#allocation2 + $0x194] sm:$0xf0]  ;;  %v5129_v33 = vld [vmem:[#allocation2 + $0x128] sm:$0xf0]  ;;  %v5531_v53 = vld [vmem:[#allocation2 + $0x14] sm:$0xf] }
 0x3e2   :  { %3567 = vmatpush.bf16.msra.mxu1 %v5076_v6  ;;  %v5184_v25 = vor.u32 %v5580_v60, %v5183_v8  ;;  %v5132_v49 = vor.u32 %v5565_v62, %v5129_v33  ;;  %3519 = vmatpush.bf16.msra.mxu0 %v5004_v2  ;;  %v4996_v35 = vor.u32 %v5531_v53, %v4993_v18  ;;  %v5563_v6 = vld [vmem:[#allocation2 + $0x114] sm:$0xf]  ;;  %v8664_v18 = vld [vmem:[#allocation48_spill] sm:$0xff] }
 0x3e3   :  { %3400 = vmatmul.bf16.gmra.mxu1 %v8663_v37  ;;  %3449 = vmatmul.bf16.gmra.mxu2 %v8097_v30  ;;  %v8180_v61 = vadd.f32 %v2765_v47, %v2717_v11  ;;  %v5068_v47 = vor.u32 %v5549_v1, %v5065_v55  ;;  %v5124_v60 = vor.u32 %v5563_v6, %v5121_v32  ;;  %v5561_v55 = vld [vmem:[#allocation2 + $0x104] sm:$0xf] }
 0x3e4   :  { %v2621_v4 = vpop.f32.mrf.mxu3  ;;  %3471 = vmatpush.bf16.msra.mxu3 %v5184_v25  ;;  %3617 = vmatpush.bf16.msra.mxu2 %v5132_v49 }
 0x3e5   :  { %v2622_v31 = vadd.f32 %v2621_v4, %v8086_v57  ;;  %v5057_v57 = vld [vmem:[#allocation2 + $0x98] sm:$0xf0] }
 0x3e6   :  { %v2768_v12 = vpop.f32.mrf.mxu2  ;;  %v2672_v46 = vpop.f32.mrf.mxu0  ;;  %3568 = vmatpush.bf16.msra.mxu1 %v5068_v47  ;;  %v5060_v8 = vor.u32 %v5547_v54, %v5057_v57  ;;  %3520 = vmatpush.bf16.msra.mxu0 %v4996_v35  ;;  %v5113_v47 = vld [vmem:[#allocation2 + $0x108] sm:$0xf0]  ;;  %v5175_v35 = vld [vmem:[#allocation2 + $0x180] sm:$0xf]  ;;  %v5578_v57 = vld [vmem:[#allocation2 + $0x184] sm:$0xf0] }
 0x3e7   :  { %v2671_v52 = vadd.f32 %v2670_v9, %v2622_v31  ;;  %v5529_v9 = vld [vmem:[#allocation2 + $0x4] sm:$0xf]  ;;  %v8665_v54 = vld [vmem:[#allocation21_spill] sm:$0xff]  ;;  %v5176_v6 = vor.u32 %v5578_v57, %v5175_v35 }
 0x3e8   :  { %v2721_v11 = vpop.f32.mrf.mxu1  ;;  %3618 = vmatpush.bf16.msra.mxu2 %v5124_v60  ;;  %v4988_v2 = vor.u32 %v5529_v9, %v4985_v63 }
 0x3e9   :  { %v2720_v14 = vadd.f32 %v2719_v3, %v2671_v52  ;;  %v5049_v3 = vld [vmem:[#allocation2 + $0x88] sm:$0xf0]  ;;  %3472 = vmatpush.bf16.msra.mxu3 %v5176_v6 }
 0x3ea   :  { %3569 = vmatpush.bf16.msra.mxu1 %v5060_v8  ;;  %v5052_v33 = vor.u32 %v5545_v27, %v5049_v3  ;;  %3521 = vmatpush.bf16.msra.mxu0 %v4988_v2 }
 0x3eb   :  { %v8183_v4 = vadd.f32 %v2768_v12, %v2720_v14  ;;  %v5116_v12 = vor.u32 %v5561_v55, %v5113_v47  ;;  %v8666_v14 = vld [vmem:[#allocation58_spill] sm:$0xff]  ;;  %v8668_v47 = vld [vmem:[#allocation27_spill] sm:$0xff] }
 0x3ec   :  { %v2623_v25 = vpop.f32.mrf.mxu3 }
 0x3ed   :  { %v2624_v1 = vadd.f32 %v2623_v25, %v8090_v26  ;;  %3619 = vmatpush.bf16.msra.mxu2 %v5116_v12 }
 0x3ee   :  { %v2770_v31 = vpop.f32.mrf.mxu2  ;;  %v2675_v62 = vpop.f32.mrf.mxu0  ;;  %3570 = vmatpush.bf16.msra.mxu1 %v5052_v33 }
 0x3ef   :  { %v2673_v49 = vadd.f32 %v2672_v46, %v2624_v1 }
 0x3f0   :  { %v2724_v52 = vpop.f32.mrf.mxu1 }
 0x3f1   :  { %v2722_v53 = vadd.f32 %v2721_v11, %v2673_v49  ;;  %4979 = vmatmul.msk.bf16.gmra.mxu3 %vm1435_vm0, %v8664_v18  ;;  %3356 = vmatmul.bf16.gmra.mxu0 %v8665_v54  ;;  %v5591_v49 = vld [vmem:[#allocation2 + $0x1f4] sm:$0xf] }
 0x3f3   :  { %3405 = vmatmul.bf16.gmra.mxu1 %v8666_v14  ;;  %3454 = vmatmul.bf16.gmra.mxu2 %v8111_v59  ;;  %v8191_v26 = vadd.f32 %v2770_v31, %v2722_v53 }
 0x3f4   :  { %v2626_v46 = vpop.f32.mrf.mxu3 }
 0x3f5   :  { %v2627_v32 = vadd.f32 %v2626_v46, %v8100_v28  ;;  %v8667_v28 = vld [vmem:[#allocation23_spill] sm:$0xff] }
 0x3f6   :  { %v2773_v8 = vpop.f32.mrf.mxu2  ;;  %v2677_v11 = vpop.f32.mrf.mxu0 }
 0x3f7   :  { %v2676_v60 = vadd.f32 %v2675_v62, %v2627_v32 }
 0x3f8   :  { %v2726_v25 = vpop.f32.mrf.mxu1 }
 0x3f9   :  { %v2725_v9 = vadd.f32 %v2724_v52, %v2676_v60  ;;  %v5233_v52 = vld [vmem:[#allocation2 + $0x1f8] sm:$0xf0] }
 0x3fb   :  { %v8194_v63 = vadd.f32 %v2773_v8, %v2725_v9 }
 0x3fc   :  { %v2628_v27 = vpop.f32.mrf.mxu3 }
 0x3fd   :  { %v2629_v1 = vadd.f32 %v2628_v27, %v8104_v48  ;;  %v5236_v48 = vor.u32 %v5591_v49, %v5233_v52 }
 0x3fe   :  { %v2775_v31 = vpop.f32.mrf.mxu2  ;;  %v2680_v2 = vpop.f32.mrf.mxu0 }
 0x3ff   :  { %v2678_v3 = vadd.f32 %v2677_v11, %v2629_v1  ;;  %3661 = vmatpush.bf16.msrb.mxu3 %v5236_v48 }
 0x400   :  { %v2729_v55 = vpop.f32.mrf.mxu1 }
 0x401   :  { %v2727_v33 = vadd.f32 %v2726_v25, %v2678_v3  ;;  %4980 = vmatmul.msk.bf16.gmra.mxu3 %vm1435_vm0, %v8638_v40  ;;  %3361 = vmatmul.bf16.gmra.mxu0 %v8667_v28  ;;  %v8208_v40 = vld [vmem:[%s8431_s4] sm:$0x3] }
 0x402   :  { %v8213_v8 = vperm.slane %v8208_v40, 0 }
 0x403   :  { %3410 = vmatmul.bf16.gmra.mxu1 %v8668_v47  ;;  %3459 = vmatmul.bf16.gmra.mxu2 %v8125_v24  ;;  %v8202_v62 = vadd.f32 %v2775_v31, %v2727_v33  ;;  %v5225_v33 = vld [vmem:[#allocation2 + $0x1e8] sm:$0xf0] }
 0x404   :  { %v2631_v12 = vpop.f32.mrf.mxu3 }
 0x405   :  { %v2632_v53 = vadd.f32 %v2631_v12, %v8114_v22 }
 0x406   :  { %v2778_v18 = vpop.f32.mrf.mxu2  ;;  %v2682_v35 = vpop.f32.mrf.mxu0 }
 0x407   :  { %v2681_v57 = vadd.f32 %v2680_v2, %v2632_v53 }
 0x408   :  { %v2731_v46 = vpop.f32.mrf.mxu1 }
 0x409   :  { %v2730_v6 = vadd.f32 %v2729_v55, %v2681_v57  ;;  %v5589_v55 = vld [vmem:[#allocation2 + $0x1e4] sm:$0xf] }
 0x40b   :  { %v8210_v32 = vadd.f32 %v2778_v18, %v2730_v6 }
 0x40c   :  { %v2633_v11 = vpop.f32.mrf.mxu3 }
 0x40d   :  { %v2634_v60 = vadd.f32 %v2633_v11, %v8118_v58  ;;  %v5228_v58 = vor.u32 %v5589_v55, %v5225_v33 }
 0x40e   :  { %v2780_v22 = vpop.f32.mrf.mxu2  ;;  %v3327_v25 = vpop.f32.mrf.mxu0 }
 0x40f   :  { %v2683_v9 = vadd.f32 %v2682_v35, %v2634_v60  ;;  %v3328_v27 = vadd.f32 %v3327_v25, %v8213_v8  ;;  %3662 = vmatpush.bf16.msrb.mxu3 %v5228_v58 }
 0x410   :  { %v3376_v1 = vpop.f32.mrf.mxu1 }
 0x411   :  { %v2732_v31 = vadd.f32 %v2731_v46, %v2683_v9  ;;  %v3377_v2 = vadd.f32 %v3376_v1, %v3328_v27  ;;  %3522 = vmatmul.bf16.vlgmr.msra.gmra.mxu0 %v8649_v7 }
 0x413   :  { %3571 = vmatmul.bf16.vlgmr.msra.gmra.mxu1 %v8650_v29  ;;  %3620 = vmatmul.bf16.vlgmr.msra.gmra.mxu2 %v8027_v13  ;;  %v8220_v3 = vadd.f32 %v2780_v22, %v2732_v31 }
 0x414   :  { %v2792_v49 = vpop.f32.mrf.mxu3 }
 0x415   :  { %v2793_v7 = vadd.f32 %v2792_v49, %v8128_v39  ;;  %v5587_v39 = vld [vmem:[#allocation2 + $0x1d4] sm:$0xf] }
 0x416   :  { %v3425_v52 = vpop.f32.mrf.mxu2  ;;  %v3329_v48 = vpop.f32.mrf.mxu0 }
 0x417   :  { %v8222_v12 = vadd.f32 %v3425_v52, %v3377_v2  ;;  %v3330_v53 = vadd.f32 %v3329_v48, %v8213_v8  ;;  %v2835_v11 = vmax.f32 %v2793_v7, 0.0 }
 0x418   :  { %v3378_v18 = vpop.f32.mrf.mxu1 }
 0x419   :  { %v3379_v35 = vadd.f32 %v3378_v18, %v3330_v53 }
 0x41c   :  { %v2794_v29 = vpop.f32.mrf.mxu3 }
 0x41d   :  { %v2795_v13 = vadd.f32 %v2794_v29, %v8136_v45  ;;  %v5217_v45 = vld [vmem:[#allocation2 + $0x1d8] sm:$0xf0] }
 0x41e   :  { %v3427_v57 = vpop.f32.mrf.mxu2  ;;  %v3332_v6 = vpop.f32.mrf.mxu0  ;;  %v5220_v31 = vor.u32 %v5587_v39, %v5217_v45 }
 0x41f   :  { %v8227_v46 = vadd.f32 %v3427_v57, %v3379_v35  ;;  %v2839_v60 = vmax.f32 %v2795_v13, 0.0  ;;  %v3333_v22 = vadd.f32 %v3332_v6, %v8213_v8 }
 0x420   :  { %v3381_v25 = vpop.f32.mrf.mxu1  ;;  %3663 = vmatpush.bf16.msrb.mxu3 %v5220_v31 }
 0x421   :  { %v8230_v9 = vpack.c.bf16 %v2839_v60, %v2835_v11  ;;  %v3382_v27 = vadd.f32 %v3381_v25, %v3333_v22  ;;  %3527 = vmatmul.bf16.gmra.mxu0 %v8651_v23 }
 0x423   :  { %3576 = vmatmul.bf16.gmra.mxu1 %v8652_v41  ;;  %3625 = vmatmul.bf16.gmra.mxu2 %v8041_v34 }
 0x424   :  { %3473 = vmatmul.bf16.vlgmr.msra.gmra.mxu3 %v8230_v9  ;;  %v2797_v1 = vpop.f32.mrf.mxu3 }
 0x425   :  { %v2798_v23 = vadd.f32 %v2797_v1, %v8139_v10  ;;  %v5585_v10 = vld [vmem:[#allocation2 + $0x1c4] sm:$0xf] }
 0x426   :  { %v3430_v2 = vpop.f32.mrf.mxu2  ;;  %v3334_v33 = vpop.f32.mrf.mxu0 }
 0x427   :  { %v8236_v55 = vadd.f32 %v3430_v2, %v3382_v27  ;;  %v3335_v49 = vadd.f32 %v3334_v33, %v8213_v8  ;;  %v2843_v35 = vmax.f32 %v2798_v23, 0.0 }
 0x428   :  { %v3383_v58 = vpop.f32.mrf.mxu1 }
 0x429   :  { %v3384_v52 = vadd.f32 %v3383_v58, %v3335_v49 }
 0x42c   :  { %v2799_v41 = vpop.f32.mrf.mxu3 }
 0x42d   :  { %v2800_v34 = vadd.f32 %v2799_v41, %v8147_v20  ;;  %v5209_v20 = vld [vmem:[#allocation2 + $0x1c8] sm:$0xf0] }
 0x42e   :  { %v3432_v48 = vpop.f32.mrf.mxu2  ;;  %v3337_v18 = vpop.f32.mrf.mxu0  ;;  %v5212_v60 = vor.u32 %v5585_v10, %v5209_v20 }
 0x42f   :  { %v8241_v53 = vadd.f32 %v3432_v48, %v3384_v52  ;;  %v2847_v7 = vmax.f32 %v2800_v34, 0.0  ;;  %v3338_v29 = vadd.f32 %v3337_v18, %v8213_v8 }
 0x430   :  { %v3386_v13 = vpop.f32.mrf.mxu1  ;;  %3664 = vmatpush.bf16.msrb.mxu3 %v5212_v60 }
 0x431   :  { %v3387_v57 = vadd.f32 %v3386_v13, %v3338_v29  ;;  %3532 = vmatmul.bf16.gmra.mxu0 %v8653_v56  ;;  %v8245_v6 = vpack.c.bf16 %v2847_v7, %v2843_v35 }
 0x433   :  { %3581 = vmatmul.bf16.gmra.mxu1 %v8654_v51  ;;  %3630 = vmatmul.bf16.gmra.mxu2 %v8055_v43 }
 0x434   :  { %3478 = vmatmul.bf16.gmra.mxu3 %v8245_v6  ;;  %v2802_v11 = vpop.f32.mrf.mxu3 }
 0x435   :  { %v2803_v1 = vadd.f32 %v2802_v11, %v8150_v5  ;;  %v5583_v5 = vld [vmem:[#allocation2 + $0x1b4] sm:$0xf] }
 0x436   :  { %v3435_v22 = vpop.f32.mrf.mxu2  ;;  %v3339_v27 = vpop.f32.mrf.mxu0 }
 0x437   :  { %v8250_v25 = vadd.f32 %v3435_v22, %v3387_v57  ;;  %v3340_v39 = vadd.f32 %v3339_v27, %v8213_v8  ;;  %v2851_v49 = vmax.f32 %v2803_v1, 0.0 }
 0x438   :  { %v3388_v56 = vpop.f32.mrf.mxu1 }
 0x439   :  { %v3389_v45 = vadd.f32 %v3388_v56, %v3340_v39  ;;  %v5581_v39 = vld [vmem:[#allocation2 + $0x1a4] sm:$0xf] }
 0x43c   :  { %v2804_v51 = vpop.f32.mrf.mxu3 }
 0x43d   :  { %v2805_v43 = vadd.f32 %v2804_v51, %v8158_v38  ;;  %v5201_v38 = vld [vmem:[#allocation2 + $0x1b8] sm:$0xf0] }
 0x43e   :  { %v3437_v31 = vpop.f32.mrf.mxu2  ;;  %v3342_v33 = vpop.f32.mrf.mxu0  ;;  %v5204_v18 = vor.u32 %v5583_v5, %v5201_v38 }
 0x43f   :  { %v8255_v2 = vadd.f32 %v3437_v31, %v3389_v45  ;;  %v2855_v58 = vmax.f32 %v2805_v43, 0.0  ;;  %v3343_v52 = vadd.f32 %v3342_v33, %v8213_v8 }
 0x440   :  { %v3391_v23 = vpop.f32.mrf.mxu1  ;;  %3665 = vmatpush.bf16.msrb.mxu3 %v5204_v18  ;;  %v5598_v18 = vld [vmem:[#allocation5 + $0x28] sm:$0xff] }
 0x441   :  { %v3392_v41 = vadd.f32 %v3391_v23, %v3343_v52  ;;  %3537 = vmatmul.bf16.gmra.mxu0 %v8656_v19  ;;  %v8259_v34 = vpack.c.bf16 %v2855_v58, %v2851_v49 }
 0x443   :  { %3586 = vmatmul.bf16.gmra.mxu1 %v8657_v17  ;;  %3635 = vmatmul.bf16.gmra.mxu2 %v8069_v42 }
 0x444   :  { %3483 = vmatmul.bf16.gmra.mxu3 %v8259_v34  ;;  %v2807_v48 = vpop.f32.mrf.mxu3 }
 0x445   :  { %v2808_v10 = vadd.f32 %v2807_v48, %v8161_v15  ;;  %v5193_v15 = vld [vmem:[#allocation2 + $0x1a8] sm:$0xf0] }
 0x446   :  { %v3440_v35 = vpop.f32.mrf.mxu2  ;;  %v3344_v29 = vpop.f32.mrf.mxu0  ;;  %v5196_v45 = vor.u32 %v5581_v39, %v5193_v15  ;;  %v5607_v39 = vld [vmem:[#allocation5 + $0x70] sm:$0xff] }
 0x447   :  { %v8264_v7 = vadd.f32 %v3440_v35, %v3392_v41  ;;  %v3345_v13 = vadd.f32 %v3344_v29, %v8213_v8  ;;  %v2859_v60 = vmax.f32 %v2808_v10, 0.0  ;;  %v5597_v29 = vld [vmem:[#allocation5 + $0x20] sm:$0xff]  ;;  %v5594_v10 = vld [vmem:[#allocation5 + $0x8] sm:$0xff] }
 0x448   :  { %v3393_v19 = vpop.f32.mrf.mxu1  ;;  %3666 = vmatpush.bf16.msrb.mxu3 %v5196_v45 }
 0x449   :  { %v3394_v57 = vadd.f32 %v3393_v19, %v3345_v13  ;;  %v5596_v13 = vld [vmem:[#allocation5 + $0x18] sm:$0xff] }
 0x44c   :  { %v2809_v17 = vpop.f32.mrf.mxu3 }
 0x44d   :  { %v2810_v42 = vadd.f32 %v2809_v17, %v8169_v0 }
 0x44e   :  { %v3442_v20 = vpop.f32.mrf.mxu2  ;;  %v8303_v17 = vpop.f32.mrf.mxu0 }
 0x44f   :  { %v8269_v11 = vadd.f32 %v3442_v20, %v3394_v57  ;;  %v2863_v22 = vmax.f32 %v2810_v42, 0.0  ;;  %v5593_v20 = vld [vmem:[#allocation5] sm:$0xff] }
 0x451   :  { %3542 = vmatmul.bf16.gmra.mxu0 %v8659_v44  ;;  %v8272_v27 = vpack.c.bf16 %v2863_v22, %v2859_v60  ;;  %v5608_v60 = vld [vmem:[#allocation5 + $0x78] sm:$0xff] }
 0x452   :  { %3939 = vmatpush.bf16.msrb.mxu1 %v5608_v60  ;;  %v5603_v60 = vld [vmem:[#allocation5 + $0x50] sm:$0xff] }
 0x453   :  { %3591 = vmatmul.bf16.gmra.mxu1 %v8660_v16  ;;  %3640 = vmatmul.bf16.gmra.mxu2 %v8083_v50  ;;  %v5579_v50 = vld [vmem:[#allocation2 + $0x194] sm:$0xf]  ;;  %v5185_v16 = vld [vmem:[#allocation2 + $0x198] sm:$0xf0] }
 0x454   :  { %3488 = vmatmul.bf16.gmra.mxu3 %v8272_v27  ;;  %v2812_v56 = vpop.f32.mrf.mxu3  ;;  %v5188_v49 = vor.u32 %v5579_v50, %v5185_v16 }
 0x455   :  { %v2813_v0 = vadd.f32 %v2812_v56, %v8172_v21 }
 0x456   :  { %3667 = vmatpush.bf16.msrb.mxu3 %v5188_v49  ;;  %v8308_v22 = vpop.f32.mrf.mxu0  ;;  %3940 = vmatpush.bf16.msrb.mxu1 %v5607_v39  ;;  %v3445_v50 = vpop.f32.mrf.mxu2 }
 0x457   :  { %v2867_v43 = vmax.f32 %v2813_v0, 0.0 }
 0x45c   :  { %v2814_v1 = vpop.f32.mrf.mxu3 }
 0x45d   :  { %v2815_v51 = vadd.f32 %v2814_v1, %v8180_v61 }
 0x45f   :  { %v2871_v44 = vmax.f32 %v2815_v51, 0.0 }
 0x461   :  { %3547 = vmatmul.bf16.gmra.mxu0 %v8662_v36  ;;  %v8280_v31 = vpack.c.bf16 %v2871_v44, %v2867_v43  ;;  %v3396_v43 = vpop.f32.mrf.mxu1 }
 0x463   :  { %3596 = vmatmul.bf16.gmra.mxu1 %v8663_v37  ;;  %3645 = vmatmul.bf16.gmra.mxu2 %v8097_v30  ;;  %v5577_v30 = vld [vmem:[#allocation2 + $0x184] sm:$0xf]  ;;  %v5177_v37 = vld [vmem:[#allocation2 + $0x188] sm:$0xf0] }
 0x464   :  { %3493 = vmatmul.bf16.gmra.mxu3 %v8280_v31  ;;  %v2817_v33 = vpop.f32.mrf.mxu3  ;;  %v5180_v5 = vor.u32 %v5577_v30, %v5177_v37  ;;  %v5605_v37 = vld [vmem:[#allocation5 + $0x60] sm:$0xff] }
 0x465   :  { %v2818_v21 = vadd.f32 %v2817_v33, %v8183_v4  ;;  %v5600_v4 = vld [vmem:[#allocation5 + $0x38] sm:$0xff] }
 0x466   :  { %3668 = vmatpush.bf16.msrb.mxu3 %v5180_v5  ;;  %3890 = vmatpush.bf16.msrb.mxu0 %v5600_v4 }
 0x467   :  { %v2875_v52 = vmax.f32 %v2818_v21, 0.0 }
 0x469   :  { %v3398_v49 = vpop.f32.mrf.mxu1 }
 0x46c   :  { %v2819_v61 = vpop.f32.mrf.mxu3 }
 0x46d   :  { %v2820_v58 = vadd.f32 %v2819_v61, %v8191_v26  ;;  %v5599_v26 = vld [vmem:[#allocation5 + $0x30] sm:$0xff] }
 0x46e   :  { %3891 = vmatpush.bf16.msrb.mxu0 %v5599_v26 }
 0x46f   :  { %v2879_v36 = vmax.f32 %v2820_v58, 0.0 }
 0x471   :  { %3552 = vmatmul.bf16.gmra.mxu0 %v8665_v54  ;;  %v8288_v23 = vpack.c.bf16 %v2879_v36, %v2875_v52 }
 0x472   :  { %3892 = vmatpush.bf16.msrb.mxu0 %v5598_v18 }
 0x473   :  { %3601 = vmatmul.bf16.gmra.mxu1 %v8666_v14  ;;  %3650 = vmatmul.bf16.gmra.mxu2 %v8111_v59 }
 0x474   :  { %3498 = vmatmul.bf16.gmra.mxu3 %v8288_v23  ;;  %v2822_v41 = vpop.f32.mrf.mxu3 }
 0x475   :  { %v2823_v38 = vadd.f32 %v2822_v41, %v8194_v63  ;;  %v3401_v41 = vpop.f32.mrf.mxu1 }
 0x476   :  { %3893 = vmatpush.bf16.msrb.mxu0 %v5597_v29  ;;  %v5604_v29 = vld [vmem:[#allocation5 + $0x58] sm:$0xff] }
 0x477   :  { %v2883_v14 = vmax.f32 %v2823_v38, 0.0 }
 0x47a   :  { %3894 = vmatpush.bf16.msrb.mxu0 %v5596_v13 }
 0x47c   :  { %v2824_v54 = vpop.f32.mrf.mxu3 }
 0x47d   :  { %v2825_v48 = vadd.f32 %v2824_v54, %v8202_v62  ;;  %v5595_v62 = vld [vmem:[#allocation5 + $0x10] sm:$0xff]  ;;  %v3403_v38 = vpop.f32.mrf.mxu1 }
 0x47e   :  { %3895 = vmatpush.bf16.msrb.mxu0 %v5595_v62 }
 0x47f   :  { %v2887_v35 = vmax.f32 %v2825_v48, 0.0 }
 0x481   :  { %3557 = vmatmul.bf16.gmra.mxu0 %v8667_v28  ;;  %v8296_v59 = vpack.c.bf16 %v2887_v35, %v2883_v14 }
 0x482   :  { %3896 = vmatpush.bf16.msrb.mxu0 %v5594_v10  ;;  %v3348_v10 = vadd.f32 %v8303_v17, %v8213_v8 }
 0x483   :  { %3606 = vmatmul.bf16.gmra.mxu1 %v8668_v47  ;;  %3655 = vmatmul.bf16.gmra.mxu2 %v8125_v24 }
 0x484   :  { %3503 = vmatmul.bf16.gmra.mxu3 %v8296_v59  ;;  %v2827_v63 = vpop.f32.mrf.mxu3 }
 0x485   :  { %v2828_v19 = vadd.f32 %v2827_v63, %v8210_v32  ;;  %v8310_v32 = vpop.f32.mrf.mxu0  ;;  %v3406_v63 = vpop.f32.mrf.mxu1 }
 0x486   :  { %3897 = vmatpush.bf16.msrb.mxu0 %v5593_v20 }
 0x487   :  { %v2891_v42 = vmax.f32 %v2828_v19, 0.0 }
 0x48c   :  { %v2829_v57 = vpop.f32.mrf.mxu3 }
 0x48d   :  { %v2830_v28 = vadd.f32 %v2829_v57, %v8220_v3  ;;  %v8313_v15 = vpop.f32.mrf.mxu0 }
 0x48f   :  { %v2895_v47 = vmax.f32 %v2830_v28, 0.0 }
 0x491   :  { %v8305_v24 = vpack.c.bf16 %v2895_v47, %v2891_v42  ;;  %v3408_v42 = vpop.f32.mrf.mxu1 }
 0x494   :  { %3508 = vmatmul.bf16.gmra.mxu3 %v8305_v24 }
 0x495   :  { %v8318_v33 = vpop.f32.mrf.mxu0 }
 0x49d   :  { %v8322_v58 = vpop.f32.mrf.mxu0 }
 0x4a4   :  { %3669 = vmatmul.bf16.vlgmr.msrb.gmra.mxu3 %v8230_v9  ;;  %v5606_v9 = vld [vmem:[#allocation5 + $0x68] sm:$0xff] }
 0x4a5   :  { %3941 = vmatpush.bf16.msrb.mxu1 %v5606_v9  ;;  %v8325_v4 = vpop.f32.mrf.mxu0 }
 0x4a7   :  { %v3474_v3 = vpop.f32.mrf.mxu3 }
 0x4a8   :  { %v3475_v56 = vadd.f32 %v3474_v3, %v8222_v12  ;;  %v3447_v12 = vpop.f32.mrf.mxu2  ;;  %v3397_v3 = vadd.f32 %v3396_v43, %v3348_v10  ;;  %v5602_v43 = vld [vmem:[#allocation5 + $0x48] sm:$0xff] }
 0x4a9   :  { %3942 = vmatpush.bf16.msrb.mxu1 %v5605_v37 }
 0x4aa   :  { %v3710_v1 = vmax.f32 %v3475_v56, 0.0 }
 0x4ad   :  { %v8330_v14 = vpop.f32.mrf.mxu0  ;;  %3943 = vmatpush.bf16.msrb.mxu1 %v5604_v29 }
 0x4af   :  { %v3476_v45 = vpop.f32.mrf.mxu3 }
 0x4b0   :  { %v3477_v0 = vadd.f32 %v3476_v45, %v8227_v46  ;;  %v3450_v5 = vpop.f32.mrf.mxu2 }
 0x4b1   :  { %3944 = vmatpush.bf16.msrb.mxu1 %v5603_v60 }
 0x4b2   :  { %v3712_v51 = vmax.f32 %v3477_v0, 0.0 }
 0x4b4   :  { %v3742_v44 = vpack.c.bf16 %v3712_v51, %v3710_v1  ;;  %3674 = vmatmul.bf16.gmra.mxu3 %v8245_v6  ;;  %v3411_v1 = vpop.f32.mrf.mxu1 }
 0x4b5   :  { %v8333_v19 = vpop.f32.mrf.mxu0  ;;  %3945 = vmatpush.bf16.msrb.mxu1 %v5602_v43 }
 0x4b6   :  { %3898 = vmatmul.bf16.vlgmr.msrb.gmra.mxu0 %v3742_v44 }
 0x4b7   :  { %v3479_v16 = vpop.f32.mrf.mxu3 }
 0x4b8   :  { %v3480_v21 = vadd.f32 %v3479_v16, %v8236_v55  ;;  %v3452_v18 = vpop.f32.mrf.mxu2 }
 0x4ba   :  { %v3714_v52 = vmax.f32 %v3480_v21, 0.0 }
 0x4bd   :  { %v8341_v39 = vpop.f32.mrf.mxu0 }
 0x4bf   :  { %v3481_v61 = vpop.f32.mrf.mxu3 }
 0x4c0   :  { %v3482_v46 = vadd.f32 %v3481_v61, %v8241_v53  ;;  %v3455_v13 = vpop.f32.mrf.mxu2  ;;  %v3413_v61 = vpop.f32.mrf.mxu1 }
 0x4c2   :  { %v3716_v36 = vmax.f32 %v3482_v46, 0.0 }
 0x4c4   :  { %3679 = vmatmul.bf16.gmra.mxu3 %v8259_v34  ;;  %v3744_v6 = vpack.c.bf16 %v3716_v36, %v3714_v52 }
 0x4c5   :  { %v8343_v9 = vpop.f32.mrf.mxu0 }
 0x4c6   :  { %3903 = vmatmul.bf16.gmra.mxu0 %v3744_v6 }
 0x4c7   :  { %v3484_v30 = vpop.f32.mrf.mxu3 }
 0x4c8   :  { %v3485_v55 = vadd.f32 %v3484_v30, %v8250_v25  ;;  %v3457_v47 = vpop.f32.mrf.mxu2 }
 0x4ca   :  { %v3718_v54 = vmax.f32 %v3485_v55, 0.0 }
 0x4cd   :  { %v8350_v30 = vpop.f32.mrf.mxu0 }
 0x4cf   :  { %v3486_v26 = vpop.f32.mrf.mxu3 }
 0x4d0   :  { %v3487_v53 = vadd.f32 %v3486_v26, %v8255_v2  ;;  %v3460_v17 = vpop.f32.mrf.mxu2 }
 0x4d2   :  { %v3720_v48 = vmax.f32 %v3487_v53, 0.0  ;;  %v3572_v53 = vpop.f32.mrf.mxu1 }
 0x4d4   :  { %3684 = vmatmul.bf16.gmra.mxu3 %v8272_v27  ;;  %v3746_v34 = vpack.c.bf16 %v3720_v48, %v3718_v54 }
 0x4d6   :  { %3908 = vmatmul.bf16.gmra.mxu0 %v3746_v34 }
 0x4d7   :  { %v3489_v35 = vpop.f32.mrf.mxu3 }
 0x4d8   :  { %v3490_v25 = vadd.f32 %v3489_v35, %v8264_v7  ;;  %v3350_v7 = vadd.f32 %v8308_v22, %v8213_v8  ;;  %v3353_v22 = vadd.f32 %v8310_v32, %v8213_v8  ;;  %v3462_v46 = vpop.f32.mrf.mxu2 }
 0x4da   :  { %v3722_v57 = vmax.f32 %v3490_v25, 0.0  ;;  %v3399_v56 = vadd.f32 %v3398_v49, %v3350_v7  ;;  %v3355_v49 = vadd.f32 %v8313_v15, %v8213_v8  ;;  %v3358_v15 = vadd.f32 %v8318_v33, %v8213_v8 }
 0x4dc   :  { %v3448_v45 = vadd.f32 %v3447_v12, %v3399_v56  ;;  %v3402_v12 = vadd.f32 %v3401_v41, %v3353_v22  ;;  %v3404_v36 = vadd.f32 %v3403_v38, %v3355_v49  ;;  %v5601_v41 = vld [vmem:[#allocation5 + $0x40] sm:$0xff]  ;;  %v3360_v38 = vadd.f32 %v8322_v58, %v8213_v8 }
 0x4dd   :  { %3946 = vmatpush.bf16.msrb.mxu1 %v5601_v41  ;;  %v3407_v34 = vadd.f32 %v3406_v63, %v3358_v15  ;;  %v3363_v58 = vadd.f32 %v8325_v4, %v8213_v8 }
 0x4de   :  { %v3451_v52 = vadd.f32 %v3450_v5, %v3402_v12  ;;  %v3453_v6 = vadd.f32 %v3452_v18, %v3404_v36  ;;  %v8357_v18 = vpop.f32.mrf.mxu0  ;;  %v3409_v29 = vadd.f32 %v3408_v42, %v3360_v38 }
 0x4df   :  { %v3491_v62 = vpop.f32.mrf.mxu3  ;;  %v3456_v35 = vadd.f32 %v3455_v13, %v3407_v34  ;;  %v3365_v13 = vadd.f32 %v8330_v14, %v8213_v8  ;;  %v3412_v60 = vadd.f32 %v3411_v1, %v3363_v58  ;;  %v5616_v8 = vld [vmem:[#allocation7 + $0x38] sm:$0xff] }
 0x4e0   :  { %v3492_v2 = vadd.f32 %v3491_v62, %v8269_v11  ;;  %v3446_v11 = vadd.f32 %v3445_v50, %v3397_v3  ;;  %v3621_v48 = vpop.f32.mrf.mxu2  ;;  %v3458_v25 = vadd.f32 %v3457_v47, %v3409_v29  ;;  %v3574_v62 = vpop.f32.mrf.mxu1  ;;  %4080 = vmatpush.bf16.msrb.mxu2 %v5616_v8 }
 0x4e1   :  { %v3461_v7 = vadd.f32 %v3460_v17, %v3412_v60  ;;  %v3414_v3 = vadd.f32 %v3413_v61, %v3365_v13 }
 0x4e2   :  { %v3724_v28 = vmax.f32 %v3492_v2, 0.0 }
 0x4e3   :  { %v3463_v56 = vadd.f32 %v3462_v46, %v3414_v3 }
 0x4e4   :  { %3689 = vmatmul.bf16.gmra.mxu3 %v8280_v31  ;;  %v3748_v27 = vpack.c.bf16 %v3724_v28, %v3722_v57 }
 0x4e6   :  { %3913 = vmatmul.bf16.gmra.mxu0 %v3748_v27  ;;  %v8359_v27 = vpop.f32.mrf.mxu0 }
 0x4e7   :  { %v3494_v20 = vpop.f32.mrf.mxu3 }
 0x4e8   :  { %v3495_v31 = vadd.f32 %v3494_v20, %v3446_v11  ;;  %v3577_v42 = vpop.f32.mrf.mxu1 }
 0x4ea   :  { %v3726_v44 = vmax.f32 %v3495_v31, 0.0 }
 0x4ee   :  { %v8366_v11 = vpop.f32.mrf.mxu0 }
 0x4ef   :  { %v3496_v0 = vpop.f32.mrf.mxu3 }
 0x4f0   :  { %v3497_v51 = vadd.f32 %v3496_v0, %v3448_v45  ;;  %v3579_v4 = vpop.f32.mrf.mxu1 }
 0x4f2   :  { %v3728_v16 = vmax.f32 %v3497_v51, 0.0 }
 0x4f4   :  { %v3750_v21 = vpack.c.bf16 %v3728_v16, %v3726_v44  ;;  %3694 = vmatmul.bf16.gmra.mxu3 %v8288_v23 }
 0x4f6   :  { %3918 = vmatmul.bf16.gmra.mxu0 %v3750_v21  ;;  %v8373_v1 = vpop.f32.mrf.mxu0 }
 0x4f7   :  { %v3499_v50 = vpop.f32.mrf.mxu3 }
 0x4f8   :  { %v3500_v37 = vadd.f32 %v3499_v50, %v3451_v52  ;;  %v3582_v49 = vpop.f32.mrf.mxu1 }
 0x4fa   :  { %v3730_v26 = vmax.f32 %v3500_v37, 0.0 }
 0x4ff   :  { %v3501_v23 = vpop.f32.mrf.mxu3 }
 0x500   :  { %v3502_v55 = vadd.f32 %v3501_v23, %v3453_v6  ;;  %v5615_v23 = vld [vmem:[#allocation7 + $0x30] sm:$0xff] }
 0x501   :  { %4081 = vmatpush.bf16.msrb.mxu2 %v5615_v23 }
 0x502   :  { %v3732_v32 = vmax.f32 %v3502_v55, 0.0 }
 0x504   :  { %v3752_v54 = vpack.c.bf16 %v3732_v32, %v3730_v26  ;;  %3699 = vmatmul.bf16.gmra.mxu3 %v8296_v59  ;;  %v3623_v59 = vpop.f32.mrf.mxu2  ;;  %v3584_v26 = vpop.f32.mrf.mxu1 }
 0x506   :  { %3923 = vmatmul.bf16.gmra.mxu0 %v3752_v54 }
 0x507   :  { %v3504_v5 = vpop.f32.mrf.mxu3 }
 0x508   :  { %v3505_v2 = vadd.f32 %v3504_v5, %v3456_v35 }
 0x50a   :  { %v3734_v33 = vmax.f32 %v3505_v2, 0.0 }
 0x50c   :  { %v3626_v47 = vpop.f32.mrf.mxu2  ;;  %v3587_v34 = vpop.f32.mrf.mxu1 }
 0x50f   :  { %v3506_v57 = vpop.f32.mrf.mxu3 }
 0x510   :  { %v3507_v28 = vadd.f32 %v3506_v57, %v3458_v25 }
 0x512   :  { %v3736_v10 = vmax.f32 %v3507_v28, 0.0 }
 0x514   :  { %v3754_v20 = vpack.c.bf16 %v3736_v10, %v3734_v33  ;;  %3704 = vmatmul.bf16.gmra.mxu3 %v8305_v24  ;;  %v8369_v24 = vperm.slane %v8208_v40, 1  ;;  %v3628_v16 = vpop.f32.mrf.mxu2  ;;  %v3589_v10 = vpop.f32.mrf.mxu1 }
 0x516   :  { %3928 = vmatmul.bf16.gmra.mxu0 %v3754_v20  ;;  %v3524_v14 = vadd.f32 %v8333_v19, %v8369_v24  ;;  %v3526_v22 = vadd.f32 %v8341_v39, %v8369_v24  ;;  %v3529_v55 = vadd.f32 %v8343_v9, %v8369_v24  ;;  %v3543_v9 = vpop.f32.mrf.mxu0  ;;  %v3534_v57 = vadd.f32 %v8357_v18, %v8369_v24 }
 0x517   :  { %v3509_v63 = vpop.f32.mrf.mxu3  ;;  %v3536_v28 = vadd.f32 %v8359_v27, %v8369_v24 }
 0x518   :  { %v3510_v45 = vadd.f32 %v3509_v63, %v3461_v7  ;;  %v3573_v43 = vadd.f32 %v3572_v53, %v3524_v14  ;;  %v3575_v50 = vadd.f32 %v3574_v62, %v3526_v22  ;;  %v3531_v53 = vadd.f32 %v8350_v30, %v8369_v24 }
 0x519   :  { %v3578_v54 = vadd.f32 %v3577_v42, %v3529_v55  ;;  %v3583_v33 = vadd.f32 %v3582_v49, %v3534_v57  ;;  %v3585_v63 = vadd.f32 %v3584_v26, %v3536_v28 }
 0x51a   :  { %v3738_v51 = vmax.f32 %v3510_v45, 0.0  ;;  %v3622_v40 = vadd.f32 %v3621_v48, %v3573_v43  ;;  %v3624_v61 = vadd.f32 %v3623_v59, %v3575_v50  ;;  %v3580_v15 = vadd.f32 %v3579_v4, %v3531_v53  ;;  %v5614_v59 = vld [vmem:[#allocation7 + $0x28] sm:$0xff] }
 0x51b   :  { %v3627_v48 = vadd.f32 %v3626_v47, %v3578_v54  ;;  %4082 = vmatpush.bf16.msrb.mxu2 %v5614_v59  ;;  %v3539_v4 = vadd.f32 %v8366_v11, %v8369_v24 }
 0x51c   :  { %v3631_v12 = vpop.f32.mrf.mxu2  ;;  %v3629_v41 = vadd.f32 %v3628_v16, %v3580_v15  ;;  %v3592_v45 = vpop.f32.mrf.mxu1 }
 0x51d   :  { %v3632_v58 = vadd.f32 %v3631_v12, %v3583_v33  ;;  %v3588_v16 = vadd.f32 %v3587_v34, %v3539_v4  ;;  %v5611_v34 = vld [vmem:[#allocation7 + $0x10] sm:$0xff] }
 0x51e   :  { %v3545_v13 = vpop.f32.mrf.mxu0 }
 0x51f   :  { %v3511_v31 = vpop.f32.mrf.mxu3 }
 0x520   :  { %v3512_v0 = vadd.f32 %v3511_v31, %v3463_v56  ;;  %v5613_v31 = vld [vmem:[#allocation7 + $0x20] sm:$0xff] }
 0x521   :  { %4083 = vmatpush.bf16.msrb.mxu2 %v5613_v31 }
 0x522   :  { %v3740_v44 = vmax.f32 %v3512_v0, 0.0 }
 0x524   :  { %v3756_v21 = vpack.c.bf16 %v3740_v44, %v3738_v51  ;;  %v3633_v39 = vpop.f32.mrf.mxu2  ;;  %v3541_v44 = vadd.f32 %v8373_v1, %v8369_v24  ;;  %v3546_v1 = vadd.f32 %v3545_v13, %v8369_v24 }
 0x525   :  { %v3634_v42 = vadd.f32 %v3633_v39, %v3585_v63 }
 0x526   :  { %3933 = vmatmul.bf16.gmra.mxu0 %v3756_v21  ;;  %v3548_v27 = vpop.f32.mrf.mxu0  ;;  %v3590_v8 = vadd.f32 %v3589_v10, %v3541_v44 }
 0x527   :  { %v3670_v17 = vpop.f32.mrf.mxu3 }
 0x528   :  { %v3671_v46 = vadd.f32 %v3670_v17, %v3622_v40  ;;  %v3594_v17 = vpop.f32.mrf.mxu1 }
 0x529   :  { %v3595_v26 = vadd.f32 %v3594_v17, %v3546_v1 }
 0x52a   :  { %v3711_v6 = vmax.f32 %v3671_v46, 0.0  ;;  %v5612_v46 = vld [vmem:[#allocation7 + $0x18] sm:$0xff] }
 0x52b   :  { %4084 = vmatpush.bf16.msrb.mxu2 %v5612_v46 }
 0x52c   :  { %v3636_v29 = vpop.f32.mrf.mxu2 }
 0x52d   :  { %v3637_v21 = vadd.f32 %v3636_v29, %v3588_v16  ;;  %v3549_v29 = vadd.f32 %v3548_v27, %v8369_v24  ;;  %v5609_v27 = vld [vmem:[#allocation7] sm:$0xff] }
 0x52e   :  { %v3550_v49 = vpop.f32.mrf.mxu0 }
 0x52f   :  { %v3672_v52 = vpop.f32.mrf.mxu3  ;;  %4085 = vmatpush.bf16.msrb.mxu2 %v5611_v34 }
 0x530   :  { %v3673_v36 = vadd.f32 %v3672_v52, %v3624_v61  ;;  %v3544_v52 = vadd.f32 %v3543_v9, %v8369_v24 }
 0x532   :  { %v3713_v37 = vmax.f32 %v3673_v36, 0.0 }
 0x534   :  { %v3743_v19 = vpack.c.bf16 %v3713_v37, %v3711_v6  ;;  %v3638_v20 = vpop.f32.mrf.mxu2  ;;  %v3597_v6 = vpop.f32.mrf.mxu1 }
 0x535   :  { %v3639_v14 = vadd.f32 %v3638_v20, %v3590_v8  ;;  %v3598_v9 = vadd.f32 %v3597_v6, %v3549_v29 }
 0x536   :  { %3947 = vmatmul.bf16.vlgmr.msrb.gmra.mxu1 %v3743_v19  ;;  %v3593_v19 = vadd.f32 %v3592_v45, %v3544_v52  ;;  %v3553_v23 = vpop.f32.mrf.mxu0 }
 0x537   :  { %v3675_v32 = vpop.f32.mrf.mxu3 }
 0x538   :  { %v3676_v5 = vadd.f32 %v3675_v32, %v3627_v48 }
 0x53a   :  { %v3715_v25 = vmax.f32 %v3676_v5, 0.0 }
 0x53c   :  { %v3641_v0 = vpop.f32.mrf.mxu2  ;;  %v3599_v48 = vpop.f32.mrf.mxu1 }
 0x53d   :  { %v3642_v55 = vadd.f32 %v3641_v0, %v3593_v19 }
 0x53f   :  { %v3677_v38 = vpop.f32.mrf.mxu3 }
 0x540   :  { %v3678_v35 = vadd.f32 %v3677_v38, %v3629_v41 }
 0x542   :  { %v3717_v62 = vmax.f32 %v3678_v35, 0.0  ;;  %v3555_v35 = vpop.f32.mrf.mxu0 }
 0x543   :  { %v3556_v45 = vadd.f32 %v3555_v35, %v8369_v24 }
 0x544   :  { %v3745_v2 = vpack.c.bf16 %v3717_v62, %v3715_v25  ;;  %v3643_v43 = vpop.f32.mrf.mxu2  ;;  %v3551_v62 = vadd.f32 %v3550_v49, %v8369_v24  ;;  %v3602_v57 = vpop.f32.mrf.mxu1 }
 0x545   :  { %v3644_v39 = vadd.f32 %v3643_v43, %v3595_v26 }
 0x546   :  { %3952 = vmatmul.bf16.gmra.mxu1 %v3745_v2  ;;  %v3600_v59 = vadd.f32 %v3599_v48, %v3551_v62 }
 0x547   :  { %v3680_v30 = vpop.f32.mrf.mxu3 }
 0x548   :  { %v3681_v47 = vadd.f32 %v3680_v30, %v3632_v58 }
 0x54a   :  { %v3719_v3 = vmax.f32 %v3681_v47, 0.0  ;;  %v3558_v10 = vpop.f32.mrf.mxu0  ;;  %v5610_v47 = vld [vmem:[#allocation7 + $0x8] sm:$0xff] }
 0x54b   :  { %4086 = vmatpush.bf16.msrb.mxu2 %v5610_v47 }
 0x54c   :  { %v3646_v37 = vpop.f32.mrf.mxu2 }
 0x54d   :  { %v3647_v2 = vadd.f32 %v3646_v37, %v3598_v9 }
 0x54f   :  { %v3682_v60 = vpop.f32.mrf.mxu3  ;;  %4087 = vmatpush.bf16.msrb.mxu2 %v5609_v27 }
 0x550   :  { %v3683_v7 = vadd.f32 %v3682_v60, %v3634_v42  ;;  %v3554_v60 = vadd.f32 %v3553_v23, %v8369_v24 }
 0x552   :  { %v3721_v56 = vmax.f32 %v3683_v7, 0.0  ;;  %v3604_v7 = vpop.f32.mrf.mxu1  ;;  %v3603_v31 = vadd.f32 %v3602_v57, %v3554_v60 }
 0x553   :  { %v3605_v4 = vadd.f32 %v3604_v7, %v3556_v45 }
 0x554   :  { %v3747_v18 = vpack.c.bf16 %v3721_v56, %v3719_v3  ;;  %v3648_v5 = vpop.f32.mrf.mxu2 }
 0x555   :  { %v3649_v28 = vadd.f32 %v3648_v5, %v3600_v59 }
 0x556   :  { %3957 = vmatmul.bf16.gmra.mxu1 %v3747_v18  ;;  %v3560_v18 = vpop.f32.mrf.mxu0 }
 0x557   :  { %v3685_v51 = vpop.f32.mrf.mxu3 }
 0x558   :  { %v3686_v22 = vadd.f32 %v3685_v51, %v3637_v21 }
 0x55a   :  { %v3723_v12 = vmax.f32 %v3686_v22, 0.0  ;;  %v3607_v21 = vpop.f32.mrf.mxu1 }
 0x55c   :  { %v3651_v30 = vpop.f32.mrf.mxu2 }
 0x55d   :  { %v3652_v0 = vadd.f32 %v3651_v30, %v3603_v31 }
 0x55e   :  { %v3899_v17 = vpop.f32.mrf.mxu0 }
 0x55f   :  { %v3687_v40 = vpop.f32.mrf.mxu3 }
 0x560   :  { %v3688_v50 = vadd.f32 %v3687_v40, %v3639_v14 }
 0x562   :  { %v3725_v61 = vmax.f32 %v3688_v50, 0.0  ;;  %v3559_v50 = vadd.f32 %v3558_v10, %v8369_v24 }
 0x564   :  { %v3749_v11 = vpack.c.bf16 %v3725_v61, %v3723_v12  ;;  %v3653_v3 = vpop.f32.mrf.mxu2  ;;  %v3561_v12 = vadd.f32 %v3560_v18, %v8369_v24  ;;  %v3608_v61 = vadd.f32 %v3607_v21, %v3559_v50  ;;  %v8400_v24 = vld [vmem:[%s8433_s6] ss:$0 sm:$0xff] }
 0x565   :  { %v3654_v51 = vadd.f32 %v3653_v3, %v3605_v4  ;;  %v3900_v48 = vadd.f32 %v8400_v24, %v3899_v17 }
 0x566   :  { %3962 = vmatmul.bf16.gmra.mxu1 %v3749_v11  ;;  %v3609_v11 = vpop.f32.mrf.mxu1  ;;  %v3901_v52 = vpop.f32.mrf.mxu0 }
 0x567   :  { %v3690_v36 = vpop.f32.mrf.mxu3  ;;  %v3610_v1 = vadd.f32 %v3609_v11, %v3561_v12 }
 0x568   :  { %v3691_v32 = vadd.f32 %v3690_v36, %v3642_v55 }
 0x56a   :  { %v3727_v15 = vmax.f32 %v3691_v32, 0.0 }
 0x56c   :  { %v3656_v14 = vpop.f32.mrf.mxu2 }
 0x56d   :  { %v3657_v36 = vadd.f32 %v3656_v14, %v3608_v61 }
 0x56e   :  { %v3904_v32 = vpop.f32.mrf.mxu0 }
 0x56f   :  { %v3692_v53 = vpop.f32.mrf.mxu3 }
 0x570   :  { %v3693_v54 = vadd.f32 %v3692_v53, %v3644_v39 }
 0x572   :  { %v3729_v41 = vmax.f32 %v3693_v54, 0.0 }
 0x574   :  { %v3751_v38 = vpack.c.bf16 %v3729_v41, %v3727_v15  ;;  %v3658_v46 = vpop.f32.mrf.mxu2  ;;  %v3902_v41 = vadd.f32 %v8400_v24, %v3901_v52 }
 0x575   :  { %v3659_v6 = vadd.f32 %v3658_v46, %v3610_v1 }
 0x576   :  { %3967 = vmatmul.bf16.gmra.mxu1 %v3751_v38  ;;  %v3906_v53 = vpop.f32.mrf.mxu0 }
 0x577   :  { %v3695_v25 = vpop.f32.mrf.mxu3  ;;  %v3907_v59 = vadd.f32 %v8400_v24, %v3906_v53 }
 0x578   :  { %v3696_v33 = vadd.f32 %v3695_v25, %v3647_v2  ;;  %v3905_v2 = vadd.f32 %v8400_v24, %v3904_v32 }
 0x57a   :  { %v3731_v63 = vmax.f32 %v3696_v33, 0.0 }
 0x57e   :  { %v3909_v15 = vpop.f32.mrf.mxu0 }
 0x57f   :  { %v3697_v20 = vpop.f32.mrf.mxu3 }
 0x580   :  { %v3698_v58 = vadd.f32 %v3697_v20, %v3649_v28 }
 0x582   :  { %v3733_v13 = vmax.f32 %v3698_v58, 0.0 }
 0x584   :  { %v3753_v42 = vpack.c.bf16 %v3733_v13, %v3731_v63 }
 0x586   :  { %3972 = vmatmul.bf16.gmra.mxu1 %v3753_v42  ;;  %v3911_v62 = vpop.f32.mrf.mxu0  ;;  %v3910_v42 = vadd.f32 %v8400_v24, %v3909_v15 }
 0x587   :  { %v3700_v56 = vpop.f32.mrf.mxu3  ;;  %v3912_v47 = vadd.f32 %v8400_v24, %v3911_v62 }
 0x588   :  { %v3701_v44 = vadd.f32 %v3700_v56, %v3652_v0 }
 0x58a   :  { %v3735_v22 = vmax.f32 %v3701_v44, 0.0 }
 0x58e   :  { %v3914_v33 = vpop.f32.mrf.mxu0 }
 0x58f   :  { %v3702_v16 = vpop.f32.mrf.mxu3  ;;  %v3915_v4 = vadd.f32 %v8400_v24, %v3914_v33 }
 0x590   :  { %v3703_v8 = vadd.f32 %v3702_v16, %v3654_v51 }
 0x592   :  { %v3737_v43 = vmax.f32 %v3703_v8, 0.0 }
 0x594   :  { %v3755_v40 = vpack.c.bf16 %v3737_v43, %v3735_v22 }
 0x596   :  { %3977 = vmatmul.bf16.gmra.mxu1 %v3755_v40  ;;  %v3916_v13 = vpop.f32.mrf.mxu0 }
 0x597   :  { %v3705_v49 = vpop.f32.mrf.mxu3  ;;  %v3917_v27 = vadd.f32 %v8400_v24, %v3916_v13 }
 0x598   :  { %v3706_v37 = vadd.f32 %v3705_v49, %v3657_v36 }
 0x59a   :  { %v3739_v55 = vmax.f32 %v3706_v37, 0.0 }
 0x59e   :  { %v3919_v31 = vpop.f32.mrf.mxu0 }
 0x59f   :  { %v3707_v19 = vpop.f32.mrf.mxu3  ;;  %v3920_v40 = vadd.f32 %v8400_v24, %v3919_v31 }
 0x5a0   :  { %v3708_v23 = vadd.f32 %v3707_v19, %v3659_v6 }
 0x5a2   :  { %v3741_v26 = vmax.f32 %v3708_v23, 0.0 }
 0x5a4   :  { %v3757_v39 = vpack.c.bf16 %v3741_v26, %v3739_v55 }
 0x5a6   :  { %3982 = vmatmul.bf16.gmra.mxu1 %v3757_v39  ;;  %v3921_v44 = vpop.f32.mrf.mxu0 }
 0x5a7   :  { %v3922_v50 = vadd.f32 %v8400_v24, %v3921_v44 }
 0x5ae   :  { %v3924_v43 = vpop.f32.mrf.mxu0 }
 0x5af   :  { %v3925_v6 = vadd.f32 %v8400_v24, %v3924_v43 }
 0x5b3   :  { %v3948_v54 = vpop.f32.mrf.mxu1 }
 0x5b4   :  { %v3949_v5 = vadd.f32 %v3948_v54, %v3900_v48 }
 0x5b6   :  { %v3988_v35 = vmax.f32 %v3949_v5, 0.0  ;;  %v3926_v52 = vpop.f32.mrf.mxu0 }
 0x5b7   :  { %v3927_v19 = vadd.f32 %v8400_v24, %v3926_v52 }
 0x5bb   :  { %v3950_v38 = vpop.f32.mrf.mxu1 }
 0x5bc   :  { %v3951_v34 = vadd.f32 %v3950_v38, %v3902_v41 }
 0x5be   :  { %v3989_v29 = vmax.f32 %v3951_v34, 0.0  ;;  %v3929_v37 = vpop.f32.mrf.mxu0 }
 0x5bf   :  { %v3930_v15 = vadd.f32 %v8400_v24, %v3929_v37 }
 0x5c0   :  { %v4004_v25 = vpack.c.bf16 %v3989_v29, %v3988_v35 }
 0x5c2   :  { %4088 = vmatmul.bf16.vlgmr.msrb.gmra.mxu2 %v4004_v25 }
 0x5c3   :  { %v3953_v9 = vpop.f32.mrf.mxu1 }
 0x5c4   :  { %v3954_v57 = vadd.f32 %v3953_v9, %v3905_v2 }
 0x5c6   :  { %v3990_v10 = vmax.f32 %v3954_v57, 0.0  ;;  %v3931_v54 = vpop.f32.mrf.mxu0 }
 0x5c7   :  { %v3932_v41 = vadd.f32 %v8400_v24, %v3931_v54 }
 0x5cb   :  { %v3955_v30 = vpop.f32.mrf.mxu1 }
 0x5cc   :  { %v3956_v28 = vadd.f32 %v3955_v30, %v3907_v59 }
 0x5ce   :  { %v3991_v20 = vmax.f32 %v3956_v28, 0.0  ;;  %v3934_v35 = vpop.f32.mrf.mxu0 }
 0x5cf   :  { %v3935_v59 = vadd.f32 %v8400_v24, %v3934_v35 }
 0x5d0   :  { %v4005_v58 = vpack.c.bf16 %v3991_v20, %v3990_v10 }
 0x5d2   :  { %4093 = vmatmul.bf16.gmra.mxu2 %v4005_v58 }
 0x5d3   :  { %v3958_v63 = vpop.f32.mrf.mxu1 }
 0x5d4   :  { %v3959_v60 = vadd.f32 %v3958_v63, %v3910_v42  ;;  %v5650_v63 = vld [vmem:[%s8435_s8] ss:$0 sm:$0xff]  ;;  %s5762_s8 = smov [#allocation8]  }
 0x5d5   :  { %s4149_s27 = sshll.u32 %s5762_s8, 4  ;;  %s4150_s27 = int_to_ptr.vmem [resolvable:$true] %s4149_s27 }
 0x5d6   :  { %v3992_v56 = vmax.f32 %v3959_v60, 0.0  ;;  %v3936_v2 = vpop.f32.mrf.mxu0 }
 0x5d7   :  { %v3937_v57 = vadd.f32 %v8400_v24, %v3936_v2 }
 0x5db   :  { %v3960_v7 = vpop.f32.mrf.mxu1 }
 0x5dc   :  { %v3961_v3 = vadd.f32 %v3960_v7, %v3912_v47 }
 0x5de   :  { %v3993_v45 = vmax.f32 %v3961_v3, 0.0 }
 0x5e0   :  { %v4006_v18 = vpack.c.bf16 %v3993_v45, %v3992_v56 }
 0x5e2   :  { %4098 = vmatmul.bf16.gmra.mxu2 %v4006_v18 }
 0x5e3   :  { %v3963_v0 = vpop.f32.mrf.mxu1 }
 0x5e4   :  { %v3964_v51 = vadd.f32 %v3963_v0, %v3915_v4 }
 0x5e6   :  { %v3994_v8 = vmax.f32 %v3964_v51, 0.0 }
 0x5eb   :  { %v3965_v16 = vpop.f32.mrf.mxu1 }
 0x5ec   :  { %v3966_v21 = vadd.f32 %v3965_v16, %v3917_v27 }
 0x5ee   :  { %v3995_v14 = vmax.f32 %v3966_v21, 0.0 }
 0x5f0   :  { %v4007_v17 = vpack.c.bf16 %v3995_v14, %v3994_v8 }
 0x5f2   :  { %4103 = vmatmul.bf16.gmra.mxu2 %v4007_v17 }
 0x5f3   :  { %v3968_v22 = vpop.f32.mrf.mxu1 }
 0x5f4   :  { %v3969_v49 = vadd.f32 %v3968_v22, %v3920_v40 }
 0x5f6   :  { %v3996_v11 = vmax.f32 %v3969_v49, 0.0 }
 0x5fb   :  { %v3970_v12 = vpop.f32.mrf.mxu1 }
 0x5fc   :  { %v3971_v61 = vadd.f32 %v3970_v12, %v3922_v50 }
 0x5fe   :  { %v3997_v46 = vmax.f32 %v3971_v61, 0.0 }
 0x600   :  { %v4008_v36 = vpack.c.bf16 %v3997_v46, %v3996_v11 }
 0x602   :  { %4108 = vmatmul.bf16.gmra.mxu2 %v4008_v36 }
 0x603   :  { %v3973_v1 = vpop.f32.mrf.mxu1 }
 0x604   :  { %v3974_v23 = vadd.f32 %v3973_v1, %v3925_v6 }
 0x606   :  { %v3998_v39 = vmax.f32 %v3974_v23, 0.0 }
 0x60b   :  { %v3975_v55 = vpop.f32.mrf.mxu1 }
 0x60c   :  { %v3976_v26 = vadd.f32 %v3975_v55, %v3927_v19 }
 0x60e   :  { %v3999_v32 = vmax.f32 %v3976_v26, 0.0 }
 0x610   :  { %v4009_v53 = vpack.c.bf16 %v3999_v32, %v3998_v39 }
 0x612   :  { %4113 = vmatmul.bf16.gmra.mxu2 %v4009_v53 }
 0x613   :  { %v3978_v48 = vpop.f32.mrf.mxu1 }
 0x614   :  { %v3979_v5 = vadd.f32 %v3978_v48, %v3930_v15 }
 0x616   :  { %v4000_v29 = vmax.f32 %v3979_v5, 0.0 }
 0x61b   :  { %v3980_v38 = vpop.f32.mrf.mxu1 }
 0x61c   :  { %v3981_v34 = vadd.f32 %v3980_v38, %v3932_v41 }
 0x61e   :  { %v4001_v25 = vmax.f32 %v3981_v34, 0.0 }
 0x620   :  { %v4010_v62 = vpack.c.bf16 %v4001_v25, %v4000_v29 }
 0x622   :  { %4118 = vmatmul.bf16.gmra.mxu2 %v4010_v62 }
 0x623   :  { %v3983_v9 = vpop.f32.mrf.mxu1 }
 0x624   :  { %v3984_v30 = vadd.f32 %v3983_v9, %v3935_v59 }
 0x626   :  { %v4002_v10 = vmax.f32 %v3984_v30, 0.0 }
 0x62b   :  { %v3985_v28 = vpop.f32.mrf.mxu1 }
 0x62c   :  { %v3986_v33 = vadd.f32 %v3985_v28, %v3937_v57 }
 0x62e   :  { %v4003_v20 = vmax.f32 %v3986_v33, 0.0 }
 0x630   :  { %v4011_v58 = vpack.c.bf16 %v4003_v20, %v4002_v10 }
 0x632   :  { %4123 = vmatmul.bf16.gmra.mxu2 %v4011_v58 }
 0x645   :  { %v4089_v13 = vpop.f32.mrf.mxu2 }
 0x646   :  { %v4090_v42 = vadd.f32 %v5650_v63, %v4089_v13 }
 0x648   :  { %4129 = vst [vmem:[#allocation8] sm:$0xff] %v4090_v42 }
 0x64d   :  { %v4091_v47 = vpop.f32.mrf.mxu2 }
 0x64e   :  { %v4092_v60 = vadd.f32 %v5650_v63, %v4091_v47 }
 0x650   :  { %4130 = vst [vmem:[#allocation8 + $0x8] sm:$0xff] %v4092_v60 }
 0x655   :  { %v4094_v7 = vpop.f32.mrf.mxu2 }
 0x656   :  { %v4095_v3 = vadd.f32 %v5650_v63, %v4094_v7 }
 0x658   :  { %4131 = vst [vmem:[#allocation8 + $0x10] sm:$0xff] %v4095_v3 }
 0x65d   :  { %v4096_v24 = vpop.f32.mrf.mxu2 }
 0x65e   :  { %v4097_v56 = vadd.f32 %v5650_v63, %v4096_v24 }
 0x660   :  { %4132 = vst [vmem:[#allocation8 + $0x18] sm:$0xff] %v4097_v56 }
 0x665   :  { %v4099_v45 = vpop.f32.mrf.mxu2 }
 0x666   :  { %v4100_v18 = vadd.f32 %v5650_v63, %v4099_v45 }
 0x668   :  { %4133 = vst [vmem:[#allocation8 + $0x20] sm:$0xff] %v4100_v18 }
 0x66d   :  { %v4101_v31 = vpop.f32.mrf.mxu2 }
 0x66e   :  { %v4102_v0 = vadd.f32 %v5650_v63, %v4101_v31 }
 0x670   :  { %4134 = vst [vmem:[#allocation8 + $0x28] sm:$0xff] %v4102_v0 }
 0x675   :  { %v4104_v4 = vpop.f32.mrf.mxu2 }
 0x676   :  { %v4105_v27 = vadd.f32 %v5650_v63, %v4104_v4 }
 0x678   :  { %4135 = vst [vmem:[#allocation8 + $0x30] sm:$0xff] %v4105_v27 }
 0x67d   :  { %v4106_v51 = vpop.f32.mrf.mxu2 }
 0x67e   :  { %v4107_v44 = vadd.f32 %v5650_v63, %v4106_v51 }
 0x680   :  { %4136 = vst [vmem:[#allocation8 + $0x38] sm:$0xff] %v4107_v44 }
 0x685   :  { %v4109_v16 = vpop.f32.mrf.mxu2 }
 0x686   :  { %v4110_v21 = vadd.f32 %v5650_v63, %v4109_v16 }
 0x688   :  { %4137 = vst [vmem:[#allocation8 + $0x40] sm:$0xff] %v4110_v21 }
 0x68d   :  { %v4111_v8 = vpop.f32.mrf.mxu2 }
 0x68e   :  { %v4112_v14 = vadd.f32 %v5650_v63, %v4111_v8 }
 0x690   :  { %4138 = vst [vmem:[#allocation8 + $0x48] sm:$0xff] %v4112_v14 }
 0x695   :  { %v4114_v17 = vpop.f32.mrf.mxu2 }
 0x696   :  { %v4115_v22 = vadd.f32 %v5650_v63, %v4114_v17 }
 0x698   :  { %4139 = vst [vmem:[#allocation8 + $0x50] sm:$0xff] %v4115_v22 }
 0x69d   :  { %v4116_v43 = vpop.f32.mrf.mxu2 }
 0x69e   :  { %v4117_v40 = vadd.f32 %v5650_v63, %v4116_v43 }
 0x6a0   :  { %4140 = vst [vmem:[#allocation8 + $0x58] sm:$0xff] %v4117_v40 }
 0x6a5   :  { %v4119_v50 = vpop.f32.mrf.mxu2 }
 0x6a6   :  { %v4120_v49 = vadd.f32 %v5650_v63, %v4119_v50 }
 0x6a8   :  { %4141 = vst [vmem:[#allocation8 + $0x60] sm:$0xff] %v4120_v49 }
 0x6ad   :  { %v4121_v12 = vpop.f32.mrf.mxu2 }
 0x6ae   :  { %v4122_v61 = vadd.f32 %v5650_v63, %v4121_v12 }
 0x6b0   :  { %4142 = vst [vmem:[#allocation8 + $0x68] sm:$0xff] %v4122_v61 }
 0x6b5   :  { %v4124_v11 = vpop.f32.mrf.mxu2 }
 0x6b6   :  { %v4125_v46 = vadd.f32 %v5650_v63, %v4124_v11 }
 0x6b8   :  { %4143 = vst [vmem:[#allocation8 + $0x70] sm:$0xff] %v4125_v46 }
 0x6bd   :  { %v4126_v52 = vpop.f32.mrf.mxu2 }
 0x6be   :  { %v4127_v36 = vadd.f32 %v5650_v63, %v4126_v52 }
 0x6c0   :  { %4144 = vst [vmem:[#allocation8 + $0x78] sm:$0xff] %v4127_v36 }
 0x6c1   :  { %4157 = dma.vmem_to_hbm [thread:$0]  %s4150_s27, 2048, %s4152_s0, [#allocation4], %s5759_s21, %s5759_s21, %s5760_s22  }
 0x6c2   :  { %5753 = dma.done.wait [#allocation4], 2048  }
 0x6c3   :  { %5754 = vsyncadd [#allocation4], 4294965248 }
 0x6c4   :  { %4162 = vsyncpa [#allocation3], 1 }
 0x6c5   :  { %4163 = vsyncpa [#allocation6], 1 }
 0x6c6   :  { %4164 = vsyncpa [#allocation4], 1 }

</bundles_post_ra>
